<compile_context>
chip_gen: v6e
topology: v6e:2x2x1
jax: 0.10.0
libtpu: 0.0.40
codegen_flags: <defaults>
</compile_context>

<pallas_src>
import functools
from collections import OrderedDict

import jax
import jax.numpy as jnp
from jax import lax
from jax.experimental import pallas as pl
from jax.experimental.pallas import tpu as pltpu


# (name, in_channels, out_channels, stride) -- one BasicBlock per layer
_BLOCK_CFG = (
    ("layer1", 16, 16, 1),
    ("layer2", 16, 32, 2),
    ("layer3", 32, 64, 2),
    ("layer4", 64, 128, 2),
)
_STEM_OUT = 16
_NUM_CHANNELS = _BLOCK_CFG[-1][2]

_TILE_M_MAX = 1024              # bigger M tiles amortize per-step pipeline overhead
_VMEM_LIMIT = 32 * 1024 * 1024  # safe on v5e/v6e (128 MiB) and v7x (64 MiB) VMEM


def _round_up(x, m):
    return (x + m - 1) // m * m


def _choose_tile_m(m):
    """Pick an M tile that (a) divides m exactly (no XLA pad/slice round trip),
    (b) is a multiple of 8 unless it equals m (sublane rule), (c) is capped at
    _TILE_M_MAX, and (d) yields >= 2 grid steps whenever m >= 512 so both v7x
    TensorCores get work.  Returns 0 if no clean divisor exists (pad fallback).
    """
    if m <= 256:
        return m                                  # single full block (always legal)
    cap = min(_TILE_M_MAX, m // 2 if m >= 512 else m)
    start = cap - (cap % 8)
    for t in range(start, 7, -8):
        if m % t == 0:
            return t
    return m if m <= 2048 else 0                  # full block, else pad fallback


# ---------------------------------------------------------------------------
# Pallas kernels
# ---------------------------------------------------------------------------
def _conv_kernel(a_ref, w_ref, b_ref, o_ref, *, relu):
    acc = jnp.dot(a_ref[...], w_ref[...], preferred_element_type=jnp.float32)
    acc = acc + b_ref[...]
    if relu:
        acc = jnp.maximum(acc, 0.0)
    o_ref[...] = acc.astype(o_ref.dtype)


def _conv_res_kernel(a_ref, w_ref, b_ref, r_ref, o_ref, *, relu):
    acc = jnp.dot(a_ref[...], w_ref[...], preferred_element_type=jnp.float32)
    acc = acc + b_ref[...] + r_ref[...].astype(jnp.float32)
    if relu:
        acc = jnp.maximum(acc, 0.0)
    o_ref[...] = acc.astype(o_ref.dtype)


def _conv_down_kernel(a_ref, w_ref, b_ref, ad_ref, wd_ref, bd_ref, o_ref, *, relu):
    # conv2 + BN + fused 1x1-downsample residual (its own conv + BN) + ReLU
    acc = jnp.dot(a_ref[...], w_ref[...], preferred_element_type=jnp.float32)
    acc = acc + jnp.dot(ad_ref[...], wd_ref[...], preferred_element_type=jnp.float32)
    acc = acc + b_ref[...] + bd_ref[...]
    if relu:
        acc = jnp.maximum(acc, 0.0)
    o_ref[...] = acc.astype(o_ref.dtype)


def _maxpool3x3_kernel(p_ref, o_ref, *, h, w):
    # p_ref: [1, h+2, w+2, C] (-inf padded); stride-1 "same" 3x3 max (pure VPU,
    # C stays on the lane axis).  Stride-2 subsampling happens in the wrapper.
    x = p_ref[0]
    m = None
    for dh in range(3):
        for dw in range(3):
            v = x[dh:dh + h, dw:dw + w, :]
            m = v if m is None else jnp.maximum(m, v)
    o_ref[0] = m


# ---------------------------------------------------------------------------
# Fused matmul wrapper: M-tiled grid, bf16 operands, f32 accumulation
# ---------------------------------------------------------------------------
def _fused_matmul(a, w, b, *, relu, res=None, down=None):
    """out = act( a @ w + b [+ res] [+ ad @ wd + bd] )  in bf16."""
    m, k = a.shape
    o = w.shape[1]

    tile_m = _choose_tile_m(m)
    if tile_m == 0:
        # rare fallback: M has no clean multiple-of-8 divisor and is large.
        tile_m = _TILE_M_MAX
        m_pad = _round_up(m, tile_m)
        a = jnp.pad(a, ((0, m_pad - m), (0, 0)))
        if res is not None:
            res = jnp.pad(res, ((0, m_pad - m), (0, 0)))
        if down is not None:
            ad, wd, bd = down
            down = (jnp.pad(ad, ((0, m_pad - m), (0, 0))), wd, bd)
    else:
        m_pad = m

    grid = (m_pad // tile_m,)
    a_spec = pl.BlockSpec((tile_m, k), lambda i: (i, 0))
    w_spec = pl.BlockSpec((k, o), lambda i: (0, 0))
    b_spec = pl.BlockSpec((1, o), lambda i: (0, 0))
    r_spec = pl.BlockSpec((tile_m, o), lambda i: (i, 0))
    o_spec = pl.BlockSpec((tile_m, o), lambda i: (i, 0))
    out_shape = jax.ShapeDtypeStruct((m_pad, o), jnp.bfloat16)

    flops = 2 * m_pad * k * o
    bytes_accessed = (a.size * a.dtype.itemsize + w.size * 2 + b.size * 4
                      + m_pad * o * 2)

    cparams = pltpu.CompilerParams(
        dimension_semantics=("parallel",),       # shards M-tiles across TCs on v7x
        vmem_limit_bytes=_VMEM_LIMIT,
    )

    if down is not None:
        ad, wd, bd = down
        kd = ad.shape[1]
        flops += 2 * m_pad * kd * o
        bytes_accessed += ad.size * 2 + wd.size * 2 + bd.size * 4
        y = pl.pallas_call(
            functools.partial(_conv_down_kernel, relu=relu),
            grid=grid,
            in_specs=[a_spec, w_spec, b_spec,
                      pl.BlockSpec((tile_m, kd), lambda i: (i, 0)),
                      pl.BlockSpec((kd, o), lambda i: (0, 0)),
                      pl.BlockSpec((1, o), lambda i: (0, 0))],
            out_specs=o_spec,
            out_shape=out_shape,
            compiler_params=cparams,
            cost_estimate=pl.CostEstimate(flops=flops, transcendentals=0,
                                          bytes_accessed=bytes_accessed),
        )(a, w, b, ad, wd, bd)
    elif res is not None:
        bytes_accessed += res.size * 2
        y = pl.pallas_call(
            functools.partial(_conv_res_kernel, relu=relu),
            grid=grid,
            in_specs=[a_spec, w_spec, b_spec, r_spec],
            out_specs=o_spec,
            out_shape=out_shape,
            compiler_params=cparams,
            cost_estimate=pl.CostEstimate(flops=flops, transcendentals=0,
                                          bytes_accessed=bytes_accessed),
        )(a, w, b, res)
    else:
        y = pl.pallas_call(
            functools.partial(_conv_kernel, relu=relu),
            grid=grid,
            in_specs=[a_spec, w_spec, b_spec],
            out_specs=o_spec,
            out_shape=out_shape,
            compiler_params=cparams,
            cost_estimate=pl.CostEstimate(flops=flops, transcendentals=0,
                                          bytes_accessed=bytes_accessed),
        )(a, w, b)
    return y[:m] if m_pad != m else y


# ---------------------------------------------------------------------------
# Conv / maxpool wrappers (NHWC bf16 activations, REAL channel counts)
# ---------------------------------------------------------------------------
def _im2col_nhwc(x, kh, kw, stride, pad):
    """NHWC x -> [N*Ho*Wo, kh*kw*C] (column order (dh, dw, c))."""
    n, h, w, c = x.shape
    ho = (h + 2 * pad - kh) // stride + 1
    wo = (w + 2 * pad - kw) // stride + 1
    xp = jnp.pad(x, ((0, 0), (pad, pad), (pad, pad), (0, 0))) if pad else x
    cols = []
    for dh in range(kh):
        for dw in range(kw):
            cols.append(lax.slice(
                xp, (0, dh, dw, 0),
                (n, dh + stride * (ho - 1) + 1, dw + stride * (wo - 1) + 1, c),
                (1, stride, stride, 1)))
    a = cols[0] if len(cols) == 1 else jnp.concatenate(cols, axis=-1)
    return a.reshape(n * ho * wo, kh * kw * c), (n, ho, wo)


def conv_bn(x, wm, bias, *, kh, kw, stride, pad, relu, residual=None, down=None):
    """Conv2d (no bias) + folded BN (+ residual / fused downsample) (+ ReLU)."""
    a, (n, ho, wo) = _im2col_nhwc(x, kh, kw, stride, pad)
    o = wm.shape[1]
    y = _fused_matmul(a, wm, bias, relu=relu, res=residual, down=down)
    return y.reshape(n, ho, wo, o)


def maxpool_3x3_s2(x):
    """MaxPool2d(kernel=3, stride=2, padding=1), NHWC, -inf padding."""
    n, h, w, c = x.shape
    xp = jnp.pad(x, ((0, 0), (1, 1), (1, 1), (0, 0)), constant_values=-jnp.inf)
    y = pl.pallas_call(
        functools.partial(_maxpool3x3_kernel, h=h, w=w),
        grid=(n,),
        in_specs=[pl.BlockSpec((1, h + 2, w + 2, c), lambda i: (i, 0, 0, 0))],
        out_specs=pl.BlockSpec((1, h, w, c), lambda i: (i, 0, 0, 0)),
        out_shape=jax.ShapeDtypeStruct((n, h, w, c), x.dtype),
        compiler_params=pltpu.CompilerParams(
            dimension_semantics=("parallel",), vmem_limit_bytes=_VMEM_LIMIT),
    )(xp)
    return y[:, ::2, ::2, :]


# ---------------------------------------------------------------------------
# ResNet body (stem + layer1..layer4, BasicBlocks, eval-mode BN folded)
# ---------------------------------------------------------------------------
def _basic_block(x, blk, stride):
    out = conv_bn(x, blk["w1"], blk["b1"], kh=3, kw=3, stride=stride, pad=1, relu=True)
    n, ho, wo, cout = out.shape
    m = n * ho * wo
    if "wd" in blk:
        # 1x1-stride-s downsample: its "im2col" is just the strided NHWC view.
        ad = x[:, ::stride, ::stride, :].reshape(m, x.shape[-1])
        return conv_bn(out, blk["w2"], blk["b2"], kh=3, kw=3, stride=1, pad=1,
                       relu=True, down=(ad, blk["wd"], blk["bd"]))
    res = x.reshape(m, cout)
    return conv_bn(out, blk["w2"], blk["b2"], kh=3, kw=3, stride=1, pad=1,
                   relu=True, residual=res)


@functools.partial(jax.jit, static_argnames=("return_interm_layers",))
def backbone_forward(params, tensor, *, return_interm_layers=False):
    # NCHW -> NHWC bf16 once, at the boundary.
    x = jnp.transpose(tensor, (0, 2, 3, 1)).astype(jnp.bfloat16)
    # stem: conv7x7/s2 + BN + ReLU, then maxpool3x3/s2
    x = conv_bn(x, params["stem"]["w"], params["stem"]["b"],
                kh=7, kw=7, stride=2, pad=3, relu=True)
    x = maxpool_3x3_s2(x)

    feats = []
    for (name, cin, cout, stride) in _BLOCK_CFG:
        x = _basic_block(x, params[name], stride)
        feats.append(x)

    selected = feats if return_interm_layers else [feats[-1]]
    # back to NCHW f32 at the boundary (channels are already the real counts)
    return tuple(jnp.transpose(f, (0, 3, 1, 2)).astype(jnp.float32)
                 for f in selected)


class ResNetFilmBackboneBase:
    """JAX/Pallas port of the PyTorch ResNetFilmBackboneBase (forward only)."""

    def __init__(self, backbone_params, film_params, num_channels, return_interm_layers):
        # film_params is stored but unused by the base forward, exactly like the
        # reference module (self.body does not invoke the FiLM generators).
        self.params = prepare_params(backbone_params)
        self.film_params = film_params
        self.num_channels = num_channels
        self.return_interm_layers = return_interm_layers

    def forward(self, tensor):
        feats = backbone_forward(self.params, tensor,
                                 return_interm_layers=self.return_interm_layers)
        xs = OrderedDict()
        for idx, f in enumerate(feats):
            xs[str(idx)] = f
        return xs

    __call__ = forward


# ---------------------------------------------------------------------------
# Parameter preparation: fold BN scale into weights, transpose to
# [kh*kw*Cin, Cout] im2col layout (REAL channel counts), cast to bf16.
# ---------------------------------------------------------------------------
def _prep_conv(w, scale, bias):
    o, i, kh, kw = w.shape
    wm = jnp.transpose(w, (2, 3, 1, 0)) * scale.reshape(1, 1, 1, o)   # fold BN scale
    wm = wm.reshape(kh * kw * i, o).astype(jnp.bfloat16)
    bp = bias.reshape(1, o).astype(jnp.float32)
    return wm, bp


def prepare_params(raw):
    p = {}
    wm, bp = _prep_conv(raw["stem"]["w"], raw["stem"]["scale"], raw["stem"]["bias"])
    p["stem"] = {"w": wm, "b": bp}
    for (name, cin, cout, stride) in _BLOCK_CFG:
        blk = raw[name]
        w1, b1 = _prep_conv(blk["conv1_w"], blk["bn1_scale"], blk["bn1_bias"])
        w2, b2 = _prep_conv(blk["conv2_w"], blk["bn2_scale"], blk["bn2_bias"])
        d = {"w1": w1, "b1": b1, "w2": w2, "b2": b2}
        if "down_w" in blk:
            wd, bd = _prep_conv(blk["down_w"], blk["dbn_scale"], blk["dbn_bias"])
            d["wd"] = wd
            d["bd"] = bd
        p[name] = d
    return p


# ---------------------------------------------------------------------------
# Deterministic raw parameter construction (synthetic weights, eval-mode BN)
# ---------------------------------------------------------------------------
def _he_init(key, shape):
    fan_in = shape[1] * shape[2] * shape[3]
    std = (2.0 / fan_in) ** 0.5
    return (std * jax.random.normal(key, shape, jnp.float32)).astype(jnp.float32)


def _bn_fold(kg, kb, c, eps=1e-5):
    gamma = 1.0 + 0.1 * jax.random.normal(kg, (c,), jnp.float32)
    beta = 0.1 * jax.random.normal(kb, (c,), jnp.float32)
    running_mean = jnp.zeros((c,), jnp.float32)
    running_var = jnp.ones((c,), jnp.float32)
    scale = gamma / jnp.sqrt(running_var + eps)
    bias = beta - running_mean * scale
    return scale, bias


def init_backbone_params(key):
    keys = iter(jax.random.split(key, 64))
    params = {}
    w = _he_init(next(keys), (_STEM_OUT, 3, 7, 7))
    s, b = _bn_fold(next(keys), next(keys), _STEM_OUT)
    params["stem"] = dict(w=w, scale=s, bias=b)
    for (name, cin, cout, stride) in _BLOCK_CFG:
        blk = {}
        blk["conv1_w"] = _he_init(next(keys), (cout, cin, 3, 3))
        blk["bn1_scale"], blk["bn1_bias"] = _bn_fold(next(keys), next(keys), cout)
        blk["conv2_w"] = _he_init(next(keys), (cout, cout, 3, 3))
        blk["bn2_scale"], blk["bn2_bias"] = _bn_fold(next(keys), next(keys), cout)
        if stride != 1 or cin != cout:
            blk["down_w"] = _he_init(next(keys), (cout, cin, 1, 1))
            blk["dbn_scale"], blk["dbn_bias"] = _bn_fold(next(keys), next(keys), cout)
        params[name] = blk
    return params


if __name__ == "__main__":
    key = jax.random.PRNGKey(0)
    kx, kp = jax.random.split(key)

    raw_params = init_backbone_params(kp)
    model = ResNetFilmBackboneBase(
        raw_params, film_params=None,
        num_channels=_NUM_CHANNELS, return_interm_layers=False,
    )

    # PyTorch-style NCHW input
    x = jax.random.normal(kx, (2, 3, 32, 32), jnp.float32)

    xs = model(x)
    for name, feat in xs.items():
        jax.block_until_ready(feat)
        assert jnp.all(jnp.isfinite(feat))

    # return_interm_layers=False -> OrderedDict {'0': layer4 features [N, 128, 1, 1]}
    assert list(xs.keys()) == ["0"]
    assert xs["0"].shape == (2, _NUM_CHANNELS, 1, 1)
    print("KERNEL_OK")
</pallas_src>

<mosaic_0001>
module attributes {stable_mosaic.version = 11 : i64} {
  func.func @_conv_kernel(%arg0: i32, %arg1: memref<256x147xbf16, #tpu.memory_space<vmem>>, %arg2: memref<147x16xbf16, #tpu.memory_space<vmem>>, %arg3: memref<1x16xf32, #tpu.memory_space<vmem>>, %arg4: memref<256x16xbf16, #tpu.memory_space<vmem>>) attributes {dimension_semantics = [#tpu.dimension_semantics<parallel>], iteration_bounds = array<i64: 2>, scalar_prefetch = 0 : i64, scratch_operands = 0 : i64, tpu.core_type = #tpu.core_type<tc>, window_params = [{transform_indices = @transform_0, window_bounds = array<i64: 256, 147>}, {pipeline_mode = #tpu.pipeline_mode<synchronous>, transform_indices = @transform_1, window_bounds = array<i64: 147, 16>}, {pipeline_mode = #tpu.pipeline_mode<synchronous>, transform_indices = @transform_2, window_bounds = array<i64: 1, 16>}, {transform_indices = @transform_3, window_bounds = array<i64: 256, 16>}]} {
    %c0 = arith.constant 0 : index
    %c0_0 = arith.constant 0 : index
    %0 = vector.load %arg1[%c0, %c0_0] : memref<256x147xbf16, #tpu.memory_space<vmem>>, vector<256x147xbf16>
    %c0_1 = arith.constant 0 : index
    %c0_2 = arith.constant 0 : index
    %1 = vector.load %arg2[%c0_1, %c0_2] : memref<147x16xbf16, #tpu.memory_space<vmem>>, vector<147x16xbf16>
    %cst = arith.constant dense<0.000000e+00> : vector<256x16xf32>
    %2 = tpu.matmul %0, %1, %cst {dimension_numbers = #tpu.dot_dimension_numbers<[1], [0], [0], [1], [0, 0, 1, 1], [], []>} : vector<256x147xbf16>, vector<147x16xbf16>, vector<256x16xf32> -> vector<256x16xf32>
    %c0_3 = arith.constant 0 : index
    %c0_4 = arith.constant 0 : index
    %3 = vector.load %arg3[%c0_3, %c0_4] : memref<1x16xf32, #tpu.memory_space<vmem>>, vector<1x16xf32>
    %4 = vector.broadcast %3 : vector<1x16xf32> to vector<256x16xf32>
    %5 = arith.addf %2, %4 : vector<256x16xf32>
    %cst_5 = arith.constant 0.000000e+00 : f32
    %6 = vector.broadcast %cst_5 : f32 to vector<256x16xf32>
    %7 = arith.maximumf %5, %6 : vector<256x16xf32>
    %8 = arith.truncf %7 : vector<256x16xf32> to vector<256x16xbf16>
    %c0_6 = arith.constant 0 : index
    %c0_7 = arith.constant 0 : index
    %9 = vector.load %arg4[%c0_6, %c0_7] : memref<256x16xbf16, #tpu.memory_space<vmem>>, vector<256x16xbf16>
    tpu.vector_store %arg4[%c0_6, %c0_7], %8 {strides = array<i32>} : memref<256x16xbf16, #tpu.memory_space<vmem>>, vector<256x16xbf16>,
    return
  }
  func.func @transform_0(%arg0: i32) -> (i32, i32) {
    %c0_i32 = arith.constant 0 : i32
    %c0_i32_0 = arith.constant 0 : i32
    return %arg0, %c0_i32 : i32, i32
  }
  func.func @transform_1(%arg0: i32) -> (i32, i32) {
    %c0_i32 = arith.constant 0 : i32
    %c0_i32_0 = arith.constant 0 : i32
    %c0_i32_1 = arith.constant 0 : i32
    return %c0_i32, %c0_i32_0 : i32, i32
  }
  func.func @transform_2(%arg0: i32) -> (i32, i32) {
    %c0_i32 = arith.constant 0 : i32
    %c0_i32_0 = arith.constant 0 : i32
    %c0_i32_1 = arith.constant 0 : i32
    return %c0_i32, %c0_i32_0 : i32, i32
  }
  func.func @transform_3(%arg0: i32) -> (i32, i32) {
    %c0_i32 = arith.constant 0 : i32
    %c0_i32_0 = arith.constant 0 : i32
    return %arg0, %c0_i32 : i32, i32
  }
}

module attributes {stable_mosaic.version = 11 : i64} {
  func.func @_maxpool3x3_kernel(%arg0: i32, %arg1: memref<1x18x18x16xbf16, #tpu.memory_space<vmem>>, %arg2: memref<1x16x16x16xbf16, #tpu.memory_space<vmem>>) attributes {dimension_semantics = [#tpu.dimension_semantics<parallel>], iteration_bounds = array<i64: 2>, scalar_prefetch = 0 : i64, scratch_operands = 0 : i64, tpu.core_type = #tpu.core_type<tc>, window_params = [{transform_indices = @transform_0, window_bounds = array<i64: 1, 18, 18, 16>}, {transform_indices = @transform_1, window_bounds = array<i64: 1, 16, 16, 16>}]} {
    %c0 = arith.constant 0 : index
    %c0_0 = arith.constant 0 : index
    %c0_1 = arith.constant 0 : index
    %c0_2 = arith.constant 0 : index
    %0 = vector.load %arg1[%c0, %c0_0, %c0_1, %c0_2] : memref<1x18x18x16xbf16, #tpu.memory_space<vmem>>, vector<1x18x18x16xbf16>
    %1 = vector.shape_cast %0 : vector<1x18x18x16xbf16> to vector<18x18x16xbf16>
    %2 = vector.extract_strided_slice %1 {offsets = [0, 0, 0], sizes = [16, 16, 16], strides = [1, 1, 1]} : vector<18x18x16xbf16> to vector<16x16x16xbf16>
    %3 = vector.extract_strided_slice %1 {offsets = [0, 1, 0], sizes = [16, 16, 16], strides = [1, 1, 1]} : vector<18x18x16xbf16> to vector<16x16x16xbf16>
    %4 = arith.maximumf %2, %3 : vector<16x16x16xbf16>
    %5 = vector.extract_strided_slice %1 {offsets = [0, 2, 0], sizes = [16, 16, 16], strides = [1, 1, 1]} : vector<18x18x16xbf16> to vector<16x16x16xbf16>
    %6 = arith.maximumf %4, %5 : vector<16x16x16xbf16>
    %7 = vector.extract_strided_slice %1 {offsets = [1, 0, 0], sizes = [16, 16, 16], strides = [1, 1, 1]} : vector<18x18x16xbf16> to vector<16x16x16xbf16>
    %8 = arith.maximumf %6, %7 : vector<16x16x16xbf16>
    %9 = vector.extract_strided_slice %1 {offsets = [1, 1, 0], sizes = [16, 16, 16], strides = [1, 1, 1]} : vector<18x18x16xbf16> to vector<16x16x16xbf16>
    %10 = arith.maximumf %8, %9 : vector<16x16x16xbf16>
    %11 = vector.extract_strided_slice %1 {offsets = [1, 2, 0], sizes = [16, 16, 16], strides = [1, 1, 1]} : vector<18x18x16xbf16> to vector<16x16x16xbf16>
    %12 = arith.maximumf %10, %11 : vector<16x16x16xbf16>
    %13 = vector.extract_strided_slice %1 {offsets = [2, 0, 0], sizes = [16, 16, 16], strides = [1, 1, 1]} : vector<18x18x16xbf16> to vector<16x16x16xbf16>
    %14 = arith.maximumf %12, %13 : vector<16x16x16xbf16>
    %15 = vector.extract_strided_slice %1 {offsets = [2, 1, 0], sizes = [16, 16, 16], strides = [1, 1, 1]} : vector<18x18x16xbf16> to vector<16x16x16xbf16>
    %16 = arith.maximumf %14, %15 : vector<16x16x16xbf16>
    %17 = vector.extract_strided_slice %1 {offsets = [2, 2, 0], sizes = [16, 16, 16], strides = [1, 1, 1]} : vector<18x18x16xbf16> to vector<16x16x16xbf16>
    %18 = arith.maximumf %16, %17 : vector<16x16x16xbf16>
    %c0_3 = arith.constant 0 : index
    %c0_4 = arith.constant 0 : index
    %c0_5 = arith.constant 0 : index
    %c0_6 = arith.constant 0 : index
    %19 = vector.load %arg2[%c0_3, %c0_4, %c0_5, %c0_6] : memref<1x16x16x16xbf16, #tpu.memory_space<vmem>>, vector<1x16x16x16xbf16>
    %20 = vector.shape_cast %19 : vector<1x16x16x16xbf16> to vector<16x16x16xbf16>
    %21 = vector.shape_cast %18 : vector<16x16x16xbf16> to vector<1x16x16x16xbf16>
    tpu.vector_store %arg2[%c0_3, %c0_4, %c0_5, %c0_6], %21 {strides = array<i32>} : memref<1x16x16x16xbf16, #tpu.memory_space<vmem>>, vector<1x16x16x16xbf16>,
    return
  }
  func.func @transform_0(%arg0: i32) -> (i32, i32, i32, i32) {
    %c0_i32 = arith.constant 0 : i32
    %c0_i32_0 = arith.constant 0 : i32
    %c0_i32_1 = arith.constant 0 : i32
    %c0_i32_2 = arith.constant 0 : i32
    return %arg0, %c0_i32, %c0_i32_0, %c0_i32_1 : i32, i32, i32, i32
  }
  func.func @transform_1(%arg0: i32) -> (i32, i32, i32, i32) {
    %c0_i32 = arith.constant 0 : i32
    %c0_i32_0 = arith.constant 0 : i32
    %c0_i32_1 = arith.constant 0 : i32
    %c0_i32_2 = arith.constant 0 : i32
    return %arg0, %c0_i32, %c0_i32_0, %c0_i32_1 : i32, i32, i32, i32
  }
}

module attributes {stable_mosaic.version = 11 : i64} {
  func.func @_conv_kernel(%arg0: i32, %arg1: memref<128x144xbf16, #tpu.memory_space<vmem>>, %arg2: memref<144x16xbf16, #tpu.memory_space<vmem>>, %arg3: memref<1x16xf32, #tpu.memory_space<vmem>>, %arg4: memref<128x16xbf16, #tpu.memory_space<vmem>>) attributes {dimension_semantics = [#tpu.dimension_semantics<parallel>], iteration_bounds = array<i64: 1>, scalar_prefetch = 0 : i64, scratch_operands = 0 : i64, tpu.core_type = #tpu.core_type<tc>, window_params = [{transform_indices = @transform_0, window_bounds = array<i64: 128, 144>}, {pipeline_mode = #tpu.pipeline_mode<synchronous>, transform_indices = @transform_1, window_bounds = array<i64: 144, 16>}, {pipeline_mode = #tpu.pipeline_mode<synchronous>, transform_indices = @transform_2, window_bounds = array<i64: 1, 16>}, {transform_indices = @transform_3, window_bounds = array<i64: 128, 16>}]} {
    %c0 = arith.constant 0 : index
    %c0_0 = arith.constant 0 : index
    %0 = vector.load %arg1[%c0, %c0_0] : memref<128x144xbf16, #tpu.memory_space<vmem>>, vector<128x144xbf16>
    %c0_1 = arith.constant 0 : index
    %c0_2 = arith.constant 0 : index
    %1 = vector.load %arg2[%c0_1, %c0_2] : memref<144x16xbf16, #tpu.memory_space<vmem>>, vector<144x16xbf16>
    %cst = arith.constant dense<0.000000e+00> : vector<128x16xf32>
    %2 = tpu.matmul %0, %1, %cst {dimension_numbers = #tpu.dot_dimension_numbers<[1], [0], [0], [1], [0, 0, 1, 1], [], []>} : vector<128x144xbf16>, vector<144x16xbf16>, vector<128x16xf32> -> vector<128x16xf32>
    %c0_3 = arith.constant 0 : index
    %c0_4 = arith.constant 0 : index
    %3 = vector.load %arg3[%c0_3, %c0_4] : memref<1x16xf32, #tpu.memory_space<vmem>>, vector<1x16xf32>
    %4 = vector.broadcast %3 : vector<1x16xf32> to vector<128x16xf32>
    %5 = arith.addf %2, %4 : vector<128x16xf32>
    %cst_5 = arith.constant 0.000000e+00 : f32
    %6 = vector.broadcast %cst_5 : f32 to vector<128x16xf32>
    %7 = arith.maximumf %5, %6 : vector<128x16xf32>
    %8 = arith.truncf %7 : vector<128x16xf32> to vector<128x16xbf16>
    %c0_6 = arith.constant 0 : index
    %c0_7 = arith.constant 0 : index
    %9 = vector.load %arg4[%c0_6, %c0_7] : memref<128x16xbf16, #tpu.memory_space<vmem>>, vector<128x16xbf16>
    tpu.vector_store %arg4[%c0_6, %c0_7], %8 {strides = array<i32>} : memref<128x16xbf16, #tpu.memory_space<vmem>>, vector<128x16xbf16>,
    return
  }
  func.func @transform_0(%arg0: i32) -> (i32, i32) {
    %c0_i32 = arith.constant 0 : i32
    %c0_i32_0 = arith.constant 0 : i32
    return %arg0, %c0_i32 : i32, i32
  }
  func.func @transform_1(%arg0: i32) -> (i32, i32) {
    %c0_i32 = arith.constant 0 : i32
    %c0_i32_0 = arith.constant 0 : i32
    %c0_i32_1 = arith.constant 0 : i32
    return %c0_i32, %c0_i32_0 : i32, i32
  }
  func.func @transform_2(%arg0: i32) -> (i32, i32) {
    %c0_i32 = arith.constant 0 : i32
    %c0_i32_0 = arith.constant 0 : i32
    %c0_i32_1 = arith.constant 0 : i32
    return %c0_i32, %c0_i32_0 : i32, i32
  }
  func.func @transform_3(%arg0: i32) -> (i32, i32) {
    %c0_i32 = arith.constant 0 : i32
    %c0_i32_0 = arith.constant 0 : i32
    return %arg0, %c0_i32 : i32, i32
  }
}

module attributes {stable_mosaic.version = 11 : i64} {
  func.func @_conv_res_kernel(%arg0: i32, %arg1: memref<128x144xbf16, #tpu.memory_space<vmem>>, %arg2: memref<144x16xbf16, #tpu.memory_space<vmem>>, %arg3: memref<1x16xf32, #tpu.memory_space<vmem>>, %arg4: memref<128x16xbf16, #tpu.memory_space<vmem>>, %arg5: memref<128x16xbf16, #tpu.memory_space<vmem>>) attributes {dimension_semantics = [#tpu.dimension_semantics<parallel>], iteration_bounds = array<i64: 1>, scalar_prefetch = 0 : i64, scratch_operands = 0 : i64, tpu.core_type = #tpu.core_type<tc>, window_params = [{transform_indices = @transform_0, window_bounds = array<i64: 128, 144>}, {pipeline_mode = #tpu.pipeline_mode<synchronous>, transform_indices = @transform_1, window_bounds = array<i64: 144, 16>}, {pipeline_mode = #tpu.pipeline_mode<synchronous>, transform_indices = @transform_2, window_bounds = array<i64: 1, 16>}, {transform_indices = @transform_3, window_bounds = array<i64: 128, 16>}, {transform_indices = @transform_4, window_bounds = array<i64: 128, 16>}]} {
    %c0 = arith.constant 0 : index
    %c0_0 = arith.constant 0 : index
    %0 = vector.load %arg1[%c0, %c0_0] : memref<128x144xbf16, #tpu.memory_space<vmem>>, vector<128x144xbf16>
    %c0_1 = arith.constant 0 : index
    %c0_2 = arith.constant 0 : index
    %1 = vector.load %arg2[%c0_1, %c0_2] : memref<144x16xbf16, #tpu.memory_space<vmem>>, vector<144x16xbf16>
    %cst = arith.constant dense<0.000000e+00> : vector<128x16xf32>
    %2 = tpu.matmul %0, %1, %cst {dimension_numbers = #tpu.dot_dimension_numbers<[1], [0], [0], [1], [0, 0, 1, 1], [], []>} : vector<128x144xbf16>, vector<144x16xbf16>, vector<128x16xf32> -> vector<128x16xf32>
    %c0_3 = arith.constant 0 : index
    %c0_4 = arith.constant 0 : index
    %3 = vector.load %arg3[%c0_3, %c0_4] : memref<1x16xf32, #tpu.memory_space<vmem>>, vector<1x16xf32>
    %4 = vector.broadcast %3 : vector<1x16xf32> to vector<128x16xf32>
    %5 = arith.addf %2, %4 : vector<128x16xf32>
    %c0_5 = arith.constant 0 : index
    %c0_6 = arith.constant 0 : index
    %6 = vector.load %arg4[%c0_5, %c0_6] : memref<128x16xbf16, #tpu.memory_space<vmem>>, vector<128x16xbf16>
    %7 = arith.extf %6 : vector<128x16xbf16> to vector<128x16xf32>
    %8 = arith.addf %5, %7 : vector<128x16xf32>
    %cst_7 = arith.constant 0.000000e+00 : f32
    %9 = vector.broadcast %cst_7 : f32 to vector<128x16xf32>
    %10 = arith.maximumf %8, %9 : vector<128x16xf32>
    %11 = arith.truncf %10 : vector<128x16xf32> to vector<128x16xbf16>
    %c0_8 = arith.constant 0 : index
    %c0_9 = arith.constant 0 : index
    %12 = vector.load %arg5[%c0_8, %c0_9] : memref<128x16xbf16, #tpu.memory_space<vmem>>, vector<128x16xbf16>
    tpu.vector_store %arg5[%c0_8, %c0_9], %11 {strides = array<i32>} : memref<128x16xbf16, #tpu.memory_space<vmem>>, vector<128x16xbf16>,
    return
  }
  func.func @transform_0(%arg0: i32) -> (i32, i32) {
    %c0_i32 = arith.constant 0 : i32
    %c0_i32_0 = arith.constant 0 : i32
    return %arg0, %c0_i32 : i32, i32
  }
  func.func @transform_1(%arg0: i32) -> (i32, i32) {
    %c0_i32 = arith.constant 0 : i32
    %c0_i32_0 = arith.constant 0 : i32
    %c0_i32_1 = arith.constant 0 : i32
    return %c0_i32, %c0_i32_0 : i32, i32
  }
  func.func @transform_2(%arg0: i32) -> (i32, i32) {
    %c0_i32 = arith.constant 0 : i32
    %c0_i32_0 = arith.constant 0 : i32
    %c0_i32_1 = arith.constant 0 : i32
    return %c0_i32, %c0_i32_0 : i32, i32
  }
  func.func @transform_3(%arg0: i32) -> (i32, i32) {
    %c0_i32 = arith.constant 0 : i32
    %c0_i32_0 = arith.constant 0 : i32
    return %arg0, %c0_i32 : i32, i32
  }
  func.func @transform_4(%arg0: i32) -> (i32, i32) {
    %c0_i32 = arith.constant 0 : i32
    %c0_i32_0 = arith.constant 0 : i32
    return %arg0, %c0_i32 : i32, i32
  }
}

module attributes {stable_mosaic.version = 11 : i64} {
  func.func @_conv_kernel(%arg0: i32, %arg1: memref<32x144xbf16, #tpu.memory_space<vmem>>, %arg2: memref<144x32xbf16, #tpu.memory_space<vmem>>, %arg3: memref<1x32xf32, #tpu.memory_space<vmem>>, %arg4: memref<32x32xbf16, #tpu.memory_space<vmem>>) attributes {dimension_semantics = [#tpu.dimension_semantics<parallel>], iteration_bounds = array<i64: 1>, scalar_prefetch = 0 : i64, scratch_operands = 0 : i64, tpu.core_type = #tpu.core_type<tc>, window_params = [{transform_indices = @transform_0, window_bounds = array<i64: 32, 144>}, {pipeline_mode = #tpu.pipeline_mode<synchronous>, transform_indices = @transform_1, window_bounds = array<i64: 144, 32>}, {pipeline_mode = #tpu.pipeline_mode<synchronous>, transform_indices = @transform_2, window_bounds = array<i64: 1, 32>}, {transform_indices = @transform_3, window_bounds = array<i64: 32, 32>}]} {
    %c0 = arith.constant 0 : index
    %c0_0 = arith.constant 0 : index
    %0 = vector.load %arg1[%c0, %c0_0] : memref<32x144xbf16, #tpu.memory_space<vmem>>, vector<32x144xbf16>
    %c0_1 = arith.constant 0 : index
    %c0_2 = arith.constant 0 : index
    %1 = vector.load %arg2[%c0_1, %c0_2] : memref<144x32xbf16, #tpu.memory_space<vmem>>, vector<144x32xbf16>
    %cst = arith.constant dense<0.000000e+00> : vector<32x32xf32>
    %2 = tpu.matmul %0, %1, %cst {dimension_numbers = #tpu.dot_dimension_numbers<[1], [0], [0], [1], [0, 0, 1, 1], [], []>} : vector<32x144xbf16>, vector<144x32xbf16>, vector<32x32xf32> -> vector<32x32xf32>
    %c0_3 = arith.constant 0 : index
    %c0_4 = arith.constant 0 : index
    %3 = vector.load %arg3[%c0_3, %c0_4] : memref<1x32xf32, #tpu.memory_space<vmem>>, vector<1x32xf32>
    %4 = vector.broadcast %3 : vector<1x32xf32> to vector<32x32xf32>
    %5 = arith.addf %2, %4 : vector<32x32xf32>
    %cst_5 = arith.constant 0.000000e+00 : f32
    %6 = vector.broadcast %cst_5 : f32 to vector<32x32xf32>
    %7 = arith.maximumf %5, %6 : vector<32x32xf32>
    %8 = arith.truncf %7 : vector<32x32xf32> to vector<32x32xbf16>
    %c0_6 = arith.constant 0 : index
    %c0_7 = arith.constant 0 : index
    %9 = vector.load %arg4[%c0_6, %c0_7] : memref<32x32xbf16, #tpu.memory_space<vmem>>, vector<32x32xbf16>
    tpu.vector_store %arg4[%c0_6, %c0_7], %8 {strides = array<i32>} : memref<32x32xbf16, #tpu.memory_space<vmem>>, vector<32x32xbf16>,
    return
  }
  func.func @transform_0(%arg0: i32) -> (i32, i32) {
    %c0_i32 = arith.constant 0 : i32
    %c0_i32_0 = arith.constant 0 : i32
    return %arg0, %c0_i32 : i32, i32
  }
  func.func @transform_1(%arg0: i32) -> (i32, i32) {
    %c0_i32 = arith.constant 0 : i32
    %c0_i32_0 = arith.constant 0 : i32
    %c0_i32_1 = arith.constant 0 : i32
    return %c0_i32, %c0_i32_0 : i32, i32
  }
  func.func @transform_2(%arg0: i32) -> (i32, i32) {
    %c0_i32 = arith.constant 0 : i32
    %c0_i32_0 = arith.constant 0 : i32
    %c0_i32_1 = arith.constant 0 : i32
    return %c0_i32, %c0_i32_0 : i32, i32
  }
  func.func @transform_3(%arg0: i32) -> (i32, i32) {
    %c0_i32 = arith.constant 0 : i32
    %c0_i32_0 = arith.constant 0 : i32
    return %arg0, %c0_i32 : i32, i32
  }
}

module attributes {stable_mosaic.version = 11 : i64} {
  func.func @_conv_down_kernel(%arg0: i32, %arg1: memref<32x288xbf16, #tpu.memory_space<vmem>>, %arg2: memref<288x32xbf16, #tpu.memory_space<vmem>>, %arg3: memref<1x32xf32, #tpu.memory_space<vmem>>, %arg4: memref<32x16xbf16, #tpu.memory_space<vmem>>, %arg5: memref<16x32xbf16, #tpu.memory_space<vmem>>, %arg6: memref<1x32xf32, #tpu.memory_space<vmem>>, %arg7: memref<32x32xbf16, #tpu.memory_space<vmem>>) attributes {dimension_semantics = [#tpu.dimension_semantics<parallel>], iteration_bounds = array<i64: 1>, scalar_prefetch = 0 : i64, scratch_operands = 0 : i64, tpu.core_type = #tpu.core_type<tc>, window_params = [{transform_indices = @transform_0, window_bounds = array<i64: 32, 288>}, {pipeline_mode = #tpu.pipeline_mode<synchronous>, transform_indices = @transform_1, window_bounds = array<i64: 288, 32>}, {pipeline_mode = #tpu.pipeline_mode<synchronous>, transform_indices = @transform_2, window_bounds = array<i64: 1, 32>}, {transform_indices = @transform_3, window_bounds = array<i64: 32, 16>}, {pipeline_mode = #tpu.pipeline_mode<synchronous>, transform_indices = @transform_4, window_bounds = array<i64: 16, 32>}, {pipeline_mode = #tpu.pipeline_mode<synchronous>, transform_indices = @transform_5, window_bounds = array<i64: 1, 32>}, {transform_indices = @transform_6, window_bounds = array<i64: 32, 32>}]} {
    %c0 = arith.constant 0 : index
    %c0_0 = arith.constant 0 : index
    %0 = vector.load %arg1[%c0, %c0_0] : memref<32x288xbf16, #tpu.memory_space<vmem>>, vector<32x288xbf16>
    %c0_1 = arith.constant 0 : index
    %c0_2 = arith.constant 0 : index
    %1 = vector.load %arg2[%c0_1, %c0_2] : memref<288x32xbf16, #tpu.memory_space<vmem>>, vector<288x32xbf16>
    %cst = arith.constant dense<0.000000e+00> : vector<32x32xf32>
    %2 = tpu.matmul %0, %1, %cst {dimension_numbers = #tpu.dot_dimension_numbers<[1], [0], [0], [1], [0, 0, 1, 1], [], []>} : vector<32x288xbf16>, vector<288x32xbf16>, vector<32x32xf32> -> vector<32x32xf32>
    %c0_3 = arith.constant 0 : index
    %c0_4 = arith.constant 0 : index
    %3 = vector.load %arg4[%c0_3, %c0_4] : memref<32x16xbf16, #tpu.memory_space<vmem>>, vector<32x16xbf16>
    %c0_5 = arith.constant 0 : index
    %c0_6 = arith.constant 0 : index
    %4 = vector.load %arg5[%c0_5, %c0_6] : memref<16x32xbf16, #tpu.memory_space<vmem>>, vector<16x32xbf16>
    %cst_7 = arith.constant dense<0.000000e+00> : vector<32x32xf32>
    %5 = tpu.matmul %3, %4, %cst_7 {dimension_numbers = #tpu.dot_dimension_numbers<[1], [0], [0], [1], [0, 0, 1, 1], [], []>} : vector<32x16xbf16>, vector<16x32xbf16>, vector<32x32xf32> -> vector<32x32xf32>
    %6 = arith.addf %2, %5 : vector<32x32xf32>
    %c0_8 = arith.constant 0 : index
    %c0_9 = arith.constant 0 : index
    %7 = vector.load %arg3[%c0_8, %c0_9] : memref<1x32xf32, #tpu.memory_space<vmem>>, vector<1x32xf32>
    %8 = vector.broadcast %7 : vector<1x32xf32> to vector<32x32xf32>
    %9 = arith.addf %6, %8 : vector<32x32xf32>
    %c0_10 = arith.constant 0 : index
    %c0_11 = arith.constant 0 : index
    %10 = vector.load %arg6[%c0_10, %c0_11] : memref<1x32xf32, #tpu.memory_space<vmem>>, vector<1x32xf32>
    %11 = vector.broadcast %10 : vector<1x32xf32> to vector<32x32xf32>
    %12 = arith.addf %9, %11 : vector<32x32xf32>
    %cst_12 = arith.constant 0.000000e+00 : f32
    %13 = vector.broadcast %cst_12 : f32 to vector<32x32xf32>
    %14 = arith.maximumf %12, %13 : vector<32x32xf32>
    %15 = arith.truncf %14 : vector<32x32xf32> to vector<32x32xbf16>
    %c0_13 = arith.constant 0 : index
    %c0_14 = arith.constant 0 : index
    %16 = vector.load %arg7[%c0_13, %c0_14] : memref<32x32xbf16, #tpu.memory_space<vmem>>, vector<32x32xbf16>
    tpu.vector_store %arg7[%c0_13, %c0_14], %15 {strides = array<i32>} : memref<32x32xbf16, #tpu.memory_space<vmem>>, vector<32x32xbf16>,
    return
  }
  func.func @transform_0(%arg0: i32) -> (i32, i32) {
    %c0_i32 = arith.constant 0 : i32
    %c0_i32_0 = arith.constant 0 : i32
    return %arg0, %c0_i32 : i32, i32
  }
  func.func @transform_1(%arg0: i32) -> (i32, i32) {
    %c0_i32 = arith.constant 0 : i32
    %c0_i32_0 = arith.constant 0 : i32
    %c0_i32_1 = arith.constant 0 : i32
    return %c0_i32, %c0_i32_0 : i32, i32
  }
  func.func @transform_2(%arg0: i32) -> (i32, i32) {
    %c0_i32 = arith.constant 0 : i32
    %c0_i32_0 = arith.constant 0 : i32
    %c0_i32_1 = arith.constant 0 : i32
    return %c0_i32, %c0_i32_0 : i32, i32
  }
  func.func @transform_3(%arg0: i32) -> (i32, i32) {
    %c0_i32 = arith.constant 0 : i32
    %c0_i32_0 = arith.constant 0 : i32
    return %arg0, %c0_i32 : i32, i32
  }
  func.func @transform_4(%arg0: i32) -> (i32, i32) {
    %c0_i32 = arith.constant 0 : i32
    %c0_i32_0 = arith.constant 0 : i32
    %c0_i32_1 = arith.constant 0 : i32
    return %c0_i32, %c0_i32_0 : i32, i32
  }
  func.func @transform_5(%arg0: i32) -> (i32, i32) {
    %c0_i32 = arith.constant 0 : i32
    %c0_i32_0 = arith.constant 0 : i32
    %c0_i32_1 = arith.constant 0 : i32
    return %c0_i32, %c0_i32_0 : i32, i32
  }
  func.func @transform_6(%arg0: i32) -> (i32, i32) {
    %c0_i32 = arith.constant 0 : i32
    %c0_i32_0 = arith.constant 0 : i32
    return %arg0, %c0_i32 : i32, i32
  }
}

module attributes {stable_mosaic.version = 11 : i64} {
  func.func @_conv_kernel(%arg0: i32, %arg1: memref<8x288xbf16, #tpu.memory_space<vmem>>, %arg2: memref<288x64xbf16, #tpu.memory_space<vmem>>, %arg3: memref<1x64xf32, #tpu.memory_space<vmem>>, %arg4: memref<8x64xbf16, #tpu.memory_space<vmem>>) attributes {dimension_semantics = [#tpu.dimension_semantics<parallel>], iteration_bounds = array<i64: 1>, scalar_prefetch = 0 : i64, scratch_operands = 0 : i64, tpu.core_type = #tpu.core_type<tc>, window_params = [{transform_indices = @transform_0, window_bounds = array<i64: 8, 288>}, {pipeline_mode = #tpu.pipeline_mode<synchronous>, transform_indices = @transform_1, window_bounds = array<i64: 288, 64>}, {pipeline_mode = #tpu.pipeline_mode<synchronous>, transform_indices = @transform_2, window_bounds = array<i64: 1, 64>}, {transform_indices = @transform_3, window_bounds = array<i64: 8, 64>}]} {
    %c0 = arith.constant 0 : index
    %c0_0 = arith.constant 0 : index
    %0 = vector.load %arg1[%c0, %c0_0] : memref<8x288xbf16, #tpu.memory_space<vmem>>, vector<8x288xbf16>
    %c0_1 = arith.constant 0 : index
    %c0_2 = arith.constant 0 : index
    %1 = vector.load %arg2[%c0_1, %c0_2] : memref<288x64xbf16, #tpu.memory_space<vmem>>, vector<288x64xbf16>
    %cst = arith.constant dense<0.000000e+00> : vector<8x64xf32>
    %2 = tpu.matmul %0, %1, %cst {dimension_numbers = #tpu.dot_dimension_numbers<[1], [0], [0], [1], [0, 0, 1, 1], [], []>} : vector<8x288xbf16>, vector<288x64xbf16>, vector<8x64xf32> -> vector<8x64xf32>
    %c0_3 = arith.constant 0 : index
    %c0_4 = arith.constant 0 : index
    %3 = vector.load %arg3[%c0_3, %c0_4] : memref<1x64xf32, #tpu.memory_space<vmem>>, vector<1x64xf32>
    %4 = vector.broadcast %3 : vector<1x64xf32> to vector<8x64xf32>
    %5 = arith.addf %2, %4 : vector<8x64xf32>
    %cst_5 = arith.constant 0.000000e+00 : f32
    %6 = vector.broadcast %cst_5 : f32 to vector<8x64xf32>
    %7 = arith.maximumf %5, %6 : vector<8x64xf32>
    %8 = arith.truncf %7 : vector<8x64xf32> to vector<8x64xbf16>
    %c0_6 = arith.constant 0 : index
    %c0_7 = arith.constant 0 : index
    %9 = vector.load %arg4[%c0_6, %c0_7] : memref<8x64xbf16, #tpu.memory_space<vmem>>, vector<8x64xbf16>
    tpu.vector_store %arg4[%c0_6, %c0_7], %8 {strides = array<i32>} : memref<8x64xbf16, #tpu.memory_space<vmem>>, vector<8x64xbf16>,
    return
  }
  func.func @transform_0(%arg0: i32) -> (i32, i32) {
    %c0_i32 = arith.constant 0 : i32
    %c0_i32_0 = arith.constant 0 : i32
    return %arg0, %c0_i32 : i32, i32
  }
  func.func @transform_1(%arg0: i32) -> (i32, i32) {
    %c0_i32 = arith.constant 0 : i32
    %c0_i32_0 = arith.constant 0 : i32
    %c0_i32_1 = arith.constant 0 : i32
    return %c0_i32, %c0_i32_0 : i32, i32
  }
  func.func @transform_2(%arg0: i32) -> (i32, i32) {
    %c0_i32 = arith.constant 0 : i32
    %c0_i32_0 = arith.constant 0 : i32
    %c0_i32_1 = arith.constant 0 : i32
    return %c0_i32, %c0_i32_0 : i32, i32
  }
  func.func @transform_3(%arg0: i32) -> (i32, i32) {
    %c0_i32 = arith.constant 0 : i32
    %c0_i32_0 = arith.constant 0 : i32
    return %arg0, %c0_i32 : i32, i32
  }
}

module attributes {stable_mosaic.version = 11 : i64} {
  func.func @_conv_down_kernel(%arg0: i32, %arg1: memref<8x576xbf16, #tpu.memory_space<vmem>>, %arg2: memref<576x64xbf16, #tpu.memory_space<vmem>>, %arg3: memref<1x64xf32, #tpu.memory_space<vmem>>, %arg4: memref<8x32xbf16, #tpu.memory_space<vmem>>, %arg5: memref<32x64xbf16, #tpu.memory_space<vmem>>, %arg6: memref<1x64xf32, #tpu.memory_space<vmem>>, %arg7: memref<8x64xbf16, #tpu.memory_space<vmem>>) attributes {dimension_semantics = [#tpu.dimension_semantics<parallel>], iteration_bounds = array<i64: 1>, scalar_prefetch = 0 : i64, scratch_operands = 0 : i64, tpu.core_type = #tpu.core_type<tc>, window_params = [{transform_indices = @transform_0, window_bounds = array<i64: 8, 576>}, {pipeline_mode = #tpu.pipeline_mode<synchronous>, transform_indices = @transform_1, window_bounds = array<i64: 576, 64>}, {pipeline_mode = #tpu.pipeline_mode<synchronous>, transform_indices = @transform_2, window_bounds = array<i64: 1, 64>}, {transform_indices = @transform_3, window_bounds = array<i64: 8, 32>}, {pipeline_mode = #tpu.pipeline_mode<synchronous>, transform_indices = @transform_4, window_bounds = array<i64: 32, 64>}, {pipeline_mode = #tpu.pipeline_mode<synchronous>, transform_indices = @transform_5, window_bounds = array<i64: 1, 64>}, {transform_indices = @transform_6, window_bounds = array<i64: 8, 64>}]} {
    %c0 = arith.constant 0 : index
    %c0_0 = arith.constant 0 : index
    %0 = vector.load %arg1[%c0, %c0_0] : memref<8x576xbf16, #tpu.memory_space<vmem>>, vector<8x576xbf16>
    %c0_1 = arith.constant 0 : index
    %c0_2 = arith.constant 0 : index
    %1 = vector.load %arg2[%c0_1, %c0_2] : memref<576x64xbf16, #tpu.memory_space<vmem>>, vector<576x64xbf16>
    %cst = arith.constant dense<0.000000e+00> : vector<8x64xf32>
    %2 = tpu.matmul %0, %1, %cst {dimension_numbers = #tpu.dot_dimension_numbers<[1], [0], [0], [1], [0, 0, 1, 1], [], []>} : vector<8x576xbf16>, vector<576x64xbf16>, vector<8x64xf32> -> vector<8x64xf32>
    %c0_3 = arith.constant 0 : index
    %c0_4 = arith.constant 0 : index
    %3 = vector.load %arg4[%c0_3, %c0_4] : memref<8x32xbf16, #tpu.memory_space<vmem>>, vector<8x32xbf16>
    %c0_5 = arith.constant 0 : index
    %c0_6 = arith.constant 0 : index
    %4 = vector.load %arg5[%c0_5, %c0_6] : memref<32x64xbf16, #tpu.memory_space<vmem>>, vector<32x64xbf16>
    %cst_7 = arith.constant dense<0.000000e+00> : vector<8x64xf32>
    %5 = tpu.matmul %3, %4, %cst_7 {dimension_numbers = #tpu.dot_dimension_numbers<[1], [0], [0], [1], [0, 0, 1, 1], [], []>} : vector<8x32xbf16>, vector<32x64xbf16>, vector<8x64xf32> -> vector<8x64xf32>
    %6 = arith.addf %2, %5 : vector<8x64xf32>
    %c0_8 = arith.constant 0 : index
    %c0_9 = arith.constant 0 : index
    %7 = vector.load %arg3[%c0_8, %c0_9] : memref<1x64xf32, #tpu.memory_space<vmem>>, vector<1x64xf32>
    %8 = vector.broadcast %7 : vector<1x64xf32> to vector<8x64xf32>
    %9 = arith.addf %6, %8 : vector<8x64xf32>
    %c0_10 = arith.constant 0 : index
    %c0_11 = arith.constant 0 : index
    %10 = vector.load %arg6[%c0_10, %c0_11] : memref<1x64xf32, #tpu.memory_space<vmem>>, vector<1x64xf32>
    %11 = vector.broadcast %10 : vector<1x64xf32> to vector<8x64xf32>
    %12 = arith.addf %9, %11 : vector<8x64xf32>
    %cst_12 = arith.constant 0.000000e+00 : f32
    %13 = vector.broadcast %cst_12 : f32 to vector<8x64xf32>
    %14 = arith.maximumf %12, %13 : vector<8x64xf32>
    %15 = arith.truncf %14 : vector<8x64xf32> to vector<8x64xbf16>
    %c0_13 = arith.constant 0 : index
    %c0_14 = arith.constant 0 : index
    %16 = vector.load %arg7[%c0_13, %c0_14] : memref<8x64xbf16, #tpu.memory_space<vmem>>, vector<8x64xbf16>
    tpu.vector_store %arg7[%c0_13, %c0_14], %15 {strides = array<i32>} : memref<8x64xbf16, #tpu.memory_space<vmem>>, vector<8x64xbf16>,
    return
  }
  func.func @transform_0(%arg0: i32) -> (i32, i32) {
    %c0_i32 = arith.constant 0 : i32
    %c0_i32_0 = arith.constant 0 : i32
    return %arg0, %c0_i32 : i32, i32
  }
  func.func @transform_1(%arg0: i32) -> (i32, i32) {
    %c0_i32 = arith.constant 0 : i32
    %c0_i32_0 = arith.constant 0 : i32
    %c0_i32_1 = arith.constant 0 : i32
    return %c0_i32, %c0_i32_0 : i32, i32
  }
  func.func @transform_2(%arg0: i32) -> (i32, i32) {
    %c0_i32 = arith.constant 0 : i32
    %c0_i32_0 = arith.constant 0 : i32
    %c0_i32_1 = arith.constant 0 : i32
    return %c0_i32, %c0_i32_0 : i32, i32
  }
  func.func @transform_3(%arg0: i32) -> (i32, i32) {
    %c0_i32 = arith.constant 0 : i32
    %c0_i32_0 = arith.constant 0 : i32
    return %arg0, %c0_i32 : i32, i32
  }
  func.func @transform_4(%arg0: i32) -> (i32, i32) {
    %c0_i32 = arith.constant 0 : i32
    %c0_i32_0 = arith.constant 0 : i32
    %c0_i32_1 = arith.constant 0 : i32
    return %c0_i32, %c0_i32_0 : i32, i32
  }
  func.func @transform_5(%arg0: i32) -> (i32, i32) {
    %c0_i32 = arith.constant 0 : i32
    %c0_i32_0 = arith.constant 0 : i32
    %c0_i32_1 = arith.constant 0 : i32
    return %c0_i32, %c0_i32_0 : i32, i32
  }
  func.func @transform_6(%arg0: i32) -> (i32, i32) {
    %c0_i32 = arith.constant 0 : i32
    %c0_i32_0 = arith.constant 0 : i32
    return %arg0, %c0_i32 : i32, i32
  }
}

module attributes {stable_mosaic.version = 11 : i64} {
  func.func @_conv_kernel(%arg0: i32, %arg1: memref<2x576xbf16, #tpu.memory_space<vmem>>, %arg2: memref<576x128xbf16, #tpu.memory_space<vmem>>, %arg3: memref<1x128xf32, #tpu.memory_space<vmem>>, %arg4: memref<2x128xbf16, #tpu.memory_space<vmem>>) attributes {dimension_semantics = [#tpu.dimension_semantics<parallel>], iteration_bounds = array<i64: 1>, scalar_prefetch = 0 : i64, scratch_operands = 0 : i64, tpu.core_type = #tpu.core_type<tc>, window_params = [{transform_indices = @transform_0, window_bounds = array<i64: 2, 576>}, {pipeline_mode = #tpu.pipeline_mode<synchronous>, transform_indices = @transform_1, window_bounds = array<i64: 576, 128>}, {pipeline_mode = #tpu.pipeline_mode<synchronous>, transform_indices = @transform_2, window_bounds = array<i64: 1, 128>}, {transform_indices = @transform_3, window_bounds = array<i64: 2, 128>}]} {
    %c0 = arith.constant 0 : index
    %c0_0 = arith.constant 0 : index
    %0 = vector.load %arg1[%c0, %c0_0] : memref<2x576xbf16, #tpu.memory_space<vmem>>, vector<2x576xbf16>
    %c0_1 = arith.constant 0 : index
    %c0_2 = arith.constant 0 : index
    %1 = vector.load %arg2[%c0_1, %c0_2] : memref<576x128xbf16, #tpu.memory_space<vmem>>, vector<576x128xbf16>
    %cst = arith.constant dense<0.000000e+00> : vector<2x128xf32>
    %2 = tpu.matmul %0, %1, %cst {dimension_numbers = #tpu.dot_dimension_numbers<[1], [0], [0], [1], [0, 0, 1, 1], [], []>} : vector<2x576xbf16>, vector<576x128xbf16>, vector<2x128xf32> -> vector<2x128xf32>
    %c0_3 = arith.constant 0 : index
    %c0_4 = arith.constant 0 : index
    %3 = vector.load %arg3[%c0_3, %c0_4] : memref<1x128xf32, #tpu.memory_space<vmem>>, vector<1x128xf32>
    %4 = vector.broadcast %3 : vector<1x128xf32> to vector<2x128xf32>
    %5 = arith.addf %2, %4 : vector<2x128xf32>
    %cst_5 = arith.constant 0.000000e+00 : f32
    %6 = vector.broadcast %cst_5 : f32 to vector<2x128xf32>
    %7 = arith.maximumf %5, %6 : vector<2x128xf32>
    %8 = arith.truncf %7 : vector<2x128xf32> to vector<2x128xbf16>
    %c0_6 = arith.constant 0 : index
    %c0_7 = arith.constant 0 : index
    %9 = vector.load %arg4[%c0_6, %c0_7] : memref<2x128xbf16, #tpu.memory_space<vmem>>, vector<2x128xbf16>
    tpu.vector_store %arg4[%c0_6, %c0_7], %8 {strides = array<i32>} : memref<2x128xbf16, #tpu.memory_space<vmem>>, vector<2x128xbf16>,
    return
  }
  func.func @transform_0(%arg0: i32) -> (i32, i32) {
    %c0_i32 = arith.constant 0 : i32
    %c0_i32_0 = arith.constant 0 : i32
    return %arg0, %c0_i32 : i32, i32
  }
  func.func @transform_1(%arg0: i32) -> (i32, i32) {
    %c0_i32 = arith.constant 0 : i32
    %c0_i32_0 = arith.constant 0 : i32
    %c0_i32_1 = arith.constant 0 : i32
    return %c0_i32, %c0_i32_0 : i32, i32
  }
  func.func @transform_2(%arg0: i32) -> (i32, i32) {
    %c0_i32 = arith.constant 0 : i32
    %c0_i32_0 = arith.constant 0 : i32
    %c0_i32_1 = arith.constant 0 : i32
    return %c0_i32, %c0_i32_0 : i32, i32
  }
  func.func @transform_3(%arg0: i32) -> (i32, i32) {
    %c0_i32 = arith.constant 0 : i32
    %c0_i32_0 = arith.constant 0 : i32
    return %arg0, %c0_i32 : i32, i32
  }
}

module attributes {stable_mosaic.version = 11 : i64} {
  func.func @_conv_down_kernel(%arg0: i32, %arg1: memref<2x1152xbf16, #tpu.memory_space<vmem>>, %arg2: memref<1152x128xbf16, #tpu.memory_space<vmem>>, %arg3: memref<1x128xf32, #tpu.memory_space<vmem>>, %arg4: memref<2x64xbf16, #tpu.memory_space<vmem>>, %arg5: memref<64x128xbf16, #tpu.memory_space<vmem>>, %arg6: memref<1x128xf32, #tpu.memory_space<vmem>>, %arg7: memref<2x128xbf16, #tpu.memory_space<vmem>>) attributes {dimension_semantics = [#tpu.dimension_semantics<parallel>], iteration_bounds = array<i64: 1>, scalar_prefetch = 0 : i64, scratch_operands = 0 : i64, tpu.core_type = #tpu.core_type<tc>, window_params = [{transform_indices = @transform_0, window_bounds = array<i64: 2, 1152>}, {pipeline_mode = #tpu.pipeline_mode<synchronous>, transform_indices = @transform_1, window_bounds = array<i64: 1152, 128>}, {pipeline_mode = #tpu.pipeline_mode<synchronous>, transform_indices = @transform_2, window_bounds = array<i64: 1, 128>}, {transform_indices = @transform_3, window_bounds = array<i64: 2, 64>}, {pipeline_mode = #tpu.pipeline_mode<synchronous>, transform_indices = @transform_4, window_bounds = array<i64: 64, 128>}, {pipeline_mode = #tpu.pipeline_mode<synchronous>, transform_indices = @transform_5, window_bounds = array<i64: 1, 128>}, {transform_indices = @transform_6, window_bounds = array<i64: 2, 128>}]} {
    %c0 = arith.constant 0 : index
    %c0_0 = arith.constant 0 : index
    %0 = vector.load %arg1[%c0, %c0_0] : memref<2x1152xbf16, #tpu.memory_space<vmem>>, vector<2x1152xbf16>
    %c0_1 = arith.constant 0 : index
    %c0_2 = arith.constant 0 : index
    %1 = vector.load %arg2[%c0_1, %c0_2] : memref<1152x128xbf16, #tpu.memory_space<vmem>>, vector<1152x128xbf16>
    %cst = arith.constant dense<0.000000e+00> : vector<2x128xf32>
    %2 = tpu.matmul %0, %1, %cst {dimension_numbers = #tpu.dot_dimension_numbers<[1], [0], [0], [1], [0, 0, 1, 1], [], []>} : vector<2x1152xbf16>, vector<1152x128xbf16>, vector<2x128xf32> -> vector<2x128xf32>
    %c0_3 = arith.constant 0 : index
    %c0_4 = arith.constant 0 : index
    %3 = vector.load %arg4[%c0_3, %c0_4] : memref<2x64xbf16, #tpu.memory_space<vmem>>, vector<2x64xbf16>
    %c0_5 = arith.constant 0 : index
    %c0_6 = arith.constant 0 : index
    %4 = vector.load %arg5[%c0_5, %c0_6] : memref<64x128xbf16, #tpu.memory_space<vmem>>, vector<64x128xbf16>
    %cst_7 = arith.constant dense<0.000000e+00> : vector<2x128xf32>
    %5 = tpu.matmul %3, %4, %cst_7 {dimension_numbers = #tpu.dot_dimension_numbers<[1], [0], [0], [1], [0, 0, 1, 1], [], []>} : vector<2x64xbf16>, vector<64x128xbf16>, vector<2x128xf32> -> vector<2x128xf32>
    %6 = arith.addf %2, %5 : vector<2x128xf32>
    %c0_8 = arith.constant 0 : index
    %c0_9 = arith.constant 0 : index
    %7 = vector.load %arg3[%c0_8, %c0_9] : memref<1x128xf32, #tpu.memory_space<vmem>>, vector<1x128xf32>
    %8 = vector.broadcast %7 : vector<1x128xf32> to vector<2x128xf32>
    %9 = arith.addf %6, %8 : vector<2x128xf32>
    %c0_10 = arith.constant 0 : index
    %c0_11 = arith.constant 0 : index
    %10 = vector.load %arg6[%c0_10, %c0_11] : memref<1x128xf32, #tpu.memory_space<vmem>>, vector<1x128xf32>
    %11 = vector.broadcast %10 : vector<1x128xf32> to vector<2x128xf32>
    %12 = arith.addf %9, %11 : vector<2x128xf32>
    %cst_12 = arith.constant 0.000000e+00 : f32
    %13 = vector.broadcast %cst_12 : f32 to vector<2x128xf32>
    %14 = arith.maximumf %12, %13 : vector<2x128xf32>
    %15 = arith.truncf %14 : vector<2x128xf32> to vector<2x128xbf16>
    %c0_13 = arith.constant 0 : index
    %c0_14 = arith.constant 0 : index
    %16 = vector.load %arg7[%c0_13, %c0_14] : memref<2x128xbf16, #tpu.memory_space<vmem>>, vector<2x128xbf16>
    tpu.vector_store %arg7[%c0_13, %c0_14], %15 {strides = array<i32>} : memref<2x128xbf16, #tpu.memory_space<vmem>>, vector<2x128xbf16>,
    return
  }
  func.func @transform_0(%arg0: i32) -> (i32, i32) {
    %c0_i32 = arith.constant 0 : i32
    %c0_i32_0 = arith.constant 0 : i32
    return %arg0, %c0_i32 : i32, i32
  }
  func.func @transform_1(%arg0: i32) -> (i32, i32) {
    %c0_i32 = arith.constant 0 : i32
    %c0_i32_0 = arith.constant 0 : i32
    %c0_i32_1 = arith.constant 0 : i32
    return %c0_i32, %c0_i32_0 : i32, i32
  }
  func.func @transform_2(%arg0: i32) -> (i32, i32) {
    %c0_i32 = arith.constant 0 : i32
    %c0_i32_0 = arith.constant 0 : i32
    %c0_i32_1 = arith.constant 0 : i32
    return %c0_i32, %c0_i32_0 : i32, i32
  }
  func.func @transform_3(%arg0: i32) -> (i32, i32) {
    %c0_i32 = arith.constant 0 : i32
    %c0_i32_0 = arith.constant 0 : i32
    return %arg0, %c0_i32 : i32, i32
  }
  func.func @transform_4(%arg0: i32) -> (i32, i32) {
    %c0_i32 = arith.constant 0 : i32
    %c0_i32_0 = arith.constant 0 : i32
    %c0_i32_1 = arith.constant 0 : i32
    return %c0_i32, %c0_i32_0 : i32, i32
  }
  func.func @transform_5(%arg0: i32) -> (i32, i32) {
    %c0_i32 = arith.constant 0 : i32
    %c0_i32_0 = arith.constant 0 : i32
    %c0_i32_1 = arith.constant 0 : i32
    return %c0_i32, %c0_i32_0 : i32, i32
  }
  func.func @transform_6(%arg0: i32) -> (i32, i32) {
    %c0_i32 = arith.constant 0 : i32
    %c0_i32_0 = arith.constant 0 : i32
    return %arg0, %c0_i32 : i32, i32
  }
}

</mosaic_0001>

<bundles_post_ra>
// kernel: backbone_forward.10
= control target key start
LH: loop header
LB: loop body
LE: loop exit
PB: predicated region body
PF: predicated region fallthrough
CT: control target
= control target key end

     0   :  { %s1157_s12 = smov 0   ;;  %s1361_s0 = inlined_call_operand.vmem [shape: bf16[512,147], index: 0, kind: input, shape index: {}]   ;;  %s1362_s1 = inlined_call_operand.vmem [shape: bf16[147,16], index: 1, kind: input, shape index: {}]   ;;  %s1363_s2 = inlined_call_operand.vmem [shape: f32[1,16], index: 2, kind: input, shape index: {}]   ;;  %s1364_s3 = inlined_call_operand.vmem [shape: bf16[512,16], index: 3, kind: output, shape index: {}]  }
   0x1 LB: > { %s903_s13 = sadd.s32 4294967295, %s1133_s12   ;;  %p907_p0 = scmp.ge.s32.totalorder %s1133_s12, 1  ;;  %s1133_s12 = sphi %s1157_s12, %s13_s12  }
   0x2   : > { %p139_p1 = scmp.lt.s32.totalorder %s1133_s12, 3 }
   0x4   : > { %p140_p2 = pnand %p907_p0, %p139_p1 }
   0x5   : > { %s908_s20 = sshll.u32 (!%p140_p2), %s903_s13, 5 }
   0x6   : > { %143 = sbr.rel (%p140_p2) target bundleno = 312 (0x138), region = 32  ;;  %p165_p3 = scmp.lt.s32.totalorder (!%p140_p2), %s908_s20, 63 }
   0xb   : > { %v1069_v0 = vld [vmem:[%s1362_s1 + $0x38] sm:$0xff]   ;;  %v1135_v1 = vmov 0   ;;  %v1070_v2 = vld [vmem:[%s1362_s1 + $0x30] sm:$0xff]   ;;  %v1071_v3 = vld [vmem:[%s1362_s1 + $0x28] sm:$0xff]   ;;  %s1366_s20 = smov (!%p165_p3, %s908_s20), 63  ;;  %vm437_vm0 = vcmask 154624  }
   0xc   : > { %493 = vmatprep.subr.bf16.mxu0 %v1135_v1  ;;  %1039 = vmatprep.subr.bf16.mxu1 %v1135_v1  ;;  %v1072_v4 = vld [vmem:[%s1362_s1 + $0x20] sm:$0xff]   ;;  %s1006_s23 = sshll.u32 %s1366_s20, 3  ;;  %v1073_v5 = vld [vmem:[%s1362_s1 + $0x18] sm:$0xff]   ;;  %v1074_v8 = vld [vmem:[%s1362_s1 + $0x10] sm:$0xff]   ;;  %vm486_vm1 = vcmask 1040384   ;;  %vm487_vm2 = vcmask 1041408  }
   0xd   : > { %494 = vmatpush1.bf16.msra.mxu0 %v1069_v0  ;;  %1049 = vmatpush1.bf16.msra.mxu1 %v1069_v0  ;;  %s1183_s26 = scalar_lea.vmem %s1361_s0, %s1006_s23  ;;  %v1075_v9 = vld [vmem:[%s1362_s1 + $0x8] sm:$0xff]   ;;  %v1136_v10 = vmov 65535   ;;  %v1076_v12 = vld [vmem:[%s1362_s1] sm:$0xff]   ;;  %s912_s15 = sshll.u32 %s1366_s20, 2  ;;  %vm814_vm3 = vcmask 125952  }
   0xe   : > { %495 = vmatprep.subr.bf16.mxu0 %v1135_v1  ;;  %1040 = vmatprep.subr.bf16.mxu1 %v1135_v1  ;;  %v1081_v6 = vld [vmem:[%s1183_s26 + $0x4] ss:$8 sps:$4 sm:$0xff]   ;;  %v488_v11 = vsel %vm486_vm1, 4294967295, %v1136_v10  ;;  %v1077_v13 = vld [vmem:[%s1362_s1 + $0x48] ss:$0 sps:$4 sm:$0x33]   ;;  %s1262_s18 = scalar_lea.vmem %s1364_s3, %s912_s15 }
   0xf   : > { %v1084_v7 = vld [vmem:[%s1183_s26 + $0x84] ss:$8 sps:$4 sm:$0xff]   ;;  %956 = vmatprep.mubr.msk.bf16.mxu0 %vm437_vm0, %v1081_v6  ;;  %v489_v14 = vsel %vm487_vm2, %v488_v11, 0  ;;  %v1079_v17 = vld [vmem:[%s1183_s26] ss:$8 sps:$4 sm:$0xff]  }
  0x10   : > { %964 = vmatprep.mubr.msk.bf16.mxu1 %vm437_vm0, %v1084_v7  ;;  %v491_v15 = vand.u32 %v1077_v13, %v489_v14  ;;  %v1078_v16 = vld [vmem:[%s1362_s1 + $0x40] sm:$0xff]   ;;  %v1085_v19 = vld [vmem:[%s1183_s26 + $0x14] ss:$8 sps:$4 sm:$0xff]   ;;  %v1089_v21 = vld [vmem:[%s1183_s26 + $0x10] ss:$8 sps:$4 sm:$0xff]  }
  0x11   : > { %496 = vmatpush1.bf16.msra.mxu0 %v1070_v2  ;;  %1050 = vmatpush1.bf16.msra.mxu1 %v1070_v2  ;;  %v1082_v18 = vld [vmem:[%s1183_s26 + $0x80] ss:$8 sps:$4 sm:$0xff]   ;;  %v1087_v20 = vld [vmem:[%s1183_s26 + $0x94] ss:$8 sps:$4 sm:$0xff]   ;;  %v1090_v22 = vld [vmem:[%s1183_s26 + $0x90] ss:$8 sps:$4 sm:$0xff]  }
  0x12   : > { %497 = vmatprep.subr.bf16.mxu0 %v1135_v1  ;;  %1041 = vmatprep.subr.bf16.mxu1 %v1135_v1  ;;  %v1091_v23 = vld [vmem:[%s1183_s26 + $0x24] ss:$8 sps:$4 sm:$0xff]   ;;  %v1095_v25 = vld [vmem:[%s1183_s26 + $0x20] ss:$8 sps:$4 sm:$0xff]   ;;  %v1097_v27 = vld [vmem:[%s1183_s26 + $0x34] ss:$8 sps:$4 sm:$0xff]  }
  0x13   : > { %v1093_v24 = vld [vmem:[%s1183_s26 + $0xa4] ss:$8 sps:$4 sm:$0xff]   ;;  %v1096_v26 = vld [vmem:[%s1183_s26 + $0xa0] ss:$8 sps:$4 sm:$0xff]   ;;  %v1099_v28 = vld [vmem:[%s1183_s26 + $0xb4] ss:$8 sps:$4 sm:$0xff]  }
  0x14   : > { %v1101_v29 = vld [vmem:[%s1183_s26 + $0x30] ss:$8 sps:$4 sm:$0xff]   ;;  %v1103_v31 = vld [vmem:[%s1183_s26 + $0x44] ss:$8 sps:$4 sm:$0xff]   ;;  %v1107_v33 = vld [vmem:[%s1183_s26 + $0x40] ss:$8 sps:$4 sm:$0xff]  }
  0x15   : > { %498 = vmatpush1.bf16.msra.mxu0 %v1071_v3  ;;  %1051 = vmatpush1.bf16.msra.mxu1 %v1071_v3  ;;  %v1102_v30 = vld [vmem:[%s1183_s26 + $0xb0] ss:$8 sps:$4 sm:$0xff]   ;;  %v1105_v32 = vld [vmem:[%s1183_s26 + $0xc4] ss:$8 sps:$4 sm:$0xff]   ;;  %v1108_v34 = vld [vmem:[%s1183_s26 + $0xc0] ss:$8 sps:$4 sm:$0xff]  }
  0x16   : > { %499 = vmatprep.subr.bf16.mxu0 %v1135_v1  ;;  %1042 = vmatprep.subr.bf16.mxu1 %v1135_v1  ;;  %v1109_v35 = vld [vmem:[%s1183_s26 + $0x54] ss:$8 sps:$4 sm:$0xff]   ;;  %v1113_v37 = vld [vmem:[%s1183_s26 + $0x50] ss:$8 sps:$4 sm:$0xff]   ;;  %v1115_v39 = vld [vmem:[%s1183_s26 + $0x64] ss:$8 sps:$4 sm:$0xff]  }
  0x17   : > { %v1111_v36 = vld [vmem:[%s1183_s26 + $0xd4] ss:$8 sps:$4 sm:$0xff]   ;;  %v1114_v38 = vld [vmem:[%s1183_s26 + $0xd0] ss:$8 sps:$4 sm:$0xff]   ;;  %v1117_v40 = vld [vmem:[%s1183_s26 + $0xe4] ss:$8 sps:$4 sm:$0xff]  }
  0x18   : > { %v1119_v41 = vld [vmem:[%s1183_s26 + $0x60] ss:$8 sps:$4 sm:$0xff]   ;;  %v1121_v43 = vld [vmem:[%s1183_s26 + $0x74] ss:$8 sps:$4 sm:$0xff]   ;;  %v1125_v45 = vld [vmem:[%s1183_s26 + $0x70] ss:$8 sps:$4 sm:$0xff]  }
  0x19   : > { %500 = vmatpush1.bf16.msra.mxu0 %v1072_v4  ;;  %1052 = vmatpush1.bf16.msra.mxu1 %v1072_v4  ;;  %v1120_v42 = vld [vmem:[%s1183_s26 + $0xe0] ss:$8 sps:$4 sm:$0xff]   ;;  %v1123_v44 = vld [vmem:[%s1183_s26 + $0xf4] ss:$8 sps:$4 sm:$0xff]   ;;  %v1126_v46 = vld [vmem:[%s1183_s26 + $0xf0] ss:$8 sps:$4 sm:$0xff]  }
  0x1a   : > { %501 = vmatprep.subr.bf16.mxu0 %v1135_v1  ;;  %1043 = vmatprep.subr.bf16.mxu1 %v1135_v1  ;;  %v1254_v47 = vld [vmem:[%s1363_s2] ss:$0 sm:$0xff] }
  0x1d   : > { %502 = vmatpush1.bf16.msra.mxu0 %v1073_v5  ;;  %1053 = vmatpush1.bf16.msra.mxu1 %v1073_v5 }
  0x1e   : > { %503 = vmatprep.subr.bf16.mxu0 %v1135_v1  ;;  %1044 = vmatprep.subr.bf16.mxu1 %v1135_v1 }
  0x21   : > { %504 = vmatpush1.bf16.msra.mxu0 %v1074_v8  ;;  %1054 = vmatpush1.bf16.msra.mxu1 %v1074_v8 }
  0x22   : > { %505 = vmatprep.subr.bf16.mxu0 %v1135_v1  ;;  %1045 = vmatprep.subr.bf16.mxu1 %v1135_v1 }
  0x25   : > { %506 = vmatpush1.bf16.msra.mxu0 %v1075_v9  ;;  %1055 = vmatpush1.bf16.msra.mxu1 %v1075_v9 }
  0x26   : > { %507 = vmatprep.subr.bf16.mxu0 %v1135_v1  ;;  %1046 = vmatprep.subr.bf16.mxu1 %v1135_v1 }
  0x29   : > { %508 = vmatpush1.bf16.msra.mxu0 %v1076_v12  ;;  %1056 = vmatpush1.bf16.msra.mxu1 %v1076_v12 }
  0x2a   : > { %521 = vmatprep.subr.bf16.mxu0 %v1135_v1  ;;  %1047 = vmatprep.subr.bf16.mxu1 %v1135_v1 }
  0x2d   : > { %522 = vmatpush2.bf16.msra.mxu0 %v491_v15  ;;  %1057 = vmatpush2.bf16.msra.mxu1 %v491_v15 }
  0x2e   : > { %523 = vmatprep.subr.bf16.mxu0 %v1135_v1  ;;  %1048 = vmatprep.subr.bf16.mxu1 %v1135_v1 }
  0x31   : > { %524 = vmatpush2.bf16.msra.mxu0 %v1078_v16  ;;  %1058 = vmatpush2.bf16.msra.mxu1 %v1078_v16 }
  0x34   : > { %526 = vmatmul.mubr.bf16.vlgmr.msra.gmra.mxu0 %v1079_v17  ;;  %590 = vmatmul.mubr.bf16.vlgmr.msra.gmra.mxu1 %v1082_v18 }
  0x35   : > { %957 = vmatprep.mubr.msk.bf16.mxu0 %vm437_vm0, %v1085_v19  ;;  %965 = vmatprep.mubr.msk.bf16.mxu1 %vm437_vm0, %v1087_v20 }
  0x3c   : > { %534 = vmatmul.mubr.bf16.gmra.mxu0 %v1089_v21  ;;  %598 = vmatmul.mubr.bf16.gmra.mxu1 %v1090_v22 }
  0x3d   : > { %958 = vmatprep.mubr.msk.bf16.mxu0 %vm437_vm0, %v1091_v23  ;;  %966 = vmatprep.mubr.msk.bf16.mxu1 %vm437_vm0, %v1093_v24 }
  0x44   : > { %542 = vmatmul.mubr.bf16.gmra.mxu0 %v1095_v25  ;;  %606 = vmatmul.mubr.bf16.gmra.mxu1 %v1096_v26 }
  0x45   : > { %959 = vmatprep.mubr.msk.bf16.mxu0 %vm437_vm0, %v1097_v27  ;;  %967 = vmatprep.mubr.msk.bf16.mxu1 %vm437_vm0, %v1099_v28 }
  0x4c   : > { %550 = vmatmul.mubr.bf16.gmra.mxu0 %v1101_v29  ;;  %614 = vmatmul.mubr.bf16.gmra.mxu1 %v1102_v30 }
  0x4d   : > { %960 = vmatprep.mubr.msk.bf16.mxu0 %vm437_vm0, %v1103_v31  ;;  %968 = vmatprep.mubr.msk.bf16.mxu1 %vm437_vm0, %v1105_v32 }
  0x54   : > { %558 = vmatmul.mubr.bf16.gmra.mxu0 %v1107_v33  ;;  %622 = vmatmul.mubr.bf16.gmra.mxu1 %v1108_v34 }
  0x55   : > { %961 = vmatprep.mubr.msk.bf16.mxu0 %vm437_vm0, %v1109_v35  ;;  %969 = vmatprep.mubr.msk.bf16.mxu1 %vm437_vm0, %v1111_v36 }
  0x5c   : > { %566 = vmatmul.mubr.bf16.gmra.mxu0 %v1113_v37  ;;  %630 = vmatmul.mubr.bf16.gmra.mxu1 %v1114_v38 }
  0x5d   : > { %962 = vmatprep.mubr.msk.bf16.mxu0 %vm437_vm0, %v1115_v39  ;;  %970 = vmatprep.mubr.msk.bf16.mxu1 %vm437_vm0, %v1117_v40 }
  0x64   : > { %574 = vmatmul.mubr.bf16.gmra.mxu0 %v1119_v41  ;;  %638 = vmatmul.mubr.bf16.gmra.mxu1 %v1120_v42 }
  0x65   : > { %963 = vmatprep.mubr.msk.bf16.mxu0 %vm437_vm0, %v1121_v43  ;;  %971 = vmatprep.mubr.msk.bf16.mxu1 %vm437_vm0, %v1123_v44 }
  0x6c   : > { %582 = vmatmul.mubr.bf16.gmra.mxu0 %v1125_v45  ;;  %646 = vmatmul.mubr.bf16.gmra.mxu1 %v1126_v46 }
  0xf4   : > { %v527_v48 = vpop.f32.mrf.mxu0  ;;  %v591_v49 = vpop.f32.mrf.mxu1 }
  0xf5   : > { %v528_v50 = vadd.f32 %v1254_v47, %v527_v48  ;;  %v592_v51 = vadd.f32 %v1254_v47, %v591_v49 }
  0xf6   : > { %v529_v52 = vpop.f32.mrf.mxu0  ;;  %v593_v53 = vpop.f32.mrf.mxu1 }
  0xf7   : > { %v654_v54 = vmax.f32 %v528_v50, 0.0  ;;  %v670_v55 = vmax.f32 %v592_v51, 0.0 }
  0xf8   : > { %v530_v56 = vpop.f32.mrf.mxu0  ;;  %v594_v57 = vpop.f32.mrf.mxu1 }
  0xf9   : > { %v1007_v58 = vpack.c.bf16 %v654_v54, %v654_v54  ;;  %v1023_v59 = vpack.c.bf16 %v670_v55, %v670_v55  ;;  %v531_v60 = vadd.f32 %v1254_v47, %v530_v56  ;;  %v595_v61 = vadd.f32 %v1254_v47, %v594_v57 }
  0xfa   : > { %v532_v62 = vpop.f32.mrf.mxu0  ;;  %v596_v63 = vpop.f32.mrf.mxu1 }
  0xfb   : > { %815 = vst.msk [vmem:[%s1262_s18] sm:$0xf] %vm814_vm3, %v1007_v58  ;;  %831 = vst.msk [vmem:[%s1262_s18 + $0x40] sm:$0xf] %vm814_vm3, %v1023_v59  ;;  %v655_v0 = vmax.f32 %v531_v60, 0.0  ;;  %v671_v1 = vmax.f32 %v595_v61, 0.0 }
  0xfc   : > { %v535_v2 = vpop.f32.mrf.mxu0  ;;  %v599_v3 = vpop.f32.mrf.mxu1 }
  0xfd   : > { %v1008_v4 = vpack.c.bf16 %v655_v0, %v655_v0  ;;  %v1024_v5 = vpack.c.bf16 %v671_v1, %v671_v1  ;;  %v536_v6 = vadd.f32 %v1254_v47, %v535_v2  ;;  %v600_v7 = vadd.f32 %v1254_v47, %v599_v3 }
  0xfe   : > { %v537_v8 = vpop.f32.mrf.mxu0  ;;  %v601_v9 = vpop.f32.mrf.mxu1 }
  0xff   : > { %816 = vst.msk [vmem:[%s1262_s18 + $0x4] sm:$0xf] %vm814_vm3, %v1008_v4  ;;  %832 = vst.msk [vmem:[%s1262_s18 + $0x44] sm:$0xf] %vm814_vm3, %v1024_v5  ;;  %v656_v10 = vmax.f32 %v536_v6, 0.0  ;;  %v672_v11 = vmax.f32 %v600_v7, 0.0 }
 0x100   : > { %v538_v12 = vpop.f32.mrf.mxu0  ;;  %v602_v13 = vpop.f32.mrf.mxu1 }
 0x101   : > { %v1009_v14 = vpack.c.bf16 %v656_v10, %v656_v10  ;;  %v1025_v15 = vpack.c.bf16 %v672_v11, %v672_v11  ;;  %v539_v16 = vadd.f32 %v1254_v47, %v538_v12  ;;  %v603_v17 = vadd.f32 %v1254_v47, %v602_v13 }
 0x102   : > { %v540_v18 = vpop.f32.mrf.mxu0  ;;  %v604_v19 = vpop.f32.mrf.mxu1 }
 0x103   : > { %817 = vst.msk [vmem:[%s1262_s18 + $0x8] sm:$0xf] %vm814_vm3, %v1009_v14  ;;  %833 = vst.msk [vmem:[%s1262_s18 + $0x48] sm:$0xf] %vm814_vm3, %v1025_v15  ;;  %v657_v20 = vmax.f32 %v539_v16, 0.0  ;;  %v673_v21 = vmax.f32 %v603_v17, 0.0 }
 0x104   : > { %v543_v22 = vpop.f32.mrf.mxu0  ;;  %v607_v23 = vpop.f32.mrf.mxu1 }
 0x105   : > { %v1010_v24 = vpack.c.bf16 %v657_v20, %v657_v20  ;;  %v1026_v25 = vpack.c.bf16 %v673_v21, %v673_v21  ;;  %v544_v26 = vadd.f32 %v1254_v47, %v543_v22  ;;  %v608_v27 = vadd.f32 %v1254_v47, %v607_v23 }
 0x106   : > { %v545_v28 = vpop.f32.mrf.mxu0  ;;  %v609_v29 = vpop.f32.mrf.mxu1 }
 0x107   : > { %818 = vst.msk [vmem:[%s1262_s18 + $0xc] sm:$0xf] %vm814_vm3, %v1010_v24  ;;  %834 = vst.msk [vmem:[%s1262_s18 + $0x4c] sm:$0xf] %vm814_vm3, %v1026_v25  ;;  %v658_v30 = vmax.f32 %v544_v26, 0.0  ;;  %v674_v31 = vmax.f32 %v608_v27, 0.0 }
 0x108   : > { %v546_v32 = vpop.f32.mrf.mxu0  ;;  %v610_v33 = vpop.f32.mrf.mxu1 }
 0x109   : > { %v1011_v34 = vpack.c.bf16 %v658_v30, %v658_v30  ;;  %v1027_v35 = vpack.c.bf16 %v674_v31, %v674_v31  ;;  %v547_v36 = vadd.f32 %v1254_v47, %v546_v32  ;;  %v611_v37 = vadd.f32 %v1254_v47, %v610_v33 }
 0x10a   : > { %v548_v38 = vpop.f32.mrf.mxu0  ;;  %v612_v39 = vpop.f32.mrf.mxu1 }
 0x10b   : > { %819 = vst.msk [vmem:[%s1262_s18 + $0x10] sm:$0xf] %vm814_vm3, %v1011_v34  ;;  %835 = vst.msk [vmem:[%s1262_s18 + $0x50] sm:$0xf] %vm814_vm3, %v1027_v35  ;;  %v659_v40 = vmax.f32 %v547_v36, 0.0  ;;  %v675_v41 = vmax.f32 %v611_v37, 0.0 }
 0x10c   : > { %v551_v42 = vpop.f32.mrf.mxu0  ;;  %v615_v43 = vpop.f32.mrf.mxu1 }
 0x10d   : > { %v1012_v44 = vpack.c.bf16 %v659_v40, %v659_v40  ;;  %v1028_v45 = vpack.c.bf16 %v675_v41, %v675_v41  ;;  %v552_v46 = vadd.f32 %v1254_v47, %v551_v42  ;;  %v616_v48 = vadd.f32 %v1254_v47, %v615_v43 }
 0x10e   : > { %v553_v49 = vpop.f32.mrf.mxu0  ;;  %v617_v50 = vpop.f32.mrf.mxu1 }
 0x10f   : > { %820 = vst.msk [vmem:[%s1262_s18 + $0x14] sm:$0xf] %vm814_vm3, %v1012_v44  ;;  %836 = vst.msk [vmem:[%s1262_s18 + $0x54] sm:$0xf] %vm814_vm3, %v1028_v45  ;;  %v660_v51 = vmax.f32 %v552_v46, 0.0  ;;  %v676_v52 = vmax.f32 %v616_v48, 0.0 }
 0x110   : > { %v554_v53 = vpop.f32.mrf.mxu0  ;;  %v618_v54 = vpop.f32.mrf.mxu1 }
 0x111   : > { %v1013_v55 = vpack.c.bf16 %v660_v51, %v660_v51  ;;  %v1029_v56 = vpack.c.bf16 %v676_v52, %v676_v52  ;;  %v555_v57 = vadd.f32 %v1254_v47, %v554_v53  ;;  %v619_v58 = vadd.f32 %v1254_v47, %v618_v54 }
 0x112   : > { %v556_v59 = vpop.f32.mrf.mxu0  ;;  %v620_v60 = vpop.f32.mrf.mxu1 }
 0x113   : > { %821 = vst.msk [vmem:[%s1262_s18 + $0x18] sm:$0xf] %vm814_vm3, %v1013_v55  ;;  %837 = vst.msk [vmem:[%s1262_s18 + $0x58] sm:$0xf] %vm814_vm3, %v1029_v56  ;;  %v661_v61 = vmax.f32 %v555_v57, 0.0  ;;  %v677_v62 = vmax.f32 %v619_v58, 0.0 }
 0x114   : > { %v559_v63 = vpop.f32.mrf.mxu0  ;;  %v623_v0 = vpop.f32.mrf.mxu1 }
 0x115   : > { %v1014_v1 = vpack.c.bf16 %v661_v61, %v661_v61  ;;  %v1030_v2 = vpack.c.bf16 %v677_v62, %v677_v62  ;;  %v560_v3 = vadd.f32 %v1254_v47, %v559_v63  ;;  %v624_v4 = vadd.f32 %v1254_v47, %v623_v0 }
 0x116   : > { %v561_v5 = vpop.f32.mrf.mxu0  ;;  %v625_v6 = vpop.f32.mrf.mxu1 }
 0x117   : > { %822 = vst.msk [vmem:[%s1262_s18 + $0x1c] sm:$0xf] %vm814_vm3, %v1014_v1  ;;  %838 = vst.msk [vmem:[%s1262_s18 + $0x5c] sm:$0xf] %vm814_vm3, %v1030_v2  ;;  %v662_v7 = vmax.f32 %v560_v3, 0.0  ;;  %v678_v8 = vmax.f32 %v624_v4, 0.0 }
 0x118   : > { %v562_v9 = vpop.f32.mrf.mxu0  ;;  %v626_v10 = vpop.f32.mrf.mxu1 }
 0x119   : > { %v1015_v11 = vpack.c.bf16 %v662_v7, %v662_v7  ;;  %v1031_v12 = vpack.c.bf16 %v678_v8, %v678_v8  ;;  %v563_v13 = vadd.f32 %v1254_v47, %v562_v9  ;;  %v627_v14 = vadd.f32 %v1254_v47, %v626_v10 }
 0x11a   : > { %v564_v15 = vpop.f32.mrf.mxu0  ;;  %v628_v16 = vpop.f32.mrf.mxu1 }
 0x11b   : > { %823 = vst.msk [vmem:[%s1262_s18 + $0x20] sm:$0xf] %vm814_vm3, %v1015_v11  ;;  %839 = vst.msk [vmem:[%s1262_s18 + $0x60] sm:$0xf] %vm814_vm3, %v1031_v12  ;;  %v663_v17 = vmax.f32 %v563_v13, 0.0  ;;  %v679_v18 = vmax.f32 %v627_v14, 0.0 }
 0x11c   : > { %v567_v19 = vpop.f32.mrf.mxu0  ;;  %v631_v20 = vpop.f32.mrf.mxu1 }
 0x11d   : > { %v1016_v21 = vpack.c.bf16 %v663_v17, %v663_v17  ;;  %v1032_v22 = vpack.c.bf16 %v679_v18, %v679_v18  ;;  %v568_v23 = vadd.f32 %v1254_v47, %v567_v19  ;;  %v632_v24 = vadd.f32 %v1254_v47, %v631_v20 }
 0x11e   : > { %v569_v25 = vpop.f32.mrf.mxu0  ;;  %v633_v26 = vpop.f32.mrf.mxu1 }
 0x11f   : > { %824 = vst.msk [vmem:[%s1262_s18 + $0x24] sm:$0xf] %vm814_vm3, %v1016_v21  ;;  %840 = vst.msk [vmem:[%s1262_s18 + $0x64] sm:$0xf] %vm814_vm3, %v1032_v22  ;;  %v664_v27 = vmax.f32 %v568_v23, 0.0  ;;  %v680_v28 = vmax.f32 %v632_v24, 0.0 }
 0x120   : > { %v570_v29 = vpop.f32.mrf.mxu0  ;;  %v634_v30 = vpop.f32.mrf.mxu1 }
 0x121   : > { %v1017_v31 = vpack.c.bf16 %v664_v27, %v664_v27  ;;  %v1033_v32 = vpack.c.bf16 %v680_v28, %v680_v28  ;;  %v571_v33 = vadd.f32 %v1254_v47, %v570_v29  ;;  %v635_v34 = vadd.f32 %v1254_v47, %v634_v30 }
 0x122   : > { %v572_v35 = vpop.f32.mrf.mxu0  ;;  %v636_v36 = vpop.f32.mrf.mxu1 }
 0x123   : > { %825 = vst.msk [vmem:[%s1262_s18 + $0x28] sm:$0xf] %vm814_vm3, %v1017_v31  ;;  %841 = vst.msk [vmem:[%s1262_s18 + $0x68] sm:$0xf] %vm814_vm3, %v1033_v32  ;;  %v665_v37 = vmax.f32 %v571_v33, 0.0  ;;  %v681_v38 = vmax.f32 %v635_v34, 0.0 }
 0x124   : > { %v575_v39 = vpop.f32.mrf.mxu0  ;;  %v639_v40 = vpop.f32.mrf.mxu1 }
 0x125   : > { %v1018_v41 = vpack.c.bf16 %v665_v37, %v665_v37  ;;  %v1034_v42 = vpack.c.bf16 %v681_v38, %v681_v38  ;;  %v576_v43 = vadd.f32 %v1254_v47, %v575_v39  ;;  %v640_v44 = vadd.f32 %v1254_v47, %v639_v40 }
 0x126   : > { %v577_v45 = vpop.f32.mrf.mxu0  ;;  %v641_v46 = vpop.f32.mrf.mxu1 }
 0x127   : > { %826 = vst.msk [vmem:[%s1262_s18 + $0x2c] sm:$0xf] %vm814_vm3, %v1018_v41  ;;  %842 = vst.msk [vmem:[%s1262_s18 + $0x6c] sm:$0xf] %vm814_vm3, %v1034_v42  ;;  %v666_v48 = vmax.f32 %v576_v43, 0.0  ;;  %v682_v49 = vmax.f32 %v640_v44, 0.0 }
 0x128   : > { %v578_v50 = vpop.f32.mrf.mxu0  ;;  %v642_v51 = vpop.f32.mrf.mxu1 }
 0x129   : > { %v1019_v52 = vpack.c.bf16 %v666_v48, %v666_v48  ;;  %v1035_v53 = vpack.c.bf16 %v682_v49, %v682_v49  ;;  %v579_v54 = vadd.f32 %v1254_v47, %v578_v50  ;;  %v643_v55 = vadd.f32 %v1254_v47, %v642_v51 }
 0x12a   : > { %v580_v56 = vpop.f32.mrf.mxu0  ;;  %v644_v57 = vpop.f32.mrf.mxu1 }
 0x12b   : > { %827 = vst.msk [vmem:[%s1262_s18 + $0x30] sm:$0xf] %vm814_vm3, %v1019_v52  ;;  %843 = vst.msk [vmem:[%s1262_s18 + $0x70] sm:$0xf] %vm814_vm3, %v1035_v53  ;;  %v667_v58 = vmax.f32 %v579_v54, 0.0  ;;  %v683_v59 = vmax.f32 %v643_v55, 0.0 }
 0x12c   : > { %v583_v60 = vpop.f32.mrf.mxu0  ;;  %v647_v61 = vpop.f32.mrf.mxu1 }
 0x12d   : > { %v1020_v62 = vpack.c.bf16 %v667_v58, %v667_v58  ;;  %v1036_v63 = vpack.c.bf16 %v683_v59, %v683_v59  ;;  %v584_v0 = vadd.f32 %v1254_v47, %v583_v60  ;;  %v648_v1 = vadd.f32 %v1254_v47, %v647_v61 }
 0x12e   : > { %v585_v2 = vpop.f32.mrf.mxu0  ;;  %v649_v3 = vpop.f32.mrf.mxu1 }
 0x12f   : > { %828 = vst.msk [vmem:[%s1262_s18 + $0x34] sm:$0xf] %vm814_vm3, %v1020_v62  ;;  %844 = vst.msk [vmem:[%s1262_s18 + $0x74] sm:$0xf] %vm814_vm3, %v1036_v63  ;;  %v668_v4 = vmax.f32 %v584_v0, 0.0  ;;  %v684_v5 = vmax.f32 %v648_v1, 0.0 }
 0x130   : > { %v586_v6 = vpop.f32.mrf.mxu0  ;;  %v650_v7 = vpop.f32.mrf.mxu1 }
 0x131   : > { %v1021_v8 = vpack.c.bf16 %v668_v4, %v668_v4  ;;  %v1037_v9 = vpack.c.bf16 %v684_v5, %v684_v5  ;;  %v587_v10 = vadd.f32 %v1254_v47, %v586_v6  ;;  %v651_v11 = vadd.f32 %v1254_v47, %v650_v7 }
 0x132   : > { %v588_v12 = vpop.f32.mrf.mxu0  ;;  %v652_v13 = vpop.f32.mrf.mxu1 }
 0x133   : > { %829 = vst.msk [vmem:[%s1262_s18 + $0x38] sm:$0xf] %vm814_vm3, %v1021_v8  ;;  %845 = vst.msk [vmem:[%s1262_s18 + $0x78] sm:$0xf] %vm814_vm3, %v1037_v9  ;;  %v669_v14 = vmax.f32 %v587_v10, 0.0  ;;  %v685_v15 = vmax.f32 %v651_v11, 0.0 }
 0x135   : > { %v1022_v16 = vpack.c.bf16 %v669_v14, %v669_v14  ;;  %v1038_v17 = vpack.c.bf16 %v685_v15, %v685_v15 }
 0x137   : > { %830 = vst.msk [vmem:[%s1262_s18 + $0x3c] sm:$0xf] %vm814_vm3, %v1022_v16  ;;  %846 = vst.msk [vmem:[%s1262_s18 + $0x7c] sm:$0xf] %vm814_vm3, %v1038_v17 }
 0x138 PF: > { %s13_s12 = sadd.s32 1, %s1133_s12  }
 0x139   : > { %p10_p4 = scmp.ge.s32.totalorder %s13_s12, 4  }
 0x13b   :  { %12 = sbr.rel (!%p10_p4) target bundleno = 1 (0x1), region = 62 }

// kernel: backbone_forward.11
= control target key start
LH: loop header
LB: loop body
LE: loop exit
PB: predicated region body
PF: predicated region fallthrough
CT: control target
= control target key end

     0   :  { %s1261_s6 = smov 0   ;;  %s1815_s0 = inlined_call_operand.vmem [shape: bf16[2,18,18,16], index: 0, kind: input, shape index: {}]   ;;  %s1816_s1 = inlined_call_operand.vmem [shape: bf16[2,16,16,16], index: 1, kind: output, shape index: {}]  }
   0x1 LB: > { %s1205_s7 = sadd.s32 4294967295, %s1249_s6   ;;  %p1209_p0 = scmp.ge.s32.totalorder %s1249_s6, 1  ;;  %s1249_s6 = sphi %s1261_s6, %s11_s6  }
   0x2   : > { %p87_p1 = scmp.lt.s32.totalorder %s1249_s6, 3 }
   0x4   : > { %p88_p2 = pnand %p1209_p0, %p87_p1 }
   0x5   : > { %p107_p3 = scmp.lt.s32.totalorder (!%p88_p2), %s1205_s7, 1 }
   0x6   : > { %91 = sbr.rel (%p88_p2) target bundleno = 187 (0xbb), region = 24 }
   0xb   : > { %s1822_s7 = smov (!%p107_p3, %s1205_s7), 1  ;;  %vm171_vm0 = vsmask.f32 3328  ;;  %vm172_vm1 = vsmask.f32 7440  ;;  %vm670_vm2 = vcmask 1042432  }
   0xc   : > { %s1234_s8 = smul.u32 216, %s1822_s7  ;;  %vm671_vm3 = vcmask 1046532   ;;  %vm1309_vm5 = vmor %vm171_vm0, %vm172_vm1  ;;  %vm1117_vm6 = vcmask 125952   ;;  %s1233_s12 = sshll.u32 %s1822_s7, 7 }
   0xd   : > { %vm1301_vm4 = vmor %vm670_vm2, %vm671_vm3  ;;  %s1375_s15 = scalar_lea.vmem %s1816_s1, %s1233_s12 }
   0xe   : > { %s1275_s11 = scalar_lea.vmem %s1815_s0, %s1234_s8 }
   0xf   : > { %v117_v0 = vld [vmem:[%s1275_s11] sm:$0xf]  ;;  %v1279_v1 = vld [vmem:[%s1275_s11 + $0x4] sm:$0xf]  ;;  %v1282_v2 = vld [vmem:[%s1275_s11 + $0xc] sm:$0xf] }
  0x10   : > { %v1285_v3 = vld [vmem:[%s1275_s11 + $0x10] sm:$0xf]  ;;  %v1288_v4 = vld [vmem:[%s1275_s11 + $0x18] sm:$0xf]  ;;  %v175_v5 = vshrl.u32 %v117_v0, 16  ;;  %v178_v6 = vshll.u32 %v117_v0, 16 }
  0x11   : > { %v184_v7 = vshll.u32 %v1279_v1, 16  ;;  %v199_v8 = vshrl.u32 %v1282_v2, 16  ;;  %v1293_v9 = vld [vmem:[%s1275_s11 + $0x1c] sm:$0xf]  ;;  %v202_v10 = vshll.u32 %v1282_v2, 16  ;;  %v208_v11 = vshll.u32 %v1285_v3, 16 }
  0x12   : > { %v223_v12 = vshrl.u32 %v1288_v4, 16  ;;  %v226_v13 = vshll.u32 %v1288_v4, 16  ;;  %v177_v14 = vrot.slane %v175_v5, 4  ;;  %v180_v15 = vrot.slane %v178_v6, 5  ;;  %v119_v32 = vld [vmem:[%s1275_s11 + $0x8] sm:$0x1] }
  0x13   : > { %v186_v16 = vrot.slane %v184_v7, 5  ;;  %v201_v17 = vrot.slane %v199_v8, 4  ;;  %v204_v18 = vrot.slane %v202_v10, 5  ;;  %v210_v19 = vrot.slane %v208_v11, 5  ;;  %v122_v42 = vld [vmem:[%s1275_s11 + $0x14] sm:$0x1] }
  0x14   : > { %v225_v20 = vrot.slane %v223_v12, 4  ;;  %v228_v21 = vrot.slane %v226_v13, 5  ;;  %v181_v23 = vor.u32 %v180_v15, %v177_v14  ;;  %v232_v24 = vshll.u32 %v1293_v9, 16  ;;  %v125_v50 = vld [vmem:[%s1275_s11 + $0x20] sm:$0x1] }
  0x15   : > { %v1213_v25 = vrot.slane %v117_v0, 9  ;;  %v675_v26 = vrot.slane %v1279_v1, 5  ;;  %v205_v28 = vor.u32 %v204_v18, %v201_v17  ;;  %v1214_v30 = vrot.slane %v1282_v2, 9  ;;  %v1343_v63 = vld [vmem:[%s1275_s11 + $0x24] sm:$0xf] }
  0x16   : > { %v229_v29 = vor.u32 %v228_v21, %v225_v20  ;;  %v682_v31 = vrot.slane %v1285_v3, 5  ;;  %v182_v33 = vrot.slane %v181_v23, 4  ;;  %v234_v34 = vrot.slane %v232_v24, 5 }
  0x17   : > { %v676_v35 = vsel %vm1301_vm4, %v1213_v25, %v675_v26  ;;  %v1215_v36 = vrot.slane %v1288_v4, 9  ;;  %v206_v37 = vrot.slane %v205_v28, 4  ;;  %v689_v40 = vrot.slane %v1293_v9, 5 }
  0x18   : > { %v230_v38 = vrot.slane %v229_v29, 4  ;;  %v683_v39 = vsel %vm1301_vm4, %v1214_v30, %v682_v31  ;;  %v187_v41 = vsel %vm1309_vm5, %v182_v33, %v186_v16  ;;  %v188_v43 = vshrl.u32 %v1279_v1, 16 }
  0x19   : > { %v194_v44 = vshll.u32 %v119_v32, 16  ;;  %v212_v45 = vshrl.u32 %v1285_v3, 16  ;;  %v211_v46 = vsel %vm1309_vm5, %v206_v37, %v210_v19  ;;  %v590_v48 = vmax.bf16 %v187_v41, %v117_v0 }
  0x1a   : > { %v235_v47 = vsel %vm1309_vm5, %v230_v38, %v234_v34  ;;  %v1333_v49 = vsel %vm1301_vm4, %v1215_v36, %v689_v40  ;;  %v592_v51 = vmax.bf16 %v211_v46, %v1282_v2  ;;  %v190_v53 = vrot.slane %v188_v43, 4 }
  0x1b   : > { %v594_v52 = vmax.bf16 %v235_v47, %v1288_v4  ;;  %v196_v54 = vrot.slane %v194_v44, 5  ;;  %v817_v55 = vmax.bf16 %v676_v35, %v590_v48  ;;  %v214_v56 = vrot.slane %v212_v45, 4 }
  0x1c   : > { %v218_v57 = vshll.u32 %v122_v42, 16  ;;  %v236_v58 = vshrl.u32 %v1293_v9, 16  ;;  %v819_v59 = vmax.bf16 %v683_v39, %v592_v51  ;;  %v191_v61 = vor.u32 %v190_v53, %v186_v16 }
  0x1d   : > { %v1340_v60 = vmax.bf16 %v1333_v49, %v594_v52  ;;  %v242_v62 = vshll.u32 %v125_v50, 16  ;;  %v849_v0 = vmax.bf16 %v817_v55, %v1282_v2  ;;  %v215_v5 = vor.u32 %v214_v56, %v210_v19  ;;  %v1388_v55 = vld [vmem:[%s1275_s11 + $0x30] sm:$0xf] }
  0x1e   : > { %v220_v6 = vrot.slane %v218_v57, 5  ;;  %v238_v7 = vrot.slane %v236_v58, 4  ;;  %v851_v8 = vmax.bf16 %v819_v59, %v1288_v4  ;;  %v192_v11 = vrot.slane %v191_v61, 4 }
  0x1f   : > { %v853_v10 = vmax.bf16 %v1340_v60, %v1343_v63  ;;  %v244_v12 = vrot.slane %v242_v62, 5  ;;  %v907_v13 = vmax.bf16 %v849_v0, %v211_v46  ;;  %v216_v14 = vrot.slane %v215_v5, 4 }
  0x20   : > { %v239_v15 = vor.u32 %v238_v7, %v234_v34  ;;  %v677_v16 = vrot.slane %v675_v26, 4  ;;  %v909_v17 = vmax.bf16 %v851_v8, %v235_v47  ;;  %v197_v2 = vsel %vm1309_vm5, %v192_v11, %v196_v54  ;;  %v1396_v11 = vld [vmem:[%s1275_s11 + $0x34] sm:$0xf] }
  0x21   : > { %v678_v18 = vrot.slane %v119_v32, 5  ;;  %v684_v19 = vrot.slane %v682_v31, 4  ;;  %v951_v20 = vmax.bf16 %v907_v13, %v683_v39  ;;  %v221_v21 = vsel %vm1309_vm5, %v216_v14, %v220_v6  ;;  %v1361_v32 = vld [vmem:[%s1275_s11 + $0x28] sm:$0xf] }
  0x22   : > { %v240_v23 = vrot.slane %v239_v15, 4  ;;  %v591_v24 = vmax.bf16 %v197_v2, %v1279_v1  ;;  %v953_v25 = vmax.bf16 %v909_v17, %v1333_v49  ;;  %v593_v28 = vmax.bf16 %v221_v21, %v1285_v3 }
  0x23   : > { %v679_v26 = vsel %vm1301_vm4, %v677_v16, %v678_v18  ;;  %v685_v29 = vrot.slane %v122_v42, 5  ;;  %v983_v30 = vmax.bf16 %v951_v20, %v1288_v4  ;;  %v691_v33 = vrot.slane %v689_v40, 4 }
  0x24   : > { %v245_v31 = vsel %vm1309_vm5, %v240_v23, %v244_v12  ;;  %v692_v34 = vrot.slane %v125_v50, 5  ;;  %v818_v36 = vmax.bf16 %v679_v26, %v591_v24  ;;  %v247_v37 = vshrl.u32 %v1343_v63, 16  ;;  %v128_v50 = vld [vmem:[%s1275_s11 + $0x2c] sm:$0x1] }
  0x25   : > { %v595_v1 = vmax.bf16 %v245_v31, %v1293_v9  ;;  %v686_v35 = vsel %vm1301_vm4, %v684_v19, %v685_v29  ;;  %v1041_v38 = vmax.bf16 %v983_v30, %v235_v47  ;;  %v250_v41 = vshll.u32 %v1343_v63, 16 }
  0x26   : > { %v693_v4 = vsel %vm1301_vm4, %v691_v33, %v692_v34  ;;  %v820_v39 = vmax.bf16 %v686_v35, %v593_v28  ;;  %v850_v42 = vmax.bf16 %v818_v36, %v1285_v3  ;;  %v249_v43 = vrot.slane %v247_v37, 4 }
  0x27   : > { %v822_v40 = vmax.bf16 %v693_v4, %v595_v1  ;;  %v256_v44 = vshll.u32 %v1361_v32, 16  ;;  %v1085_v45 = vmax.bf16 %v1041_v38, %v1333_v49  ;;  %v252_v47 = vrot.slane %v250_v41, 5 }
  0x28   : > { %v852_v46 = vmax.bf16 %v820_v39, %v1293_v9  ;;  %v1216_v48 = vrot.slane %v1343_v63, 9  ;;  %v908_v52 = vmax.bf16 %v850_v42, %v221_v21  ;;  %v696_v54 = vrot.slane %v1361_v32, 5 }
  0x29   : > { %v854_v51 = vmax.bf16 %v822_v40, %v1361_v32  ;;  %v258_v53 = vrot.slane %v256_v44, 5  ;;  %1118 = vst.msk [vmem:[%s1375_s15] sm:$0xf] %vm1117_vm6, %v1085_v45  ;;  %v253_v56 = vor.u32 %v252_v47, %v249_v43  ;;  %v985_v49 = vmax.bf16 %v953_v25, %v1343_v63  ;;  %v1424_v44 = vld [vmem:[%s1275_s11 + $0x3c] sm:$0xf] }
  0x2a   : > { %v910_v3 = vmax.bf16 %v852_v46, %v245_v31  ;;  %v260_v57 = vshrl.u32 %v1361_v32, 16  ;;  %v952_v58 = vmax.bf16 %v908_v52, %v686_v35  ;;  %v697_v59 = vsel %vm1301_vm4, %v1216_v48, %v696_v54 }
  0x2b   : > { %v266_v61 = vshll.u32 %v128_v50, 16  ;;  %v698_v62 = vrot.slane %v696_v54, 4  ;;  %v254_v5 = vrot.slane %v253_v56, 4  ;;  %v699_v7 = vrot.slane %v128_v50, 5 }
  0x2c   : > { %v954_v0 = vmax.bf16 %v910_v3, %v693_v4  ;;  %v262_v6 = vrot.slane %v260_v57, 4  ;;  %v984_v8 = vmax.bf16 %v952_v58, %v1293_v9  ;;  %v271_v13 = vshrl.u32 %v1388_v55, 16 }
  0x2d   : > { %v268_v12 = vrot.slane %v266_v61, 5  ;;  %v274_v14 = vshll.u32 %v1388_v55, 16  ;;  %v259_v15 = vsel %vm1309_vm5, %v254_v5, %v258_v53  ;;  %v700_v17 = vsel %vm1301_vm4, %v698_v62, %v699_v7 }
  0x2e   : > { %v263_v16 = vor.u32 %v262_v6, %v258_v53  ;;  %v986_v2 = vmax.bf16 %v954_v0, %v1361_v32  ;;  %v1042_v18 = vmax.bf16 %v984_v8, %v245_v31  ;;  %v596_v9 = vmax.bf16 %v259_v15, %v1343_v63  ;;  %v131_v63 = vld [vmem:[%s1275_s11 + $0x38] sm:$0x1]  ;;  %v1435_v53 = vld [vmem:[%s1275_s11 + $0x40] sm:$0xf] }
  0x2f   : > { %v911_v19 = vmax.bf16 %v853_v10, %v259_v15  ;;  %v1043_v20 = vmax.bf16 %v985_v49, %v259_v15  ;;  %v273_v23 = vrot.slane %v271_v13, 4  ;;  %v276_v24 = vrot.slane %v274_v14, 5  ;;  %v134_v13 = vld [vmem:[%s1275_s11 + $0x44] sm:$0x1] }
  0x30   : > { %v264_v21 = vrot.slane %v263_v16, 4  ;;  %v280_v25 = vshll.u32 %v1396_v11, 16  ;;  %v1086_v28 = vmax.bf16 %v1042_v18, %v693_v4  ;;  %v823_v26 = vmax.bf16 %v697_v59, %v596_v9 }
  0x31   : > { %v955_v29 = vmax.bf16 %v911_v19, %v697_v59  ;;  %v1087_v30 = vmax.bf16 %v1043_v20, %v697_v59  ;;  %v277_v33 = vor.u32 %v276_v24, %v273_v23  ;;  %v1217_v60 = vrot.slane %v1388_v55, 9  ;;  %v1454_v19 = vld [vmem:[%s1275_s11 + $0x48] sm:$0xf] }
  0x32   : > { %v269_v31 = vsel %vm1309_vm5, %v264_v21, %v268_v12  ;;  %v282_v34 = vrot.slane %v280_v25, 5  ;;  %1119 = vst.msk [vmem:[%s1375_s15 + $0x4] sm:$0xf] %vm1117_vm6, %v1086_v28  ;;  %v855_v10 = vmax.bf16 %v823_v26, %v1388_v55  ;;  %v703_v38 = vrot.slane %v1396_v11, 5 }
  0x33   : > { %1120 = vst.msk [vmem:[%s1375_s15 + $0x8] sm:$0xf] %vm1117_vm6, %v1087_v30  ;;  %v597_v1 = vmax.bf16 %v269_v31, %v1361_v32  ;;  %v912_v35 = vmax.bf16 %v854_v51, %v269_v31  ;;  %v1044_v36 = vmax.bf16 %v986_v2, %v269_v31  ;;  %v278_v37 = vrot.slane %v277_v33, 4  ;;  %v1460_v30 = vld [vmem:[%s1275_s11 + $0x4c] sm:$0xf] }
  0x34   : > { %v987_v4 = vmax.bf16 %v955_v29, %v1388_v55  ;;  %v284_v39 = vshrl.u32 %v1396_v11, 16  ;;  %v290_v43 = vshll.u32 %v131_v63, 16  ;;  %v704_v45 = vsel %vm1301_vm4, %v1217_v60, %v703_v38 }
  0x35   : > { %v824_v41 = vmax.bf16 %v700_v17, %v597_v1  ;;  %v956_v40 = vmax.bf16 %v912_v35, %v700_v17  ;;  %v1088_v42 = vmax.bf16 %v1044_v36, %v700_v17  ;;  %v283_v32 = vsel %vm1309_vm5, %v278_v37, %v282_v34 }
  0x36   : > { %v286_v46 = vrot.slane %v284_v39, 4  ;;  %v705_v47 = vrot.slane %v703_v38, 4  ;;  %v598_v50 = vmax.bf16 %v283_v32, %v1388_v55  ;;  %v913_v51 = vmax.bf16 %v855_v10, %v283_v32 }
  0x37   : > { %v856_v48 = vmax.bf16 %v824_v41, %v1396_v11  ;;  %1121 = vst.msk [vmem:[%s1375_s15 + $0xc] sm:$0xf] %vm1117_vm6, %v1088_v42  ;;  %v1045_v52 = vmax.bf16 %v987_v4, %v283_v32  ;;  %v292_v3 = vrot.slane %v290_v43, 5  ;;  %v706_v56 = vrot.slane %v131_v63, 5  ;;  %v137_v43 = vld [vmem:[%s1275_s11 + $0x50] sm:$0x1] }
  0x38   : > { %v287_v54 = vor.u32 %v286_v46, %v282_v34  ;;  %v988_v49 = vmax.bf16 %v956_v40, %v1396_v11  ;;  %v825_v57 = vmax.bf16 %v704_v45, %v598_v50  ;;  %v957_v58 = vmax.bf16 %v913_v51, %v704_v45 }
  0x39   : > { %v1089_v59 = vmax.bf16 %v1045_v52, %v704_v45  ;;  %v295_v61 = vshrl.u32 %v1424_v44, 16  ;;  %v707_v55 = vsel %vm1301_vm4, %v705_v47, %v706_v56  ;;  %v298_v0 = vshll.u32 %v1424_v44, 16 }
  0x3a   : > { %v288_v62 = vrot.slane %v287_v54, 4  ;;  %v304_v5 = vshll.u32 %v1435_v53, 16  ;;  %v857_v6 = vmax.bf16 %v825_v57, %v1424_v44  ;;  %v1218_v8 = vrot.slane %v1424_v44, 9 }
  0x3b   : > { %1122 = vst.msk [vmem:[%s1375_s15 + $0x10] sm:$0xf] %vm1117_vm6, %v1089_v59  ;;  %v297_v7 = vrot.slane %v295_v61, 4  ;;  %v710_v12 = vrot.slane %v1435_v53, 5  ;;  %v300_v15 = vrot.slane %v298_v0, 5  ;;  %v989_v17 = vmax.bf16 %v957_v58, %v1424_v44 }
  0x3c   : > { %v293_v14 = vsel %vm1309_vm5, %v288_v62, %v292_v3  ;;  %v306_v16 = vrot.slane %v304_v5, 5  ;;  %v308_v23 = vshrl.u32 %v1435_v53, 16  ;;  %v314_v24 = vshll.u32 %v134_v13, 16  ;;  %v1487_v61 = vld [vmem:[%s1275_s11 + $0x54] sm:$0xf] }
  0x3d   : > { %v599_v2 = vmax.bf16 %v293_v14, %v1396_v11  ;;  %v914_v18 = vmax.bf16 %v856_v48, %v293_v14  ;;  %v1046_v9 = vmax.bf16 %v988_v49, %v293_v14  ;;  %v711_v20 = vsel %vm1301_vm4, %v1218_v8, %v710_v12 }
  0x3e   : > { %v301_v21 = vor.u32 %v300_v15, %v297_v7  ;;  %v712_v25 = vrot.slane %v710_v12, 4  ;;  %v713_v31 = vrot.slane %v134_v13, 5  ;;  %v310_v33 = vrot.slane %v308_v23, 4 }
  0x3f   : > { %v826_v28 = vmax.bf16 %v707_v55, %v599_v2  ;;  %v958_v26 = vmax.bf16 %v914_v18, %v707_v55  ;;  %v1090_v29 = vmax.bf16 %v1046_v9, %v707_v55  ;;  %v316_v34 = vrot.slane %v314_v24, 5  ;;  %v1498_v9 = vld [vmem:[%s1275_s11 + $0x58] sm:$0xf] }
  0x40   : > { %v302_v11 = vrot.slane %v301_v21, 4  ;;  %v319_v60 = vshrl.u32 %v1454_v19, 16  ;;  %v714_v10 = vsel %vm1301_vm4, %v712_v25, %v713_v31  ;;  %v322_v35 = vshll.u32 %v1454_v19, 16 }
  0x41   : > { %v858_v63 = vmax.bf16 %v826_v28, %v1435_v53  ;;  %1123 = vst.msk [vmem:[%s1375_s15 + $0x14] sm:$0xf] %vm1117_vm6, %v1090_v29  ;;  %v990_v1 = vmax.bf16 %v958_v26, %v1435_v53  ;;  %v311_v37 = vor.u32 %v310_v33, %v306_v16  ;;  %v328_v4 = vshll.u32 %v1460_v30, 16 }
  0x42   : > { %v307_v36 = vsel %vm1309_vm5, %v302_v11, %v306_v16  ;;  %v321_v38 = vrot.slane %v319_v60, 4  ;;  %v324_v42 = vrot.slane %v322_v35, 5  ;;  %v1219_v46 = vrot.slane %v1454_v19, 9  ;;  %v1515_v35 = vld [vmem:[%s1275_s11 + $0x60] sm:$0xf] }
  0x43   : > { %v600_v39 = vmax.bf16 %v307_v36, %v1424_v44  ;;  %v915_v41 = vmax.bf16 %v857_v6, %v307_v36  ;;  %v1047_v40 = vmax.bf16 %v989_v17, %v307_v36  ;;  %v312_v32 = vrot.slane %v311_v37, 4 }
  0x44   : > { %v330_v45 = vrot.slane %v328_v4, 5  ;;  %v717_v47 = vrot.slane %v1460_v30, 5  ;;  %v325_v52 = vor.u32 %v324_v42, %v321_v38  ;;  %v332_v3 = vshrl.u32 %v1460_v30, 16 }
  0x45   : > { %v827_v48 = vmax.bf16 %v711_v20, %v600_v39  ;;  %v959_v50 = vmax.bf16 %v915_v41, %v711_v20  ;;  %v1091_v51 = vmax.bf16 %v1047_v40, %v711_v20  ;;  %v317_v54 = vsel %vm1309_vm5, %v312_v32, %v316_v34 }
  0x46   : > { %v718_v44 = vsel %vm1301_vm4, %v1219_v46, %v717_v47  ;;  %v338_v56 = vshll.u32 %v137_v43, 16  ;;  %v601_v57 = vmax.bf16 %v317_v54, %v1435_v53  ;;  %v916_v58 = vmax.bf16 %v858_v63, %v317_v54 }
  0x47   : > { %v859_v49 = vmax.bf16 %v827_v48, %v1454_v19  ;;  %1124 = vst.msk [vmem:[%s1375_s15 + $0x18] sm:$0xf] %vm1117_vm6, %v1091_v51  ;;  %v1048_v59 = vmax.bf16 %v990_v1, %v317_v54  ;;  %v326_v62 = vrot.slane %v325_v52, 4  ;;  %v991_v55 = vmax.bf16 %v959_v50, %v1454_v19  ;;  %v140_v1 = vld [vmem:[%s1275_s11 + $0x5c] sm:$0x1] }
  0x48   : > { %v334_v0 = vrot.slane %v332_v3, 4  ;;  %v340_v5 = vrot.slane %v338_v56, 5  ;;  %v828_v6 = vmax.bf16 %v714_v10, %v601_v57  ;;  %v960_v7 = vmax.bf16 %v916_v58, %v714_v10 }
  0x49   : > { %v1092_v8 = vmax.bf16 %v1048_v59, %v714_v10  ;;  %v719_v12 = vrot.slane %v717_v47, 4  ;;  %v331_v13 = vsel %vm1309_vm5, %v326_v62, %v330_v45  ;;  %v720_v53 = vrot.slane %v137_v43, 5 }
  0x4a   : > { %v335_v14 = vor.u32 %v334_v0, %v330_v45  ;;  %v343_v15 = vshrl.u32 %v1487_v61, 16  ;;  %v860_v16 = vmax.bf16 %v828_v6, %v1460_v30  ;;  %v602_v17 = vmax.bf16 %v331_v13, %v1454_v19 }
  0x4b   : > { %1125 = vst.msk [vmem:[%s1375_s15 + $0x1c] sm:$0xf] %vm1117_vm6, %v1092_v8  ;;  %v917_v2 = vmax.bf16 %v859_v49, %v331_v13  ;;  %v1049_v18 = vmax.bf16 %v991_v55, %v331_v13  ;;  %v721_v21 = vsel %vm1301_vm4, %v719_v12, %v720_v53  ;;  %v992_v23 = vmax.bf16 %v960_v7, %v1460_v30  ;;  %v143_v53 = vld [vmem:[%s1275_s11 + $0x68] sm:$0x1] }
  0x4c   : > { %v336_v20 = vrot.slane %v335_v14, 4  ;;  %v345_v24 = vrot.slane %v343_v15, 4  ;;  %v829_v25 = vmax.bf16 %v718_v44, %v602_v17  ;;  %v346_v29 = vshll.u32 %v1487_v61, 16 }
  0x4d   : > { %v961_v28 = vmax.bf16 %v917_v2, %v718_v44  ;;  %v1093_v26 = vmax.bf16 %v1049_v18, %v718_v44  ;;  %v352_v31 = vshll.u32 %v1498_v9, 16  ;;  %v1220_v11 = vrot.slane %v1487_v61, 9 }
  0x4e   : > { %v341_v19 = vsel %vm1309_vm5, %v336_v20, %v340_v5  ;;  %v724_v33 = vrot.slane %v1498_v9, 5  ;;  %v861_v34 = vmax.bf16 %v829_v25, %v1487_v61  ;;  %v348_v36 = vrot.slane %v346_v29, 5 }
  0x4f   : > { %1126 = vst.msk [vmem:[%s1375_s15 + $0x20] sm:$0xf] %vm1117_vm6, %v1093_v26  ;;  %v603_v60 = vmax.bf16 %v341_v19, %v1460_v30  ;;  %v918_v63 = vmax.bf16 %v860_v16, %v341_v19  ;;  %v1050_v10 = vmax.bf16 %v992_v23, %v341_v19  ;;  %v354_v37 = vrot.slane %v352_v31, 5  ;;  %v1522_v30 = vld [vmem:[%s1275_s11 + $0x64] sm:$0xf] }
  0x50   : > { %v725_v38 = vsel %vm1301_vm4, %v1220_v11, %v724_v33  ;;  %v993_v4 = vmax.bf16 %v961_v28, %v1487_v61  ;;  %v356_v42 = vshrl.u32 %v1498_v9, 16  ;;  %v349_v43 = vor.u32 %v348_v36, %v345_v24 }
  0x51   : > { %v830_v39 = vmax.bf16 %v721_v21, %v603_v60  ;;  %v962_v41 = vmax.bf16 %v918_v63, %v721_v21  ;;  %v1094_v40 = vmax.bf16 %v1050_v10, %v721_v21  ;;  %v362_v32 = vshll.u32 %v140_v1, 16 }
  0x52   : > { %v726_v45 = vrot.slane %v724_v33, 4  ;;  %v727_v46 = vrot.slane %v140_v1, 5  ;;  %v358_v48 = vrot.slane %v356_v42, 4  ;;  %v367_v51 = vshrl.u32 %v1515_v35, 16 }
  0x53   : > { %v862_v47 = vmax.bf16 %v830_v39, %v1498_v9  ;;  %1127 = vst.msk [vmem:[%s1375_s15 + $0x24] sm:$0xf] %vm1117_vm6, %v1094_v40  ;;  %v994_v50 = vmax.bf16 %v962_v41, %v1498_v9  ;;  %v350_v52 = vrot.slane %v349_v43, 4  ;;  %v364_v54 = vrot.slane %v362_v32, 5  ;;  %v1559_v41 = vld [vmem:[%s1275_s11 + $0x70] sm:$0xf] }
  0x54   : > { %v728_v44 = vsel %vm1301_vm4, %v726_v45, %v727_v46  ;;  %v370_v3 = vshll.u32 %v1515_v35, 16  ;;  %v359_v56 = vor.u32 %v358_v48, %v354_v37  ;;  %v369_v49 = vrot.slane %v367_v51, 4 }
  0x55   : > { %v376_v57 = vshll.u32 %v1522_v30, 16  ;;  %v1221_v58 = vrot.slane %v1515_v35, 9  ;;  %v355_v59 = vsel %vm1309_vm5, %v350_v52, %v354_v37  ;;  %v731_v55 = vrot.slane %v1522_v30, 5 }
  0x56   : > { %v372_v62 = vrot.slane %v370_v3, 5  ;;  %v380_v0 = vshrl.u32 %v1522_v30, 16  ;;  %v604_v5 = vmax.bf16 %v355_v59, %v1487_v61  ;;  %v919_v6 = vmax.bf16 %v861_v34, %v355_v59 }
  0x57   : > { %v1051_v7 = vmax.bf16 %v993_v4, %v355_v59  ;;  %v360_v8 = vrot.slane %v359_v56, 4  ;;  %v378_v13 = vrot.slane %v376_v57, 5  ;;  %v732_v14 = vsel %vm1301_vm4, %v1221_v58, %v731_v55  ;;  %v1577_v58 = vld [vmem:[%s1275_s11 + $0x78] sm:$0xf] }
  0x58   : > { %v373_v12 = vor.u32 %v372_v62, %v369_v49  ;;  %v382_v15 = vrot.slane %v380_v0, 4  ;;  %v831_v16 = vmax.bf16 %v725_v38, %v604_v5  ;;  %v963_v17 = vmax.bf16 %v919_v6, %v725_v38 }
  0x59   : > { %v1095_v2 = vmax.bf16 %v1051_v7, %v725_v38  ;;  %v365_v18 = vsel %vm1309_vm5, %v360_v8, %v364_v54  ;;  %v386_v26 = vshll.u32 %v143_v53, 16  ;;  %v733_v36 = vrot.slane %v731_v55, 4  ;;  %v1581_v55 = vld [vmem:[%s1275_s11 + $0x7c] sm:$0xf] }
  0x5a   : > { %v605_v61 = vmax.bf16 %v365_v18, %v1498_v9  ;;  %v920_v20 = vmax.bf16 %v862_v47, %v365_v18  ;;  %v1052_v21 = vmax.bf16 %v994_v50, %v365_v18  ;;  %v374_v23 = vrot.slane %v373_v12, 4  ;;  %v1552_v9 = vld [vmem:[%s1275_s11 + $0x6c] sm:$0xf] }
  0x5b   : > { %v863_v24 = vmax.bf16 %v831_v16, %v1515_v35  ;;  %1128 = vst.msk [vmem:[%s1375_s15 + $0x28] sm:$0xf] %vm1117_vm6, %v1095_v2  ;;  %v995_v25 = vmax.bf16 %v963_v17, %v1515_v35  ;;  %v383_v28 = vor.u32 %v382_v15, %v378_v13  ;;  %v388_v1 = vrot.slane %v386_v26, 5  ;;  %v149_v26 = vld [vmem:[%s1275_s11 + $0x80] sm:$0x1] }
  0x5c   : > { %v832_v29 = vmax.bf16 %v728_v44, %v605_v61  ;;  %v964_v19 = vmax.bf16 %v920_v20, %v728_v44  ;;  %v1096_v31 = vmax.bf16 %v1052_v21, %v728_v44  ;;  %v379_v11 = vsel %vm1309_vm5, %v374_v23, %v378_v13  ;;  %v146_v44 = vld [vmem:[%s1275_s11 + $0x74] sm:$0x1] }
  0x5d   : > { %v606_v33 = vmax.bf16 %v379_v11, %v1515_v35  ;;  %v921_v34 = vmax.bf16 %v863_v24, %v379_v11  ;;  %v1053_v60 = vmax.bf16 %v995_v25, %v379_v11  ;;  %v384_v63 = vrot.slane %v383_v28, 4 }
  0x5e   : > { %v864_v10 = vmax.bf16 %v832_v29, %v1522_v30  ;;  %1129 = vst.msk [vmem:[%s1375_s15 + $0x2c] sm:$0xf] %vm1117_vm6, %v1096_v31  ;;  %v734_v37 = vrot.slane %v143_v53, 5  ;;  %v996_v40 = vmax.bf16 %v964_v19, %v1522_v30  ;;  %v391_v43 = vshrl.u32 %v1552_v9, 16 }
  0x5f   : > { %v833_v38 = vmax.bf16 %v732_v14, %v606_v33  ;;  %v965_v4 = vmax.bf16 %v921_v34, %v732_v14  ;;  %v1097_v39 = vmax.bf16 %v1053_v60, %v732_v14  ;;  %v389_v35 = vsel %vm1309_vm5, %v384_v63, %v388_v1 }
  0x60   : > { %v735_v42 = vsel %vm1301_vm4, %v733_v36, %v734_v37  ;;  %v394_v32 = vshll.u32 %v1552_v9, 16  ;;  %v607_v46 = vmax.bf16 %v389_v35, %v1522_v30  ;;  %v922_v47 = vmax.bf16 %v864_v10, %v389_v35 }
  0x61   : > { %v865_v45 = vmax.bf16 %v833_v38, %v1552_v9  ;;  %1130 = vst.msk [vmem:[%s1375_s15 + $0x30] sm:$0xf] %vm1117_vm6, %v1097_v39  ;;  %v1054_v48 = vmax.bf16 %v996_v40, %v389_v35  ;;  %v393_v50 = vrot.slane %v391_v43, 4  ;;  %v400_v52 = vshll.u32 %v1559_v41, 16  ;;  %v1611_v40 = vld [vmem:[%s1275_s11 + $0x84] sm:$0xf] }
  0x62   : > { %v396_v51 = vrot.slane %v394_v32, 5  ;;  %v1222_v54 = vrot.slane %v1552_v9, 9  ;;  %v834_v3 = vmax.bf16 %v735_v42, %v607_v46  ;;  %v966_v56 = vmax.bf16 %v922_v47, %v735_v42 }
  0x63   : > { %v1098_v49 = vmax.bf16 %v1054_v48, %v735_v42  ;;  %v738_v57 = vrot.slane %v1559_v41, 5  ;;  %v402_v30 = vrot.slane %v400_v52, 5  ;;  %v997_v62 = vmax.bf16 %v965_v4, %v1552_v9 }
  0x64   : > { %v397_v59 = vor.u32 %v396_v51, %v393_v50  ;;  %v404_v0 = vshrl.u32 %v1559_v41, 16  ;;  %v866_v5 = vmax.bf16 %v834_v3, %v1559_v41  ;;  %v410_v7 = vshll.u32 %v146_v44, 16 }
  0x65   : > { %1131 = vst.msk [vmem:[%s1375_s15 + $0x34] sm:$0xf] %vm1117_vm6, %v1098_v49  ;;  %v739_v6 = vsel %vm1301_vm4, %v1222_v54, %v738_v57  ;;  %v740_v8 = vrot.slane %v738_v57, 4  ;;  %v741_v14 = vrot.slane %v146_v44, 5  ;;  %v998_v53 = vmax.bf16 %v966_v56, %v1559_v41  ;;  %v1622_v49 = vld [vmem:[%s1275_s11 + $0x88] sm:$0xf] }
  0x66   : > { %v398_v12 = vrot.slane %v397_v59, 4  ;;  %v406_v13 = vrot.slane %v404_v0, 4  ;;  %v412_v15 = vrot.slane %v410_v7, 5  ;;  %v415_v16 = vshrl.u32 %v1577_v58, 16 }
  0x67   : > { %v418_v17 = vshll.u32 %v1577_v58, 16  ;;  %v424_v2 = vshll.u32 %v1581_v55, 16  ;;  %v742_v20 = vsel %vm1301_vm4, %v740_v8, %v741_v14  ;;  %v1223_v21 = vrot.slane %v1577_v58, 9 }
  0x68   : > { %v403_v18 = vsel %vm1309_vm5, %v398_v12, %v402_v30  ;;  %v407_v61 = vor.u32 %v406_v13, %v402_v30  ;;  %v417_v28 = vrot.slane %v415_v16, 4  ;;  %v745_v11 = vrot.slane %v1581_v55, 5 }
  0x69   : > { %v608_v23 = vmax.bf16 %v403_v18, %v1552_v9  ;;  %v923_v24 = vmax.bf16 %v865_v45, %v403_v18  ;;  %v1055_v25 = vmax.bf16 %v997_v62, %v403_v18  ;;  %v420_v19 = vrot.slane %v418_v17, 5  ;;  %v152_v17 = vld [vmem:[%s1275_s11 + $0x8c] sm:$0x1] }
  0x6a   : > { %v408_v29 = vrot.slane %v407_v61, 4  ;;  %v426_v31 = vrot.slane %v424_v2, 5  ;;  %v428_v63 = vshrl.u32 %v1581_v55, 16  ;;  %v746_v1 = vsel %vm1301_vm4, %v1223_v21, %v745_v11  ;;  %v1639_v2 = vld [vmem:[%s1275_s11 + $0x90] sm:$0xf] }
  0x6b   : > { %v835_v33 = vmax.bf16 %v739_v6, %v608_v23  ;;  %v967_v34 = vmax.bf16 %v923_v24, %v739_v6  ;;  %v1099_v60 = vmax.bf16 %v1055_v25, %v739_v6  ;;  %v421_v9 = vor.u32 %v420_v19, %v417_v28 }
  0x6c   : > { %v413_v10 = vsel %vm1309_vm5, %v408_v29, %v412_v15  ;;  %v434_v36 = vshll.u32 %v149_v26, 16  ;;  %v430_v43 = vrot.slane %v428_v63, 4  ;;  %v747_v48 = vrot.slane %v745_v11, 4 }
  0x6d   : > { %v867_v37 = vmax.bf16 %v835_v33, %v1577_v58  ;;  %1132 = vst.msk [vmem:[%s1375_s15 + $0x38] sm:$0xf] %vm1117_vm6, %v1099_v60  ;;  %v609_v38 = vmax.bf16 %v413_v10, %v1559_v41  ;;  %v924_v4 = vmax.bf16 %v866_v5, %v413_v10  ;;  %v1056_v39 = vmax.bf16 %v998_v53, %v413_v10 }
  0x6e   : > { %v422_v35 = vrot.slane %v421_v9, 4  ;;  %v999_v42 = vmax.bf16 %v967_v34, %v1577_v58  ;;  %v436_v32 = vrot.slane %v434_v36, 5  ;;  %v431_v51 = vor.u32 %v430_v43, %v426_v31 }
  0x6f   : > { %v836_v45 = vmax.bf16 %v742_v20, %v609_v38  ;;  %v968_v46 = vmax.bf16 %v924_v4, %v742_v20  ;;  %v1100_v47 = vmax.bf16 %v1056_v39, %v742_v20  ;;  %v748_v41 = vrot.slane %v149_v26, 5 }
  0x70   : > { %v427_v50 = vsel %vm1309_vm5, %v422_v35, %v426_v31  ;;  %v439_v52 = vshrl.u32 %v1611_v40, 16  ;;  %v432_v57 = vrot.slane %v431_v51, 4  ;;  %v442_v7 = vshll.u32 %v1611_v40, 16 }
  0x71   : > { %v868_v54 = vmax.bf16 %v836_v45, %v1581_v55  ;;  %1133 = vst.msk [vmem:[%s1375_s15 + $0x3c] sm:$0xf] %vm1117_vm6, %v1100_v47  ;;  %v610_v44 = vmax.bf16 %v427_v50, %v1577_v58  ;;  %v925_v3 = vmax.bf16 %v867_v37, %v427_v50  ;;  %v1057_v56 = vmax.bf16 %v999_v42, %v427_v50 }
  0x72   : > { %v749_v59 = vsel %vm1301_vm4, %v747_v48, %v748_v41  ;;  %v1000_v30 = vmax.bf16 %v968_v46, %v1581_v55  ;;  %v441_v62 = vrot.slane %v439_v52, 4  ;;  %v437_v58 = vsel %vm1309_vm5, %v432_v57, %v436_v32  ;;  %v155_v41 = vld [vmem:[%s1275_s11 + $0x98] sm:$0x1] }
  0x73   : > { %v837_v0 = vmax.bf16 %v746_v1, %v610_v44  ;;  %v969_v5 = vmax.bf16 %v925_v3, %v746_v1  ;;  %v1101_v6 = vmax.bf16 %v1057_v56, %v746_v1  ;;  %v448_v8 = vshll.u32 %v1622_v49, 16 }
  0x74   : > { %v1224_v12 = vrot.slane %v1611_v40, 9  ;;  %v752_v13 = vrot.slane %v1622_v49, 5  ;;  %v611_v53 = vmax.bf16 %v437_v58, %v1581_v55  ;;  %v926_v15 = vmax.bf16 %v868_v54, %v437_v58  ;;  %v1646_v55 = vld [vmem:[%s1275_s11 + $0x94] sm:$0xf] }
  0x75   : > { %v869_v14 = vmax.bf16 %v837_v0, %v1611_v40  ;;  %1134 = vst.msk [vmem:[%s1375_s15 + $0x40] sm:$0xf] %vm1117_vm6, %v1101_v6  ;;  %v1058_v16 = vmax.bf16 %v1000_v30, %v437_v58  ;;  %v444_v18 = vrot.slane %v442_v7, 5  ;;  %v450_v61 = vrot.slane %v448_v8, 5 }
  0x76   : > { %v753_v20 = vsel %vm1301_vm4, %v1224_v12, %v752_v13  ;;  %v1001_v21 = vmax.bf16 %v969_v5, %v1611_v40  ;;  %v838_v23 = vmax.bf16 %v749_v59, %v611_v53  ;;  %v970_v24 = vmax.bf16 %v926_v15, %v749_v59 }
  0x77   : > { %v1102_v25 = vmax.bf16 %v1058_v16, %v749_v59  ;;  %v452_v28 = vshrl.u32 %v1622_v49, 16  ;;  %v445_v26 = vor.u32 %v444_v18, %v441_v62  ;;  %v458_v29 = vshll.u32 %v152_v17, 16 }
  0x78   : > { %v754_v19 = vrot.slane %v752_v13, 4  ;;  %v755_v31 = vrot.slane %v152_v17, 5  ;;  %v870_v11 = vmax.bf16 %v838_v23, %v1622_v49  ;;  %v1002_v34 = vmax.bf16 %v970_v24, %v1622_v49  ;;  %v1683_v24 = vld [vmem:[%s1275_s11 + $0xa0] sm:$0xf] }
  0x79   : > { %1135 = vst.msk [vmem:[%s1375_s15 + $0x44] sm:$0xf] %vm1117_vm6, %v1102_v25  ;;  %v454_v33 = vrot.slane %v452_v28, 4  ;;  %v463_v60 = vshrl.u32 %v1639_v2, 16  ;;  %v446_v63 = vrot.slane %v445_v26, 4  ;;  %v460_v10 = vrot.slane %v458_v29, 5 }
  0x7a   : > { %v756_v9 = vsel %vm1301_vm4, %v754_v19, %v755_v31  ;;  %v466_v1 = vshll.u32 %v1639_v2, 16  ;;  %v472_v38 = vshll.u32 %v1646_v55, 16  ;;  %v1225_v4 = vrot.slane %v1639_v2, 9 }
  0x7b   : > { %v455_v36 = vor.u32 %v454_v33, %v450_v61  ;;  %v465_v37 = vrot.slane %v463_v60, 4  ;;  %v451_v39 = vsel %vm1309_vm5, %v446_v63, %v450_v61  ;;  %v759_v42 = vrot.slane %v1646_v55, 5 }
  0x7c   : > { %v468_v35 = vrot.slane %v466_v1, 5  ;;  %v476_v43 = vshrl.u32 %v1646_v55, 16  ;;  %v612_v32 = vmax.bf16 %v451_v39, %v1611_v40  ;;  %v927_v45 = vmax.bf16 %v869_v14, %v451_v39 }
  0x7d   : > { %v1059_v46 = vmax.bf16 %v1001_v21, %v451_v39  ;;  %v456_v47 = vrot.slane %v455_v36, 4  ;;  %v474_v50 = vrot.slane %v472_v38, 5  ;;  %v760_v51 = vsel %vm1301_vm4, %v1225_v4, %v759_v42  ;;  %v1701_v4 = vld [vmem:[%s1275_s11 + $0xa8] sm:$0xf] }
  0x7e   : > { %v469_v48 = vor.u32 %v468_v35, %v465_v37  ;;  %v478_v52 = vrot.slane %v476_v43, 4  ;;  %v839_v54 = vmax.bf16 %v753_v20, %v612_v32  ;;  %v971_v44 = vmax.bf16 %v927_v45, %v753_v20 }
  0x7f   : > { %v1103_v3 = vmax.bf16 %v1059_v46, %v753_v20  ;;  %v461_v56 = vsel %vm1309_vm5, %v456_v47, %v460_v10  ;;  %v482_v6 = vshll.u32 %v155_v41, 16  ;;  %v761_v18 = vrot.slane %v759_v42, 4  ;;  %v1705_v42 = vld [vmem:[%s1275_s11 + $0xac] sm:$0xf] }
  0x80   : > { %v613_v40 = vmax.bf16 %v461_v56, %v1622_v49  ;;  %v928_v57 = vmax.bf16 %v870_v11, %v461_v56  ;;  %v1060_v59 = vmax.bf16 %v1002_v34, %v461_v56  ;;  %v470_v30 = vrot.slane %v469_v48, 4  ;;  %v1676_v49 = vld [vmem:[%s1275_s11 + $0x9c] sm:$0xf] }
  0x81   : > { %v871_v62 = vmax.bf16 %v839_v54, %v1639_v2  ;;  %1136 = vst.msk [vmem:[%s1375_s15 + $0x48] sm:$0xf] %vm1117_vm6, %v1103_v3  ;;  %v1003_v0 = vmax.bf16 %v971_v44, %v1639_v2  ;;  %v479_v5 = vor.u32 %v478_v52, %v474_v50  ;;  %v484_v17 = vrot.slane %v482_v6, 5  ;;  %v161_v6 = vld [vmem:[%s1275_s11 + $0xb0] sm:$0x1] }
  0x82   : > { %v840_v7 = vmax.bf16 %v756_v9, %v613_v40  ;;  %v972_v58 = vmax.bf16 %v928_v57, %v756_v9  ;;  %v1104_v8 = vmax.bf16 %v1060_v59, %v756_v9  ;;  %v475_v12 = vsel %vm1309_vm5, %v470_v30, %v474_v50  ;;  %v158_v9 = vld [vmem:[%s1275_s11 + $0xa4] sm:$0x1] }
  0x83   : > { %v614_v13 = vmax.bf16 %v475_v12, %v1639_v2  ;;  %v929_v14 = vmax.bf16 %v871_v62, %v475_v12  ;;  %v1061_v53 = vmax.bf16 %v1003_v0, %v475_v12  ;;  %v480_v15 = vrot.slane %v479_v5, 4 }
  0x84   : > { %v872_v16 = vmax.bf16 %v840_v7, %v1646_v55  ;;  %1137 = vst.msk [vmem:[%s1375_s15 + $0x4c] sm:$0xf] %vm1117_vm6, %v1104_v8  ;;  %v762_v61 = vrot.slane %v155_v41, 5  ;;  %v1004_v25 = vmax.bf16 %v972_v58, %v1646_v55  ;;  %v487_v26 = vshrl.u32 %v1676_v49, 16 }
  0x85   : > { %v841_v20 = vmax.bf16 %v760_v51, %v614_v13  ;;  %v973_v21 = vmax.bf16 %v929_v14, %v760_v51  ;;  %v1105_v23 = vmax.bf16 %v1061_v53, %v760_v51  ;;  %v485_v2 = vsel %vm1309_vm5, %v480_v15, %v484_v17 }
  0x86   : > { %v763_v28 = vsel %vm1301_vm4, %v761_v18, %v762_v61  ;;  %v490_v29 = vshll.u32 %v1676_v49, 16  ;;  %v615_v31 = vmax.bf16 %v485_v2, %v1646_v55  ;;  %v930_v11 = vmax.bf16 %v872_v16, %v485_v2 }
  0x87   : > { %v873_v19 = vmax.bf16 %v841_v20, %v1676_v49  ;;  %1138 = vst.msk [vmem:[%s1375_s15 + $0x50] sm:$0xf] %vm1117_vm6, %v1105_v23  ;;  %v1062_v33 = vmax.bf16 %v1004_v25, %v485_v2  ;;  %v489_v34 = vrot.slane %v487_v26, 4  ;;  %v496_v63 = vshll.u32 %v1683_v24, 16  ;;  %v1735_v25 = vld [vmem:[%s1275_s11 + $0xb4] sm:$0xf] }
  0x88   : > { %v492_v60 = vrot.slane %v490_v29, 5  ;;  %v1226_v10 = vrot.slane %v1676_v49, 9  ;;  %v842_v1 = vmax.bf16 %v763_v28, %v615_v31  ;;  %v974_v36 = vmax.bf16 %v930_v11, %v763_v28 }
  0x89   : > { %v1106_v37 = vmax.bf16 %v1062_v33, %v763_v28  ;;  %v766_v38 = vrot.slane %v1683_v24, 5  ;;  %v498_v55 = vrot.slane %v496_v63, 5  ;;  %v1005_v35 = vmax.bf16 %v973_v21, %v1676_v49 }
  0x8a   : > { %v493_v39 = vor.u32 %v492_v60, %v489_v34  ;;  %v500_v43 = vshrl.u32 %v1683_v24, 16  ;;  %v874_v32 = vmax.bf16 %v842_v1, %v1683_v24  ;;  %v506_v46 = vshll.u32 %v158_v9, 16 }
  0x8b   : > { %1139 = vst.msk [vmem:[%s1375_s15 + $0x54] sm:$0xf] %vm1117_vm6, %v1106_v37  ;;  %v767_v45 = vsel %vm1301_vm4, %v1226_v10, %v766_v38  ;;  %v768_v47 = vrot.slane %v766_v38, 4  ;;  %v769_v51 = vrot.slane %v158_v9, 5  ;;  %v1006_v41 = vmax.bf16 %v974_v36, %v1683_v24  ;;  %v1746_v37 = vld [vmem:[%s1275_s11 + $0xb8] sm:$0xf] }
  0x8c   : > { %v494_v48 = vrot.slane %v493_v39, 4  ;;  %v502_v50 = vrot.slane %v500_v43, 4  ;;  %v508_v52 = vrot.slane %v506_v46, 5  ;;  %v511_v54 = vshrl.u32 %v1701_v4, 16 }
  0x8d   : > { %v514_v44 = vshll.u32 %v1701_v4, 16  ;;  %v520_v3 = vshll.u32 %v1705_v42, 16  ;;  %v770_v57 = vsel %vm1301_vm4, %v768_v47, %v769_v51  ;;  %v1227_v59 = vrot.slane %v1701_v4, 9 }
  0x8e   : > { %v499_v56 = vsel %vm1309_vm5, %v494_v48, %v498_v55  ;;  %v503_v40 = vor.u32 %v502_v50, %v498_v55  ;;  %v513_v5 = vrot.slane %v511_v54, 4  ;;  %v773_v12 = vrot.slane %v1705_v42, 5 }
  0x8f   : > { %v616_v30 = vmax.bf16 %v499_v56, %v1676_v49  ;;  %v931_v62 = vmax.bf16 %v873_v19, %v499_v56  ;;  %v1063_v0 = vmax.bf16 %v1005_v35, %v499_v56  ;;  %v516_v58 = vrot.slane %v514_v44, 5  ;;  %v164_v44 = vld [vmem:[%s1275_s11 + $0xbc] sm:$0x1] }
  0x90   : > { %v504_v7 = vrot.slane %v503_v40, 4  ;;  %v522_v8 = vrot.slane %v520_v3, 5  ;;  %v524_v15 = vshrl.u32 %v1705_v42, 16  ;;  %v774_v17 = vsel %vm1301_vm4, %v1227_v59, %v773_v12  ;;  %v165_v59 = vld [vmem:[%s1275_s11 + $0xc0] sm:$0xf] }
  0x91   : > { %v843_v13 = vmax.bf16 %v767_v45, %v616_v30  ;;  %v975_v14 = vmax.bf16 %v931_v62, %v767_v45  ;;  %v1107_v53 = vmax.bf16 %v1063_v0, %v767_v45  ;;  %v517_v49 = vor.u32 %v516_v58, %v513_v5 }
  0x92   : > { %v509_v16 = vsel %vm1309_vm5, %v504_v7, %v508_v52  ;;  %v530_v18 = vshll.u32 %v161_v6, 16  ;;  %v526_v26 = vrot.slane %v524_v15, 4  ;;  %v775_v33 = vrot.slane %v773_v12, 4 }
  0x93   : > { %v875_v61 = vmax.bf16 %v843_v13, %v1701_v4  ;;  %1140 = vst.msk [vmem:[%s1375_s15 + $0x58] sm:$0xf] %vm1117_vm6, %v1107_v53  ;;  %v617_v20 = vmax.bf16 %v509_v16, %v1683_v24  ;;  %v932_v21 = vmax.bf16 %v874_v32, %v509_v16  ;;  %v1064_v23 = vmax.bf16 %v1006_v41, %v509_v16 }
  0x94   : > { %v518_v2 = vrot.slane %v517_v49, 4  ;;  %v1007_v28 = vmax.bf16 %v975_v14, %v1701_v4  ;;  %v532_v29 = vrot.slane %v530_v18, 5  ;;  %v527_v60 = vor.u32 %v526_v26, %v522_v8 }
  0x95   : > { %v844_v19 = vmax.bf16 %v770_v57, %v617_v20  ;;  %v976_v31 = vmax.bf16 %v932_v21, %v770_v57  ;;  %v1108_v11 = vmax.bf16 %v1064_v23, %v770_v57  ;;  %v776_v24 = vrot.slane %v161_v6, 5 }
  0x96   : > { %v523_v34 = vsel %vm1309_vm5, %v518_v2, %v522_v8  ;;  %v535_v63 = vshrl.u32 %v1735_v25, 16  ;;  %v528_v38 = vrot.slane %v527_v60, 4  ;;  %v538_v46 = vshll.u32 %v1735_v25, 16  ;;  %v166_v8 = vld [vmem:[%s1275_s11 + $0xc4] sm:$0xf] }
  0x97   : > { %v876_v10 = vmax.bf16 %v844_v19, %v1705_v42  ;;  %1141 = vst.msk [vmem:[%s1375_s15 + $0x5c] sm:$0xf] %vm1117_vm6, %v1108_v11  ;;  %v618_v9 = vmax.bf16 %v523_v34, %v1701_v4  ;;  %v933_v1 = vmax.bf16 %v875_v61, %v523_v34  ;;  %v1065_v36 = vmax.bf16 %v1007_v28, %v523_v34 }
  0x98   : > { %v777_v39 = vsel %vm1301_vm4, %v775_v33, %v776_v24  ;;  %v1008_v55 = vmax.bf16 %v976_v31, %v1705_v42  ;;  %v537_v35 = vrot.slane %v535_v63, 4  ;;  %v533_v4 = vsel %vm1309_vm5, %v528_v38, %v532_v29  ;;  %v167_v24 = vld [vmem:[%s1275_s11 + $0xc8] sm:$0x1] }
  0x99   : > { %v845_v43 = vmax.bf16 %v774_v17, %v618_v9  ;;  %v977_v32 = vmax.bf16 %v933_v1, %v774_v17  ;;  %v1109_v45 = vmax.bf16 %v1065_v36, %v774_v17  ;;  %v544_v47 = vshll.u32 %v1746_v37, 16 }
  0x9a   : > { %v1228_v48 = vrot.slane %v1735_v25, 9  ;;  %v780_v50 = vrot.slane %v1746_v37, 5  ;;  %v619_v41 = vmax.bf16 %v533_v4, %v1705_v42  ;;  %v934_v52 = vmax.bf16 %v876_v10, %v533_v4 }
  0x9b   : > { %v877_v51 = vmax.bf16 %v845_v43, %v1735_v25  ;;  %1142 = vst.msk [vmem:[%s1375_s15 + $0x60] sm:$0xf] %vm1117_vm6, %v1109_v45  ;;  %v1066_v54 = vmax.bf16 %v1008_v55, %v533_v4  ;;  %v540_v3 = vrot.slane %v538_v46, 5  ;;  %v546_v56 = vrot.slane %v544_v47, 5 }
  0x9c   : > { %v781_v40 = vsel %vm1301_vm4, %v1228_v48, %v780_v50  ;;  %v1009_v57 = vmax.bf16 %v977_v32, %v1735_v25  ;;  %v846_v30 = vmax.bf16 %v777_v39, %v619_v41  ;;  %v978_v62 = vmax.bf16 %v934_v52, %v777_v39 }
  0x9d   : > { %v1110_v0 = vmax.bf16 %v1066_v54, %v777_v39  ;;  %v548_v5 = vshrl.u32 %v1746_v37, 16  ;;  %v541_v6 = vor.u32 %v540_v3, %v537_v35  ;;  %v554_v42 = vshll.u32 %v164_v44, 16 }
  0x9e   : > { %v782_v7 = vrot.slane %v780_v50, 4  ;;  %v783_v58 = vrot.slane %v164_v44, 5  ;;  %v878_v12 = vmax.bf16 %v846_v30, %v1746_v37  ;;  %v1010_v14 = vmax.bf16 %v978_v62, %v1746_v37  ;;  %v168_v50 = vld [vmem:[%s1275_s11 + $0xcc] sm:$0xf] }
  0x9f   : > { %1143 = vst.msk [vmem:[%s1375_s15 + $0x64] sm:$0xf] %vm1117_vm6, %v1110_v0  ;;  %v550_v13 = vrot.slane %v548_v5, 4  ;;  %v882_v53 = vshrl.u32 %v165_v59, 16  ;;  %v542_v15 = vrot.slane %v541_v6, 4  ;;  %v556_v16 = vrot.slane %v554_v42, 5 }
  0xa0   : > { %v784_v49 = vsel %vm1301_vm4, %v782_v7, %v783_v58  ;;  %v885_v17 = vshll.u32 %v165_v59, 16  ;;  %v891_v20 = vshll.u32 %v166_v8, 16  ;;  %v1229_v21 = vrot.slane %v165_v59, 9  ;;  %v170_v6 = vld [vmem:[%s1275_s11 + $0xd4] sm:$0x1] }
  0xa1   : > { %v551_v18 = vor.u32 %v550_v13, %v546_v56  ;;  %v884_v61 = vrot.slane %v882_v53, 4  ;;  %v547_v23 = vsel %vm1309_vm5, %v542_v15, %v546_v56  ;;  %v944_v28 = vrot.slane %v166_v8, 5 }
  0xa2   : > { %v887_v2 = vrot.slane %v885_v17, 5  ;;  %v895_v26 = vshrl.u32 %v166_v8, 16  ;;  %v620_v29 = vmax.bf16 %v547_v23, %v1735_v25  ;;  %v935_v19 = vmax.bf16 %v877_v51, %v547_v23 }
  0xa3   : > { %v1067_v31 = vmax.bf16 %v1009_v57, %v547_v23  ;;  %v552_v11 = vrot.slane %v551_v18, 4  ;;  %v893_v34 = vrot.slane %v891_v20, 5  ;;  %v945_v60 = vsel %vm1301_vm4, %v1229_v21, %v944_v28 }
  0xa4   : > { %v888_v33 = vor.u32 %v887_v2, %v884_v61  ;;  %v897_v63 = vrot.slane %v895_v26, 4  ;;  %v847_v10 = vmax.bf16 %v781_v40, %v620_v29  ;;  %v979_v9 = vmax.bf16 %v935_v19, %v781_v40 }
  0xa5   : > { %v1111_v1 = vmax.bf16 %v1067_v31, %v781_v40  ;;  %v557_v36 = vsel %vm1309_vm5, %v552_v11, %v556_v16  ;;  %v901_v45 = vshll.u32 %v167_v24, 16  ;;  %v946_v44 = vrot.slane %v944_v28, 4  ;;  %v169_v40 = vld [vmem:[%s1275_s11 + $0xd0] sm:$0xf] }
  0xa6   : > { %v621_v25 = vmax.bf16 %v557_v36, %v1746_v37  ;;  %v936_v38 = vmax.bf16 %v878_v12, %v557_v36  ;;  %v1068_v39 = vmax.bf16 %v1010_v14, %v557_v36  ;;  %v889_v55 = vrot.slane %v888_v33, 4 }
  0xa7   : > { %1144 = vst.msk [vmem:[%s1375_s15 + $0x68] sm:$0xf] %vm1117_vm6, %v1111_v1  ;;  %v879_v35 = vmax.bf16 %v847_v10, %v165_v59  ;;  %v1011_v43 = vmax.bf16 %v979_v9, %v165_v59  ;;  %v898_v32 = vor.u32 %v897_v63, %v893_v34  ;;  %v903_v52 = vrot.slane %v901_v45, 5 }
  0xa8   : > { %v848_v46 = vmax.bf16 %v784_v49, %v621_v25  ;;  %v980_v4 = vmax.bf16 %v936_v38, %v784_v49  ;;  %v1112_v47 = vmax.bf16 %v1068_v39, %v784_v49  ;;  %v894_v48 = vsel %vm1309_vm5, %v889_v55, %v893_v34 }
  0xa9   : > { %v937_v51 = vmax.bf16 %v894_v48, %v879_v35  ;;  %v1069_v37 = vmax.bf16 %v1011_v43, %v894_v48  ;;  %v899_v41 = vrot.slane %v898_v32, 4  ;;  %v947_v3 = vrot.slane %v167_v24, 5 }
  0xaa   : > { %1145 = vst.msk [vmem:[%s1375_s15 + $0x6c] sm:$0xf] %vm1117_vm6, %v1112_v47  ;;  %v880_v54 = vmax.bf16 %v848_v46, %v166_v8  ;;  %v1012_v56 = vmax.bf16 %v980_v4, %v166_v8  ;;  %v1016_v30 = vshrl.u32 %v168_v50, 16  ;;  %v1019_v5 = vshll.u32 %v168_v50, 16 }
  0xab   : > { %v1113_v57 = vmax.bf16 %v1069_v37, %v945_v60  ;;  %v904_v59 = vsel %vm1309_vm5, %v899_v41, %v903_v52  ;;  %v981_v42 = vmax.bf16 %v945_v60, %v937_v51  ;;  %v948_v7 = vsel %vm1301_vm4, %v946_v44, %v947_v3 }
  0xac   : > { %v938_v62 = vmax.bf16 %v904_v59, %v880_v54  ;;  %v1070_v0 = vmax.bf16 %v1012_v56, %v904_v59  ;;  %v1018_v58 = vrot.slane %v1016_v30, 4  ;;  %v1025_v12 = vshll.u32 %v169_v40, 16 }
  0xad   : > { %1146 = vst.msk [vmem:[%s1375_s15 + $0x70] sm:$0xf] %vm1117_vm6, %v1113_v57  ;;  %v1021_v13 = vrot.slane %v1019_v5, 5  ;;  %v1078_v53 = vrot.slane %v169_v40, 5  ;;  %v1029_v15 = vshrl.u32 %v169_v40, 16  ;;  %v1035_v16 = vshll.u32 %v170_v6, 16 }
  0xae   : > { %v1114_v8 = vmax.bf16 %v1070_v0, %v948_v7  ;;  %v1027_v14 = vrot.slane %v1025_v12, 5  ;;  %v982_v49 = vmax.bf16 %v948_v7, %v938_v62  ;;  %v1230_v18 = vrot.slane %v168_v50, 9 }
  0xaf   : > { %v1022_v17 = vor.u32 %v1021_v13, %v1018_v58  ;;  %v1013_v61 = vmax.bf16 %v981_v42, %v168_v50  ;;  %v1031_v20 = vrot.slane %v1029_v15, 4  ;;  %v1037_v2 = vrot.slane %v1035_v16, 5 }
  0xb0   : > { %1147 = vst.msk [vmem:[%s1375_s15 + $0x74] sm:$0xf] %vm1117_vm6, %v1114_v8  ;;  %v1080_v28 = vrot.slane %v1078_v53, 4  ;;  %v1081_v26 = vrot.slane %v170_v6, 5  ;;  %v1079_v19 = vsel %vm1301_vm4, %v1230_v18, %v1078_v53  ;;  %v1014_v31 = vmax.bf16 %v982_v49, %v169_v40 }
  0xb1   : > { %v1023_v21 = vrot.slane %v1022_v17, 4  ;;  %v1032_v23 = vor.u32 %v1031_v20, %v1027_v14 }
  0xb2   : > { %v1082_v24 = vsel %vm1301_vm4, %v1080_v28, %v1081_v26 }
  0xb3   : > { %v1028_v29 = vsel %vm1309_vm5, %v1023_v21, %v1027_v14  ;;  %v1033_v33 = vrot.slane %v1032_v23, 4 }
  0xb4   : > { %v1071_v11 = vmax.bf16 %v1028_v29, %v1013_v61 }
  0xb5   : > { %v1038_v60 = vsel %vm1309_vm5, %v1033_v33, %v1037_v2 }
  0xb6   : > { %v1115_v34 = vmax.bf16 %v1079_v19, %v1071_v11  ;;  %v1072_v63 = vmax.bf16 %v1038_v60, %v1014_v31 }
  0xb8   : > { %1148 = vst.msk [vmem:[%s1375_s15 + $0x78] sm:$0xf] %vm1117_vm6, %v1115_v34  ;;  %v1116_v10 = vmax.bf16 %v1082_v24, %v1072_v63 }
  0xba   : > { %1149 = vst.msk [vmem:[%s1375_s15 + $0x7c] sm:$0xf] %vm1117_vm6, %v1116_v10 }
  0xbb PF: > { %s11_s6 = sadd.s32 1, %s1249_s6  }
  0xbc   : > { %p8_p4 = scmp.ge.s32.totalorder %s11_s6, 4  }
  0xbe   :  { %10 = sbr.rel (!%p8_p4) target bundleno = 1 (0x1), region = 54 }

// kernel: backbone_forward.12
= control target key start
LH: loop header
LB: loop body
LE: loop exit
PB: predicated region body
PF: predicated region fallthrough
CT: control target
= control target key end

     0   :  { %v523_v0 = vmov 0   ;;  %vm182_vm0 = vcmask 130048   ;;  %vm384_vm1 = vcmask 125952   ;;  %s712_s1 = inlined_call_operand.vmem [shape: bf16[144,16], index: 1, kind: input, shape index: {}]   ;;  %s713_s0 = inlined_call_operand.vmem [shape: bf16[128,144], index: 0, kind: input, shape index: {}]   ;;  %s714_s2 = inlined_call_operand.vmem [shape: f32[1,16], index: 2, kind: input, shape index: {}]   ;;  %s715_s3 = inlined_call_operand.vmem [shape: bf16[128,16], index: 3, kind: output, shape index: {}]  }
   0x1   :  { %207 = vmatprep.subr.bf16.mxu0 %v523_v0  ;;  %471 = vmatprep.subr.bf16.mxu1 %v523_v0  ;;  %v490_v1 = vld [vmem:[%s712_s1 + $0x38] sm:$0xff]   ;;  %v491_v2 = vld [vmem:[%s712_s1 + $0x30] sm:$0xff]   ;;  %v492_v3 = vld [vmem:[%s712_s1 + $0x28] sm:$0xff]  }
   0x2   :  { %208 = vmatpush1.bf16.msra.mxu0 %v490_v1  ;;  %480 = vmatpush1.bf16.msra.mxu1 %v490_v1  ;;  %v493_v4 = vld [vmem:[%s712_s1 + $0x20] sm:$0xff]   ;;  %v494_v7 = vld [vmem:[%s712_s1 + $0x18] sm:$0xff]   ;;  %v495_v8 = vld [vmem:[%s712_s1 + $0x10] sm:$0xff]  }
   0x3   :  { %209 = vmatprep.subr.bf16.mxu0 %v523_v0  ;;  %472 = vmatprep.subr.bf16.mxu1 %v523_v0  ;;  %v501_v5 = vld [vmem:[%s713_s0 + $0x4] ss:$8 sps:$4 sm:$0xff]   ;;  %v499_v12 = vld [vmem:[%s713_s0] ss:$8 sps:$4 sm:$0xff]   ;;  %v505_v14 = vld [vmem:[%s713_s0 + $0x14] ss:$8 sps:$4 sm:$0xff]  }
   0x4   :  { %v504_v6 = vld [vmem:[%s713_s0 + $0x44] ss:$8 sps:$4 sm:$0xff]   ;;  %431 = vmatprep.mubr.msk.bf16.mxu0 %vm182_vm0, %v501_v5  ;;  %v502_v13 = vld [vmem:[%s713_s0 + $0x40] ss:$8 sps:$4 sm:$0xff]   ;;  %v507_v15 = vld [vmem:[%s713_s0 + $0x54] ss:$8 sps:$4 sm:$0xff]  }
   0x5   :  { %435 = vmatprep.mubr.msk.bf16.mxu1 %vm182_vm0, %v504_v6  ;;  %v496_v9 = vld [vmem:[%s712_s1 + $0x8] sm:$0xff]   ;;  %v497_v10 = vld [vmem:[%s712_s1] sm:$0xff]   ;;  %v509_v16 = vld [vmem:[%s713_s0 + $0x10] ss:$8 sps:$4 sm:$0xff]  }
   0x6   :  { %210 = vmatpush1.bf16.msra.mxu0 %v491_v2  ;;  %481 = vmatpush1.bf16.msra.mxu1 %v491_v2  ;;  %v498_v11 = vld [vmem:[%s712_s1 + $0x40] sm:$0xff]   ;;  %v510_v17 = vld [vmem:[%s713_s0 + $0x50] ss:$8 sps:$4 sm:$0xff]   ;;  %v517_v22 = vld [vmem:[%s713_s0 + $0x34] ss:$8 sps:$4 sm:$0xff]  }
   0x7   :  { %211 = vmatprep.subr.bf16.mxu0 %v523_v0  ;;  %473 = vmatprep.subr.bf16.mxu1 %v523_v0  ;;  %v511_v18 = vld [vmem:[%s713_s0 + $0x24] ss:$8 sps:$4 sm:$0xff]   ;;  %v515_v20 = vld [vmem:[%s713_s0 + $0x20] ss:$8 sps:$4 sm:$0xff]   ;;  %v519_v23 = vld [vmem:[%s713_s0 + $0x74] ss:$8 sps:$4 sm:$0xff]  }
   0x8   :  { %v513_v19 = vld [vmem:[%s713_s0 + $0x64] ss:$8 sps:$4 sm:$0xff]   ;;  %v516_v21 = vld [vmem:[%s713_s0 + $0x60] ss:$8 sps:$4 sm:$0xff]   ;;  %v521_v24 = vld [vmem:[%s713_s0 + $0x30] ss:$8 sps:$4 sm:$0xff]  }
   0x9   :  { %v522_v25 = vld [vmem:[%s713_s0 + $0x70] ss:$8 sps:$4 sm:$0xff]   ;;  %v630_v26 = vld [vmem:[%s714_s2] ss:$0 sm:$0xff] }
   0xa   :  { %212 = vmatpush1.bf16.msra.mxu0 %v492_v3  ;;  %482 = vmatpush1.bf16.msra.mxu1 %v492_v3 }
   0xb   :  { %213 = vmatprep.subr.bf16.mxu0 %v523_v0  ;;  %474 = vmatprep.subr.bf16.mxu1 %v523_v0 }
   0xe   :  { %214 = vmatpush1.bf16.msra.mxu0 %v493_v4  ;;  %483 = vmatpush1.bf16.msra.mxu1 %v493_v4 }
   0xf   :  { %215 = vmatprep.subr.bf16.mxu0 %v523_v0  ;;  %475 = vmatprep.subr.bf16.mxu1 %v523_v0 }
  0x12   :  { %216 = vmatpush1.bf16.msra.mxu0 %v494_v7  ;;  %484 = vmatpush1.bf16.msra.mxu1 %v494_v7 }
  0x13   :  { %217 = vmatprep.subr.bf16.mxu0 %v523_v0  ;;  %476 = vmatprep.subr.bf16.mxu1 %v523_v0 }
  0x16   :  { %218 = vmatpush1.bf16.msra.mxu0 %v495_v8  ;;  %485 = vmatpush1.bf16.msra.mxu1 %v495_v8 }
  0x17   :  { %219 = vmatprep.subr.bf16.mxu0 %v523_v0  ;;  %477 = vmatprep.subr.bf16.mxu1 %v523_v0 }
  0x1a   :  { %220 = vmatpush1.bf16.msra.mxu0 %v496_v9  ;;  %486 = vmatpush1.bf16.msra.mxu1 %v496_v9 }
  0x1b   :  { %221 = vmatprep.subr.bf16.mxu0 %v523_v0  ;;  %478 = vmatprep.subr.bf16.mxu1 %v523_v0 }
  0x1e   :  { %222 = vmatpush1.bf16.msra.mxu0 %v497_v10  ;;  %487 = vmatpush1.bf16.msra.mxu1 %v497_v10 }
  0x1f   :  { %237 = vmatprep.subr.bf16.mxu0 %v523_v0  ;;  %479 = vmatprep.subr.bf16.mxu1 %v523_v0 }
  0x22   :  { %238 = vmatpush2.bf16.msra.mxu0 %v498_v11  ;;  %488 = vmatpush2.bf16.msra.mxu1 %v498_v11 }
  0x25   :  { %240 = vmatmul.mubr.bf16.vlgmr.msra.gmra.mxu0 %v499_v12  ;;  %272 = vmatmul.mubr.bf16.vlgmr.msra.gmra.mxu1 %v502_v13 }
  0x26   :  { %432 = vmatprep.mubr.msk.bf16.mxu0 %vm182_vm0, %v505_v14  ;;  %436 = vmatprep.mubr.msk.bf16.mxu1 %vm182_vm0, %v507_v15 }
  0x2d   :  { %248 = vmatmul.mubr.bf16.gmra.mxu0 %v509_v16  ;;  %280 = vmatmul.mubr.bf16.gmra.mxu1 %v510_v17 }
  0x2e   :  { %433 = vmatprep.mubr.msk.bf16.mxu0 %vm182_vm0, %v511_v18  ;;  %437 = vmatprep.mubr.msk.bf16.mxu1 %vm182_vm0, %v513_v19 }
  0x35   :  { %256 = vmatmul.mubr.bf16.gmra.mxu0 %v515_v20  ;;  %288 = vmatmul.mubr.bf16.gmra.mxu1 %v516_v21 }
  0x36   :  { %434 = vmatprep.mubr.msk.bf16.mxu0 %vm182_vm0, %v517_v22  ;;  %438 = vmatprep.mubr.msk.bf16.mxu1 %vm182_vm0, %v519_v23 }
  0x3d   :  { %264 = vmatmul.mubr.bf16.gmra.mxu0 %v521_v24  ;;  %296 = vmatmul.mubr.bf16.gmra.mxu1 %v522_v25 }
  0xe5   :  { %v241_v27 = vpop.f32.mrf.mxu0  ;;  %v273_v28 = vpop.f32.mrf.mxu1 }
  0xe6   :  { %v242_v29 = vadd.f32 %v630_v26, %v241_v27  ;;  %v274_v30 = vadd.f32 %v630_v26, %v273_v28 }
  0xe7   :  { %v243_v31 = vpop.f32.mrf.mxu0  ;;  %v275_v32 = vpop.f32.mrf.mxu1 }
  0xe8   :  { %v304_v33 = vmax.f32 %v242_v29, 0.0  ;;  %v312_v34 = vmax.f32 %v274_v30, 0.0 }
  0xe9   :  { %v244_v35 = vpop.f32.mrf.mxu0  ;;  %v276_v36 = vpop.f32.mrf.mxu1 }
  0xea   :  { %v455_v37 = vpack.c.bf16 %v304_v33, %v304_v33  ;;  %v463_v38 = vpack.c.bf16 %v312_v34, %v312_v34  ;;  %v245_v39 = vadd.f32 %v630_v26, %v244_v35  ;;  %v277_v40 = vadd.f32 %v630_v26, %v276_v36 }
  0xeb   :  { %v246_v41 = vpop.f32.mrf.mxu0  ;;  %v278_v42 = vpop.f32.mrf.mxu1 }
  0xec   :  { %385 = vst.msk [vmem:[%s715_s3] sm:$0xf] %vm384_vm1, %v455_v37  ;;  %393 = vst.msk [vmem:[%s715_s3 + $0x20] sm:$0xf] %vm384_vm1, %v463_v38  ;;  %v305_v43 = vmax.f32 %v245_v39, 0.0  ;;  %v313_v44 = vmax.f32 %v277_v40, 0.0 }
  0xed   :  { %v249_v45 = vpop.f32.mrf.mxu0  ;;  %v281_v46 = vpop.f32.mrf.mxu1 }
  0xee   :  { %v456_v47 = vpack.c.bf16 %v305_v43, %v305_v43  ;;  %v464_v48 = vpack.c.bf16 %v313_v44, %v313_v44  ;;  %v250_v49 = vadd.f32 %v630_v26, %v249_v45  ;;  %v282_v50 = vadd.f32 %v630_v26, %v281_v46 }
  0xef   :  { %v251_v51 = vpop.f32.mrf.mxu0  ;;  %v283_v52 = vpop.f32.mrf.mxu1 }
  0xf0   :  { %386 = vst.msk [vmem:[%s715_s3 + $0x4] sm:$0xf] %vm384_vm1, %v456_v47  ;;  %394 = vst.msk [vmem:[%s715_s3 + $0x24] sm:$0xf] %vm384_vm1, %v464_v48  ;;  %v306_v53 = vmax.f32 %v250_v49, 0.0  ;;  %v314_v54 = vmax.f32 %v282_v50, 0.0 }
  0xf1   :  { %v252_v55 = vpop.f32.mrf.mxu0  ;;  %v284_v56 = vpop.f32.mrf.mxu1 }
  0xf2   :  { %v457_v57 = vpack.c.bf16 %v306_v53, %v306_v53  ;;  %v465_v58 = vpack.c.bf16 %v314_v54, %v314_v54  ;;  %v253_v59 = vadd.f32 %v630_v26, %v252_v55  ;;  %v285_v60 = vadd.f32 %v630_v26, %v284_v56 }
  0xf3   :  { %v254_v61 = vpop.f32.mrf.mxu0  ;;  %v286_v62 = vpop.f32.mrf.mxu1 }
  0xf4   :  { %387 = vst.msk [vmem:[%s715_s3 + $0x8] sm:$0xf] %vm384_vm1, %v457_v57  ;;  %395 = vst.msk [vmem:[%s715_s3 + $0x28] sm:$0xf] %vm384_vm1, %v465_v58  ;;  %v307_v63 = vmax.f32 %v253_v59, 0.0  ;;  %v315_v0 = vmax.f32 %v285_v60, 0.0 }
  0xf5   :  { %v257_v1 = vpop.f32.mrf.mxu0  ;;  %v289_v2 = vpop.f32.mrf.mxu1 }
  0xf6   :  { %v458_v3 = vpack.c.bf16 %v307_v63, %v307_v63  ;;  %v466_v4 = vpack.c.bf16 %v315_v0, %v315_v0  ;;  %v258_v5 = vadd.f32 %v630_v26, %v257_v1  ;;  %v290_v6 = vadd.f32 %v630_v26, %v289_v2 }
  0xf7   :  { %v259_v7 = vpop.f32.mrf.mxu0  ;;  %v291_v8 = vpop.f32.mrf.mxu1 }
  0xf8   :  { %388 = vst.msk [vmem:[%s715_s3 + $0xc] sm:$0xf] %vm384_vm1, %v458_v3  ;;  %396 = vst.msk [vmem:[%s715_s3 + $0x2c] sm:$0xf] %vm384_vm1, %v466_v4  ;;  %v308_v9 = vmax.f32 %v258_v5, 0.0  ;;  %v316_v10 = vmax.f32 %v290_v6, 0.0 }
  0xf9   :  { %v260_v11 = vpop.f32.mrf.mxu0  ;;  %v292_v12 = vpop.f32.mrf.mxu1 }
  0xfa   :  { %v459_v13 = vpack.c.bf16 %v308_v9, %v308_v9  ;;  %v467_v14 = vpack.c.bf16 %v316_v10, %v316_v10  ;;  %v261_v15 = vadd.f32 %v630_v26, %v260_v11  ;;  %v293_v16 = vadd.f32 %v630_v26, %v292_v12 }
  0xfb   :  { %v262_v17 = vpop.f32.mrf.mxu0  ;;  %v294_v18 = vpop.f32.mrf.mxu1 }
  0xfc   :  { %389 = vst.msk [vmem:[%s715_s3 + $0x10] sm:$0xf] %vm384_vm1, %v459_v13  ;;  %397 = vst.msk [vmem:[%s715_s3 + $0x30] sm:$0xf] %vm384_vm1, %v467_v14  ;;  %v309_v19 = vmax.f32 %v261_v15, 0.0  ;;  %v317_v20 = vmax.f32 %v293_v16, 0.0 }
  0xfd   :  { %v265_v21 = vpop.f32.mrf.mxu0  ;;  %v297_v22 = vpop.f32.mrf.mxu1 }
  0xfe   :  { %v460_v23 = vpack.c.bf16 %v309_v19, %v309_v19  ;;  %v468_v24 = vpack.c.bf16 %v317_v20, %v317_v20  ;;  %v266_v25 = vadd.f32 %v630_v26, %v265_v21  ;;  %v298_v27 = vadd.f32 %v630_v26, %v297_v22 }
  0xff   :  { %v267_v28 = vpop.f32.mrf.mxu0  ;;  %v299_v29 = vpop.f32.mrf.mxu1 }
 0x100   :  { %390 = vst.msk [vmem:[%s715_s3 + $0x14] sm:$0xf] %vm384_vm1, %v460_v23  ;;  %398 = vst.msk [vmem:[%s715_s3 + $0x34] sm:$0xf] %vm384_vm1, %v468_v24  ;;  %v310_v30 = vmax.f32 %v266_v25, 0.0  ;;  %v318_v31 = vmax.f32 %v298_v27, 0.0 }
 0x101   :  { %v268_v32 = vpop.f32.mrf.mxu0  ;;  %v300_v33 = vpop.f32.mrf.mxu1 }
 0x102   :  { %v461_v34 = vpack.c.bf16 %v310_v30, %v310_v30  ;;  %v469_v35 = vpack.c.bf16 %v318_v31, %v318_v31  ;;  %v269_v36 = vadd.f32 %v630_v26, %v268_v32  ;;  %v301_v37 = vadd.f32 %v630_v26, %v300_v33 }
 0x103   :  { %v270_v38 = vpop.f32.mrf.mxu0  ;;  %v302_v39 = vpop.f32.mrf.mxu1 }
 0x104   :  { %391 = vst.msk [vmem:[%s715_s3 + $0x18] sm:$0xf] %vm384_vm1, %v461_v34  ;;  %399 = vst.msk [vmem:[%s715_s3 + $0x38] sm:$0xf] %vm384_vm1, %v469_v35  ;;  %v311_v40 = vmax.f32 %v269_v36, 0.0  ;;  %v319_v41 = vmax.f32 %v301_v37, 0.0 }
 0x106   :  { %v462_v42 = vpack.c.bf16 %v311_v40, %v311_v40  ;;  %v470_v43 = vpack.c.bf16 %v319_v41, %v319_v41 }
 0x108   :  { %392 = vst.msk [vmem:[%s715_s3 + $0x1c] sm:$0xf] %vm384_vm1, %v462_v42  ;;  %400 = vst.msk [vmem:[%s715_s3 + $0x3c] sm:$0xf] %vm384_vm1, %v470_v43 }

// kernel: backbone_forward.13
= control target key start
LH: loop header
LB: loop body
LE: loop exit
PB: predicated region body
PF: predicated region fallthrough
CT: control target
= control target key end

     0   :  { %v613_v0 = vmov 0   ;;  %vm185_vm0 = vcmask 130048   ;;  %vm435_vm1 = vcmask 125952   ;;  %s831_s1 = inlined_call_operand.vmem [shape: bf16[144,16], index: 1, kind: input, shape index: {}]   ;;  %s832_s0 = inlined_call_operand.vmem [shape: bf16[128,144], index: 0, kind: input, shape index: {}]   ;;  %s833_s3 = inlined_call_operand.vmem [shape: bf16[128,16], index: 3, kind: input, shape index: {}]   ;;  %s834_s2 = inlined_call_operand.vmem [shape: f32[1,16], index: 2, kind: input, shape index: {}]   ;;  %s835_s4 = inlined_call_operand.vmem [shape: bf16[128,16], index: 4, kind: output, shape index: {}]  }
   0x1   :  { %210 = vmatprep.subr.bf16.mxu0 %v613_v0  ;;  %561 = vmatprep.subr.bf16.mxu1 %v613_v0  ;;  %v580_v1 = vld [vmem:[%s831_s1 + $0x38] sm:$0xff]   ;;  %v581_v2 = vld [vmem:[%s831_s1 + $0x30] sm:$0xff]   ;;  %v582_v3 = vld [vmem:[%s831_s1 + $0x28] sm:$0xff]  }
   0x2   :  { %211 = vmatpush1.bf16.msra.mxu0 %v580_v1  ;;  %570 = vmatpush1.bf16.msra.mxu1 %v580_v1  ;;  %v583_v4 = vld [vmem:[%s831_s1 + $0x20] sm:$0xff]   ;;  %v584_v7 = vld [vmem:[%s831_s1 + $0x18] sm:$0xff]   ;;  %v585_v8 = vld [vmem:[%s831_s1 + $0x10] sm:$0xff]  }
   0x3   :  { %212 = vmatprep.subr.bf16.mxu0 %v613_v0  ;;  %562 = vmatprep.subr.bf16.mxu1 %v613_v0  ;;  %v591_v5 = vld [vmem:[%s832_s0 + $0x4] ss:$8 sps:$4 sm:$0xff]   ;;  %v589_v12 = vld [vmem:[%s832_s0] ss:$8 sps:$4 sm:$0xff]   ;;  %v595_v14 = vld [vmem:[%s832_s0 + $0x14] ss:$8 sps:$4 sm:$0xff]  }
   0x4   :  { %v594_v6 = vld [vmem:[%s832_s0 + $0x44] ss:$8 sps:$4 sm:$0xff]   ;;  %482 = vmatprep.mubr.msk.bf16.mxu0 %vm185_vm0, %v591_v5  ;;  %v592_v13 = vld [vmem:[%s832_s0 + $0x40] ss:$8 sps:$4 sm:$0xff]   ;;  %v597_v15 = vld [vmem:[%s832_s0 + $0x54] ss:$8 sps:$4 sm:$0xff]  }
   0x5   :  { %486 = vmatprep.mubr.msk.bf16.mxu1 %vm185_vm0, %v594_v6  ;;  %v586_v9 = vld [vmem:[%s831_s1 + $0x8] sm:$0xff]   ;;  %v587_v10 = vld [vmem:[%s831_s1] sm:$0xff]   ;;  %v599_v16 = vld [vmem:[%s832_s0 + $0x10] ss:$8 sps:$4 sm:$0xff]  }
   0x6   :  { %213 = vmatpush1.bf16.msra.mxu0 %v581_v2  ;;  %571 = vmatpush1.bf16.msra.mxu1 %v581_v2  ;;  %v588_v11 = vld [vmem:[%s831_s1 + $0x40] sm:$0xff]   ;;  %v600_v17 = vld [vmem:[%s832_s0 + $0x50] ss:$8 sps:$4 sm:$0xff]   ;;  %v607_v22 = vld [vmem:[%s832_s0 + $0x34] ss:$8 sps:$4 sm:$0xff]  }
   0x7   :  { %214 = vmatprep.subr.bf16.mxu0 %v613_v0  ;;  %563 = vmatprep.subr.bf16.mxu1 %v613_v0  ;;  %v601_v18 = vld [vmem:[%s832_s0 + $0x24] ss:$8 sps:$4 sm:$0xff]   ;;  %v605_v20 = vld [vmem:[%s832_s0 + $0x20] ss:$8 sps:$4 sm:$0xff]   ;;  %v609_v23 = vld [vmem:[%s832_s0 + $0x74] ss:$8 sps:$4 sm:$0xff]  }
   0x8   :  { %v603_v19 = vld [vmem:[%s832_s0 + $0x64] ss:$8 sps:$4 sm:$0xff]   ;;  %v606_v21 = vld [vmem:[%s832_s0 + $0x60] ss:$8 sps:$4 sm:$0xff]   ;;  %v611_v24 = vld [vmem:[%s832_s0 + $0x30] ss:$8 sps:$4 sm:$0xff]  }
   0x9   :  { %v612_v25 = vld [vmem:[%s832_s0 + $0x70] ss:$8 sps:$4 sm:$0xff]   ;;  %v523_v26 = vld [vmem:[%s833_s3] sm:$0xff]   ;;  %v554_v41 = vld [vmem:[%s833_s3 + $0x8] sm:$0xff]  }
   0xa   :  { %215 = vmatpush1.bf16.msra.mxu0 %v582_v3  ;;  %572 = vmatpush1.bf16.msra.mxu1 %v582_v3  ;;  %v557_v27 = vld [vmem:[%s833_s3 + $0x20] sm:$0xff]   ;;  %v524_v29 = vunpack.c.l.bf16 %v523_v26  ;;  %v525_v39 = vunpack.c.h.bf16 %v523_v26  ;;  %v558_v42 = vld [vmem:[%s833_s3 + $0x28] sm:$0xff]   ;;  %v528_v51 = vunpack.c.l.bf16 %v554_v41  ;;  %v529_v1 = vunpack.c.h.bf16 %v554_v41 }
   0xb   :  { %216 = vmatprep.subr.bf16.mxu0 %v613_v0  ;;  %564 = vmatprep.subr.bf16.mxu1 %v613_v0  ;;  %v731_v28 = vld [vmem:[%s834_s2] ss:$0 sm:$0xff]  ;;  %v540_v30 = vunpack.c.l.bf16 %v557_v27  ;;  %v541_v40 = vunpack.c.h.bf16 %v557_v27  ;;  %v544_v52 = vunpack.c.l.bf16 %v558_v42  ;;  %v545_v2 = vunpack.c.h.bf16 %v558_v42 }
   0xe   :  { %217 = vmatpush1.bf16.msra.mxu0 %v583_v4  ;;  %573 = vmatpush1.bf16.msra.mxu1 %v583_v4 }
   0xf   :  { %218 = vmatprep.subr.bf16.mxu0 %v613_v0  ;;  %565 = vmatprep.subr.bf16.mxu1 %v613_v0 }
  0x12   :  { %219 = vmatpush1.bf16.msra.mxu0 %v584_v7  ;;  %574 = vmatpush1.bf16.msra.mxu1 %v584_v7  ;;  %v555_v7 = vld [vmem:[%s833_s3 + $0x10] sm:$0xff]  }
  0x13   :  { %220 = vmatprep.subr.bf16.mxu0 %v613_v0  ;;  %566 = vmatprep.subr.bf16.mxu1 %v613_v0 }
  0x16   :  { %221 = vmatpush1.bf16.msra.mxu0 %v585_v8  ;;  %575 = vmatpush1.bf16.msra.mxu1 %v585_v8  ;;  %v559_v8 = vld [vmem:[%s833_s3 + $0x30] sm:$0xff]  }
  0x17   :  { %222 = vmatprep.subr.bf16.mxu0 %v613_v0  ;;  %567 = vmatprep.subr.bf16.mxu1 %v613_v0 }
  0x1a   :  { %223 = vmatpush1.bf16.msra.mxu0 %v586_v9  ;;  %576 = vmatpush1.bf16.msra.mxu1 %v586_v9 }
  0x1b   :  { %224 = vmatprep.subr.bf16.mxu0 %v613_v0  ;;  %568 = vmatprep.subr.bf16.mxu1 %v613_v0 }
  0x1e   :  { %225 = vmatpush1.bf16.msra.mxu0 %v587_v10  ;;  %577 = vmatpush1.bf16.msra.mxu1 %v587_v10 }
  0x1f   :  { %240 = vmatprep.subr.bf16.mxu0 %v613_v0  ;;  %569 = vmatprep.subr.bf16.mxu1 %v613_v0 }
  0x22   :  { %241 = vmatpush2.bf16.msra.mxu0 %v588_v11  ;;  %578 = vmatpush2.bf16.msra.mxu1 %v588_v11 }
  0x25   :  { %243 = vmatmul.mubr.bf16.vlgmr.msra.gmra.mxu0 %v589_v12  ;;  %275 = vmatmul.mubr.bf16.vlgmr.msra.gmra.mxu1 %v592_v13 }
  0x26   :  { %483 = vmatprep.mubr.msk.bf16.mxu0 %vm185_vm0, %v595_v14  ;;  %487 = vmatprep.mubr.msk.bf16.mxu1 %vm185_vm0, %v597_v15 }
  0x2d   :  { %251 = vmatmul.mubr.bf16.gmra.mxu0 %v599_v16  ;;  %283 = vmatmul.mubr.bf16.gmra.mxu1 %v600_v17  ;;  %v532_v17 = vunpack.c.l.bf16 %v555_v7 }
  0x2e   :  { %484 = vmatprep.mubr.msk.bf16.mxu0 %vm185_vm0, %v601_v18  ;;  %488 = vmatprep.mubr.msk.bf16.mxu1 %vm185_vm0, %v603_v19  ;;  %v548_v18 = vunpack.c.l.bf16 %v559_v8 }
  0x35   :  { %259 = vmatmul.mubr.bf16.gmra.mxu0 %v605_v20  ;;  %291 = vmatmul.mubr.bf16.gmra.mxu1 %v606_v21 }
  0x36   :  { %485 = vmatprep.mubr.msk.bf16.mxu0 %vm185_vm0, %v607_v22  ;;  %489 = vmatprep.mubr.msk.bf16.mxu1 %vm185_vm0, %v609_v23 }
  0x3d   :  { %267 = vmatmul.mubr.bf16.gmra.mxu0 %v611_v24  ;;  %299 = vmatmul.mubr.bf16.gmra.mxu1 %v612_v25 }
  0xe5   :  { %v244_v31 = vpop.f32.mrf.mxu0  ;;  %v276_v32 = vpop.f32.mrf.mxu1 }
  0xe6   :  { %v245_v33 = vadd.f32 %v731_v28, %v244_v31  ;;  %v277_v34 = vadd.f32 %v731_v28, %v276_v32  ;;  %v533_v32 = vunpack.c.h.bf16 %v555_v7 }
  0xe7   :  { %v246_v35 = vpop.f32.mrf.mxu0  ;;  %v278_v36 = vpop.f32.mrf.mxu1 }
  0xe8   :  { %v339_v37 = vadd.f32 %v524_v29, %v245_v33  ;;  %v347_v38 = vadd.f32 %v540_v30, %v277_v34  ;;  %v549_v33 = vunpack.c.h.bf16 %v559_v8 }
  0xe9   :  { %v247_v43 = vpop.f32.mrf.mxu0  ;;  %v279_v44 = vpop.f32.mrf.mxu1 }
  0xea   :  { %v355_v45 = vmax.f32 %v339_v37, 0.0  ;;  %v363_v46 = vmax.f32 %v347_v38, 0.0  ;;  %v248_v47 = vadd.f32 %v731_v28, %v247_v43  ;;  %v280_v48 = vadd.f32 %v731_v28, %v279_v44  ;;  %v556_v38 = vld [vmem:[%s833_s3 + $0x18] sm:$0xff]  }
  0xeb   :  { %v249_v49 = vpop.f32.mrf.mxu0  ;;  %v281_v50 = vpop.f32.mrf.mxu1 }
  0xec   :  { %v506_v53 = vpack.c.bf16 %v355_v45, %v355_v45  ;;  %v514_v54 = vpack.c.bf16 %v363_v46, %v363_v46  ;;  %v340_v55 = vadd.f32 %v525_v39, %v248_v47  ;;  %v348_v56 = vadd.f32 %v541_v40, %v280_v48  ;;  %v560_v39 = vld [vmem:[%s833_s3 + $0x38] sm:$0xff]  }
  0xed   :  { %v252_v57 = vpop.f32.mrf.mxu0  ;;  %v284_v58 = vpop.f32.mrf.mxu1  ;;  %v536_v48 = vunpack.c.l.bf16 %v556_v38  ;;  %v552_v49 = vunpack.c.l.bf16 %v560_v39 }
  0xee   :  { %436 = vst.msk [vmem:[%s835_s4] sm:$0xf] %vm435_vm1, %v506_v53  ;;  %444 = vst.msk [vmem:[%s835_s4 + $0x20] sm:$0xf] %vm435_vm1, %v514_v54  ;;  %v356_v59 = vmax.f32 %v340_v55, 0.0  ;;  %v364_v60 = vmax.f32 %v348_v56, 0.0  ;;  %v253_v61 = vadd.f32 %v731_v28, %v252_v57  ;;  %v285_v62 = vadd.f32 %v731_v28, %v284_v58 }
  0xef   :  { %v254_v63 = vpop.f32.mrf.mxu0  ;;  %v286_v0 = vpop.f32.mrf.mxu1 }
  0xf0   :  { %v507_v3 = vpack.c.bf16 %v356_v59, %v356_v59  ;;  %v515_v4 = vpack.c.bf16 %v364_v60, %v364_v60  ;;  %v341_v5 = vadd.f32 %v528_v51, %v253_v61  ;;  %v349_v6 = vadd.f32 %v544_v52, %v285_v62 }
  0xf1   :  { %v255_v9 = vpop.f32.mrf.mxu0  ;;  %v287_v10 = vpop.f32.mrf.mxu1  ;;  %v537_v62 = vunpack.c.h.bf16 %v556_v38  ;;  %v553_v63 = vunpack.c.h.bf16 %v560_v39 }
  0xf2   :  { %437 = vst.msk [vmem:[%s835_s4 + $0x4] sm:$0xf] %vm435_vm1, %v507_v3  ;;  %445 = vst.msk [vmem:[%s835_s4 + $0x24] sm:$0xf] %vm435_vm1, %v515_v4  ;;  %v357_v11 = vmax.f32 %v341_v5, 0.0  ;;  %v365_v12 = vmax.f32 %v349_v6, 0.0  ;;  %v256_v13 = vadd.f32 %v731_v28, %v255_v9  ;;  %v288_v14 = vadd.f32 %v731_v28, %v287_v10 }
  0xf3   :  { %v257_v15 = vpop.f32.mrf.mxu0  ;;  %v289_v16 = vpop.f32.mrf.mxu1 }
  0xf4   :  { %v508_v19 = vpack.c.bf16 %v357_v11, %v357_v11  ;;  %v516_v20 = vpack.c.bf16 %v365_v12, %v365_v12  ;;  %v342_v21 = vadd.f32 %v529_v1, %v256_v13  ;;  %v350_v22 = vadd.f32 %v545_v2, %v288_v14 }
  0xf5   :  { %v260_v23 = vpop.f32.mrf.mxu0  ;;  %v292_v24 = vpop.f32.mrf.mxu1 }
  0xf6   :  { %438 = vst.msk [vmem:[%s835_s4 + $0x8] sm:$0xf] %vm435_vm1, %v508_v19  ;;  %446 = vst.msk [vmem:[%s835_s4 + $0x28] sm:$0xf] %vm435_vm1, %v516_v20  ;;  %v358_v25 = vmax.f32 %v342_v21, 0.0  ;;  %v366_v26 = vmax.f32 %v350_v22, 0.0  ;;  %v261_v27 = vadd.f32 %v731_v28, %v260_v23  ;;  %v293_v29 = vadd.f32 %v731_v28, %v292_v24 }
  0xf7   :  { %v262_v30 = vpop.f32.mrf.mxu0  ;;  %v294_v31 = vpop.f32.mrf.mxu1 }
  0xf8   :  { %v509_v34 = vpack.c.bf16 %v358_v25, %v358_v25  ;;  %v517_v35 = vpack.c.bf16 %v366_v26, %v366_v26  ;;  %v343_v36 = vadd.f32 %v532_v17, %v261_v27  ;;  %v351_v37 = vadd.f32 %v548_v18, %v293_v29 }
  0xf9   :  { %v263_v40 = vpop.f32.mrf.mxu0  ;;  %v295_v41 = vpop.f32.mrf.mxu1 }
  0xfa   :  { %439 = vst.msk [vmem:[%s835_s4 + $0xc] sm:$0xf] %vm435_vm1, %v509_v34  ;;  %447 = vst.msk [vmem:[%s835_s4 + $0x2c] sm:$0xf] %vm435_vm1, %v517_v35  ;;  %v359_v42 = vmax.f32 %v343_v36, 0.0  ;;  %v367_v43 = vmax.f32 %v351_v37, 0.0  ;;  %v264_v44 = vadd.f32 %v731_v28, %v263_v40  ;;  %v296_v45 = vadd.f32 %v731_v28, %v295_v41 }
  0xfb   :  { %v265_v46 = vpop.f32.mrf.mxu0  ;;  %v297_v47 = vpop.f32.mrf.mxu1 }
  0xfc   :  { %v510_v50 = vpack.c.bf16 %v359_v42, %v359_v42  ;;  %v518_v51 = vpack.c.bf16 %v367_v43, %v367_v43  ;;  %v344_v52 = vadd.f32 %v533_v32, %v264_v44  ;;  %v352_v53 = vadd.f32 %v549_v33, %v296_v45 }
  0xfd   :  { %v268_v54 = vpop.f32.mrf.mxu0  ;;  %v300_v55 = vpop.f32.mrf.mxu1 }
  0xfe   :  { %440 = vst.msk [vmem:[%s835_s4 + $0x10] sm:$0xf] %vm435_vm1, %v510_v50  ;;  %448 = vst.msk [vmem:[%s835_s4 + $0x30] sm:$0xf] %vm435_vm1, %v518_v51  ;;  %v360_v56 = vmax.f32 %v344_v52, 0.0  ;;  %v368_v57 = vmax.f32 %v352_v53, 0.0  ;;  %v269_v58 = vadd.f32 %v731_v28, %v268_v54  ;;  %v301_v59 = vadd.f32 %v731_v28, %v300_v55 }
  0xff   :  { %v270_v60 = vpop.f32.mrf.mxu0  ;;  %v302_v61 = vpop.f32.mrf.mxu1 }
 0x100   :  { %v511_v0 = vpack.c.bf16 %v360_v56, %v360_v56  ;;  %v519_v1 = vpack.c.bf16 %v368_v57, %v368_v57  ;;  %v345_v2 = vadd.f32 %v536_v48, %v269_v58  ;;  %v353_v3 = vadd.f32 %v552_v49, %v301_v59 }
 0x101   :  { %v271_v4 = vpop.f32.mrf.mxu0  ;;  %v303_v5 = vpop.f32.mrf.mxu1 }
 0x102   :  { %441 = vst.msk [vmem:[%s835_s4 + $0x14] sm:$0xf] %vm435_vm1, %v511_v0  ;;  %449 = vst.msk [vmem:[%s835_s4 + $0x34] sm:$0xf] %vm435_vm1, %v519_v1  ;;  %v361_v6 = vmax.f32 %v345_v2, 0.0  ;;  %v369_v7 = vmax.f32 %v353_v3, 0.0  ;;  %v272_v8 = vadd.f32 %v731_v28, %v271_v4  ;;  %v304_v9 = vadd.f32 %v731_v28, %v303_v5 }
 0x103   :  { %v273_v10 = vpop.f32.mrf.mxu0  ;;  %v305_v11 = vpop.f32.mrf.mxu1 }
 0x104   :  { %v512_v12 = vpack.c.bf16 %v361_v6, %v361_v6  ;;  %v520_v13 = vpack.c.bf16 %v369_v7, %v369_v7  ;;  %v346_v14 = vadd.f32 %v537_v62, %v272_v8  ;;  %v354_v15 = vadd.f32 %v553_v63, %v304_v9 }
 0x106   :  { %442 = vst.msk [vmem:[%s835_s4 + $0x18] sm:$0xf] %vm435_vm1, %v512_v12  ;;  %450 = vst.msk [vmem:[%s835_s4 + $0x38] sm:$0xf] %vm435_vm1, %v520_v13  ;;  %v362_v16 = vmax.f32 %v346_v14, 0.0  ;;  %v370_v17 = vmax.f32 %v354_v15, 0.0 }
 0x108   :  { %v513_v18 = vpack.c.bf16 %v362_v16, %v362_v16  ;;  %v521_v28 = vpack.c.bf16 %v370_v17, %v370_v17 }
 0x10a   :  { %443 = vst.msk [vmem:[%s835_s4 + $0x1c] sm:$0xf] %vm435_vm1, %v513_v18  ;;  %451 = vst.msk [vmem:[%s835_s4 + $0x3c] sm:$0xf] %vm435_vm1, %v521_v28 }

// kernel: backbone_forward.14
= control target key start
LH: loop header
LB: loop body
LE: loop exit
PB: predicated region body
PF: predicated region fallthrough
CT: control target
= control target key end

     0   :  { %v259_v0 = vmov 0   ;;  %vm116_vm0 = vcmask 130048   ;;  %vm192_vm1 = vcmask 257024   ;;  %s338_s1 = inlined_call_operand.vmem [shape: bf16[144,32], index: 1, kind: input, shape index: {}]   ;;  %s339_s0 = inlined_call_operand.vmem [shape: bf16[32,144], index: 0, kind: input, shape index: {}]   ;;  %s340_s2 = inlined_call_operand.vmem [shape: f32[1,32], index: 2, kind: input, shape index: {}]   ;;  %s341_s3 = inlined_call_operand.vmem [shape: bf16[32,32], index: 3, kind: output, shape index: {}]  }
   0x1   :  { %123 = vmatprep.subr.bf16.mxu0 %v259_v0  ;;  %225 = vmatprep.subr.bf16.mxu1 %v259_v0  ;;  %v244_v1 = vld [vmem:[%s338_s1 + $0x38] sm:$0xff]   ;;  %v245_v2 = vld [vmem:[%s338_s1 + $0x30] sm:$0xff]   ;;  %v246_v3 = vld [vmem:[%s338_s1 + $0x28] sm:$0xff]  }
   0x2   :  { %124 = vmatpush1.bf16.msra.mxu0 %v244_v1  ;;  %234 = vmatpush1.bf16.msra.mxu1 %v244_v1  ;;  %v247_v4 = vld [vmem:[%s338_s1 + $0x20] sm:$0xff]   ;;  %v258_v6 = vld [vmem:[%s339_s0 + $0x14] ss:$8 sps:$4 sm:$0xff]   ;;  %v250_v9 = vld [vmem:[%s338_s1 + $0x8] sm:$0xff]  }
   0x3   :  { %125 = vmatprep.subr.bf16.mxu0 %v259_v0  ;;  %226 = vmatprep.subr.bf16.mxu1 %v259_v0  ;;  %v255_v5 = vld [vmem:[%s339_s0 + $0x4] ss:$8 sps:$4 sm:$0xff]   ;;  %v248_v7 = vld [vmem:[%s338_s1 + $0x18] sm:$0xff]   ;;  %v249_v8 = vld [vmem:[%s338_s1 + $0x10] sm:$0xff]  }
   0x4   :  { %215 = vmatprep.mubr.msk.bf16.mxu0 %vm116_vm0, %v255_v5  ;;  %216 = vmatprep.mubr.msk.bf16.mxu1 %vm116_vm0, %v258_v6  ;;  %v251_v10 = vld [vmem:[%s338_s1] sm:$0xff]   ;;  %v256_v13 = vld [vmem:[%s339_s0 + $0x10] ss:$8 sps:$4 sm:$0xff]  }
   0x5   :  { %v252_v11 = vld [vmem:[%s338_s1 + $0x40] sm:$0xff]  }
   0x6   :  { %126 = vmatpush1.bf16.msra.mxu0 %v245_v2  ;;  %235 = vmatpush1.bf16.msra.mxu1 %v245_v2  ;;  %v253_v12 = vld [vmem:[%s339_s0] ss:$8 sps:$4 sm:$0xff]  }
   0x7   :  { %127 = vmatprep.subr.bf16.mxu0 %v259_v0  ;;  %227 = vmatprep.subr.bf16.mxu1 %v259_v0  ;;  %v201_v14 = vld [vmem:[%s340_s2] ss:$0 sm:$0xff] }
   0xa   :  { %128 = vmatpush1.bf16.msra.mxu0 %v246_v3  ;;  %236 = vmatpush1.bf16.msra.mxu1 %v246_v3 }
   0xb   :  { %129 = vmatprep.subr.bf16.mxu0 %v259_v0  ;;  %228 = vmatprep.subr.bf16.mxu1 %v259_v0 }
   0xe   :  { %130 = vmatpush1.bf16.msra.mxu0 %v247_v4  ;;  %237 = vmatpush1.bf16.msra.mxu1 %v247_v4 }
   0xf   :  { %131 = vmatprep.subr.bf16.mxu0 %v259_v0  ;;  %229 = vmatprep.subr.bf16.mxu1 %v259_v0 }
  0x12   :  { %132 = vmatpush1.bf16.msra.mxu0 %v248_v7  ;;  %238 = vmatpush1.bf16.msra.mxu1 %v248_v7 }
  0x13   :  { %133 = vmatprep.subr.bf16.mxu0 %v259_v0  ;;  %230 = vmatprep.subr.bf16.mxu1 %v259_v0 }
  0x16   :  { %134 = vmatpush1.bf16.msra.mxu0 %v249_v8  ;;  %239 = vmatpush1.bf16.msra.mxu1 %v249_v8 }
  0x17   :  { %135 = vmatprep.subr.bf16.mxu0 %v259_v0  ;;  %231 = vmatprep.subr.bf16.mxu1 %v259_v0 }
  0x1a   :  { %136 = vmatpush1.bf16.msra.mxu0 %v250_v9  ;;  %240 = vmatpush1.bf16.msra.mxu1 %v250_v9 }
  0x1b   :  { %137 = vmatprep.subr.bf16.mxu0 %v259_v0  ;;  %232 = vmatprep.subr.bf16.mxu1 %v259_v0 }
  0x1e   :  { %138 = vmatpush1.bf16.msra.mxu0 %v251_v10  ;;  %241 = vmatpush1.bf16.msra.mxu1 %v251_v10 }
  0x1f   :  { %153 = vmatprep.subr.bf16.mxu0 %v259_v0  ;;  %233 = vmatprep.subr.bf16.mxu1 %v259_v0 }
  0x22   :  { %154 = vmatpush2.bf16.msra.mxu0 %v252_v11  ;;  %242 = vmatpush2.bf16.msra.mxu1 %v252_v11 }
  0x25   :  { %156 = vmatmul.mubr.bf16.vlgmr.msra.gmra.mxu0 %v253_v12  ;;  %164 = vmatmul.mubr.bf16.vlgmr.msra.gmra.mxu1 %v256_v13 }
  0xe5   :  { %v157_v15 = vpop.f32.mrf.mxu0  ;;  %v165_v16 = vpop.f32.mrf.mxu1 }
  0xe6   :  { %v158_v17 = vadd.f32 %v201_v14, %v157_v15  ;;  %v166_v18 = vadd.f32 %v201_v14, %v165_v16 }
  0xe7   :  { %v159_v19 = vpop.f32.mrf.mxu0  ;;  %v167_v20 = vpop.f32.mrf.mxu1 }
  0xe8   :  { %v172_v21 = vmax.f32 %v158_v17, 0.0  ;;  %v174_v22 = vmax.f32 %v166_v18, 0.0 }
  0xe9   :  { %v160_v23 = vpop.f32.mrf.mxu0  ;;  %v168_v24 = vpop.f32.mrf.mxu1 }
  0xea   :  { %v221_v25 = vpack.c.bf16 %v172_v21, %v172_v21  ;;  %v223_v26 = vpack.c.bf16 %v174_v22, %v174_v22  ;;  %v161_v27 = vadd.f32 %v201_v14, %v160_v23  ;;  %v169_v28 = vadd.f32 %v201_v14, %v168_v24 }
  0xeb   :  { %v162_v29 = vpop.f32.mrf.mxu0  ;;  %v170_v30 = vpop.f32.mrf.mxu1 }
  0xec   :  { %193 = vst.msk [vmem:[%s341_s3] sm:$0xf] %vm192_vm1, %v221_v25  ;;  %195 = vst.msk [vmem:[%s341_s3 + $0x8] sm:$0xf] %vm192_vm1, %v223_v26  ;;  %v173_v31 = vmax.f32 %v161_v27, 0.0  ;;  %v175_v32 = vmax.f32 %v169_v28, 0.0 }
  0xee   :  { %v222_v33 = vpack.c.bf16 %v173_v31, %v173_v31  ;;  %v224_v34 = vpack.c.bf16 %v175_v32, %v175_v32 }
  0xf0   :  { %194 = vst.msk [vmem:[%s341_s3 + $0x4] sm:$0xf] %vm192_vm1, %v222_v33  ;;  %196 = vst.msk [vmem:[%s341_s3 + $0xc] sm:$0xf] %vm192_vm1, %v224_v34 }

// kernel: backbone_forward.15
= control target key start
LH: loop header
LB: loop body
LE: loop exit
PB: predicated region body
PF: predicated region fallthrough
CT: control target
= control target key end

     0   :  { %vm90_vm0 = vcmask 130048   ;;  %vm284_vm1 = vcmask 261120   ;;  %vm431_vm2 = vcmask 257024   ;;  %s697_s1 = inlined_call_operand.vmem [shape: bf16[288,32], index: 1, kind: input, shape index: {}]   ;;  %s698_s4 = inlined_call_operand.vmem [shape: bf16[16,32], index: 4, kind: input, shape index: {}]   ;;  %s699_s3 = inlined_call_operand.vmem [shape: bf16[32,16], index: 3, kind: input, shape index: {}]   ;;  %s700_s0 = inlined_call_operand.vmem [shape: bf16[32,288], index: 0, kind: input, shape index: {}]   ;;  %s701_s2 = inlined_call_operand.vmem [shape: f32[1,32], index: 2, kind: input, shape index: {}]   ;;  %s702_s5 = inlined_call_operand.vmem [shape: f32[1,32], index: 5, kind: input, shape index: {}]   ;;  %s703_s6 = inlined_call_operand.vmem [shape: bf16[32,32], index: 6, kind: output, shape index: {}]  }
   0x1   :  { %v530_v0 = vld [vmem:[%s697_s1 + $0x78] sm:$0xff]   ;;  %v532_v2 = vld [vmem:[%s697_s1 + $0x70] sm:$0xff]   ;;  %v534_v4 = vld [vmem:[%s697_s1 + $0x68] sm:$0xff]  }
   0x2   :  { %v531_v1 = vld [vmem:[%s697_s1 + $0x38] sm:$0xff]   ;;  %484 = vmatprep.subr.bf16.mxu1 %v530_v0  ;;  %v533_v3 = vld [vmem:[%s697_s1 + $0x30] sm:$0xff]   ;;  %v535_v5 = vld [vmem:[%s697_s1 + $0x28] sm:$0xff]  }
   0x3   :  { %485 = vmatpush3.bf16.msra.mxu1 %v531_v1  ;;  %v536_v6 = vld [vmem:[%s697_s1 + $0x60] sm:$0xff]   ;;  %v538_v8 = vld [vmem:[%s697_s1 + $0x58] sm:$0xff]   ;;  %v540_v11 = vld [vmem:[%s697_s1 + $0x50] sm:$0xff]  }
   0x4   :  { %486 = vmatprep.subr.bf16.mxu1 %v532_v2  ;;  %v537_v7 = vld [vmem:[%s697_s1 + $0x20] sm:$0xff]   ;;  %v539_v10 = vld [vmem:[%s697_s1 + $0x18] sm:$0xff]   ;;  %v546_v13 = vld [vmem:[%s699_s3 + $0x8] sm:$0xff]  }
   0x5   :  { %v542_v9 = vld [vmem:[%s698_s4] sm:$0xff]   ;;  %v548_v14 = vld [vmem:[%s697_s1 + $0x88] sm:$0xff]   ;;  %v541_v15 = vld [vmem:[%s697_s1 + $0x10] sm:$0xff]  }
   0x6   :  { %516 = vmatprep.subr.bf16.mxu0 %v542_v9  ;;  %v545_v12 = vld [vmem:[%s699_s3] sm:$0xff]   ;;  %v543_v16 = vld [vmem:[%s697_s1 + $0x48] sm:$0xff]  }
   0x7   :  { %487 = vmatpush3.bf16.msra.mxu1 %v533_v3  ;;  %517 = vmatpush3.bf16.msra.mxu0 %v542_v9  ;;  %v544_v17 = vld [vmem:[%s697_s1 + $0x8] sm:$0xff]   ;;  %v552_v18 = vld [vmem:[%s700_s0 + $0x4] ss:$12 sps:$4 sm:$0xff]   ;;  %v471_v40 = vld [vmem:[%s701_s2] ss:$0 sm:$0xff] }
   0x8   :  { %488 = vmatprep.subr.bf16.mxu1 %v534_v4  ;;  %518 = vmatprep.mubr.msk.bf16.mxu0 %vm90_vm0, %v545_v12  ;;  %v547_v19 = vld [vmem:[%s697_s1 + $0x40] sm:$0xff]   ;;  %v554_v21 = vld [vmem:[%s700_s0 + $0x8] ss:$12 sps:$4 sm:$0xff]  }
   0x9   :  { %522 = vmatprep.subr.bf16.mxu0 %v548_v14  ;;  %v553_v20 = vld [vmem:[%s697_s1 + $0x80] sm:$0xff]   ;;  %323 = vmatprep.mubr.bf16.mxu1 %v552_v18  ;;  %v556_v25 = vld [vmem:[%s700_s0 + $0x1c] ss:$12 sps:$4 sm:$0xff]  }
   0xa   :  { %519 = vmatmul.mubr.msk.bf16.vlgmr.msra.gmra.mxu0 %vm90_vm0, %v546_v13  ;;  %v555_v22 = vld [vmem:[%s700_s0 + $0x20] ss:$12 sps:$4 sm:$0xff]   ;;  %v558_v26 = vld [vmem:[%s700_s0 + $0x18] ss:$12 sps:$4 sm:$0xff]  }
   0xb   :  { %489 = vmatpush3.bf16.msra.mxu1 %v535_v5  ;;  %523 = vmatpush3.bf16.msra.mxu0 %v548_v14  ;;  %v549_v23 = vld [vmem:[%s697_s1] sm:$0xff]  }
   0xc   :  { %490 = vmatprep.subr.bf16.mxu1 %v536_v6  ;;  %524 = vmatprep.subr.bf16.mxu0 %v553_v20  ;;  %v550_v24 = vld [vmem:[%s700_s0] ss:$12 sps:$4 sm:$0xff]  }
   0xd   :  { %526 = vmatprep.mubr.msk.bf16.mxu0 %vm284_vm1, %v554_v21  ;;  %v472_v43 = vld [vmem:[%s702_s5] ss:$0 sm:$0xff] }
   0xf   :  { %491 = vmatpush3.bf16.msra.mxu1 %v537_v7  ;;  %525 = vmatpush3.bf16.msra.mxu0 %v553_v20 }
  0x10   :  { %492 = vmatprep.subr.bf16.mxu1 %v538_v8 }
  0x12   :  { %527 = vmatmul.mubr.msk.bf16.vlgmr.msra.gmra.mxu0 %vm284_vm1, %v555_v22 }
  0x13   :  { %493 = vmatpush3.bf16.msra.mxu1 %v539_v10 }
  0x14   :  { %494 = vmatprep.subr.bf16.mxu1 %v540_v11 }
  0x17   :  { %495 = vmatpush3.bf16.msra.mxu1 %v541_v15 }
  0x18   :  { %496 = vmatprep.subr.bf16.mxu1 %v543_v16 }
  0x1b   :  { %497 = vmatpush3.bf16.msra.mxu1 %v544_v17 }
  0x1c   :  { %498 = vmatprep.subr.bf16.mxu1 %v547_v19 }
  0x1f   :  { %499 = vmatpush3.bf16.msra.mxu1 %v549_v23 }
  0x22   :  { %324 = vmatmul.mubr.bf16.vlgmr.msra.gmra.mxu1 %v550_v24 }
  0x23   :  { %331 = vmatprep.mubr.bf16.mxu1 %v556_v25 }
  0x2a   :  { %332 = vmatmul.mubr.bf16.gmra.mxu1 %v558_v26 }
  0xca   :  { %v520_v27 = vpop.f32.mrf.mxu0 }
  0xcc   :  { %v131_v28 = vpop.f32.mrf.mxu0 }
  0xce   :  { %v521_v29 = vpop.f32.mrf.mxu0 }
  0xd0   :  { %v134_v30 = vpop.f32.mrf.mxu0 }
  0xd2   :  { %v528_v31 = vpop.f32.mrf.mxu0 }
  0xd4   :  { %v374_v33 = vpop.f32.mrf.mxu0 }
  0xd6   :  { %v529_v37 = vpop.f32.mrf.mxu0 }
  0xd8   :  { %v377_v45 = vpop.f32.mrf.mxu0 }
  0xe2   :  { %v500_v32 = vpop.f32.mrf.mxu1 }
  0xe4   :  { %v501_v34 = vpop.f32.mrf.mxu1 }
  0xe5   :  { %v502_v35 = vadd.f32 %v501_v34, %v500_v32 }
  0xe6   :  { %v503_v36 = vpop.f32.mrf.mxu1 }
  0xe7   :  { %v326_v38 = vadd.f32 %v502_v35, %v131_v28 }
  0xe8   :  { %v504_v39 = vpop.f32.mrf.mxu1 }
  0xe9   :  { %v505_v41 = vadd.f32 %v504_v39, %v503_v36  ;;  %v375_v42 = vadd.f32 %v374_v33, %v326_v38 }
  0xea   :  { %v506_v44 = vpop.f32.mrf.mxu1 }
  0xeb   :  { %v396_v46 = vadd.f32 %v471_v40, %v375_v42  ;;  %v329_v47 = vadd.f32 %v505_v41, %v134_v30 }
  0xec   :  { %v507_v48 = vpop.f32.mrf.mxu1 }
  0xed   :  { %v407_v49 = vadd.f32 %v472_v43, %v396_v46  ;;  %v508_v50 = vadd.f32 %v507_v48, %v506_v44  ;;  %v378_v51 = vadd.f32 %v377_v45, %v329_v47 }
  0xee   :  { %v509_v52 = vpop.f32.mrf.mxu1 }
  0xef   :  { %v411_v53 = vmax.f32 %v407_v49, 0.0  ;;  %v334_v54 = vadd.f32 %v520_v27, %v508_v50  ;;  %v397_v55 = vadd.f32 %v471_v40, %v378_v51 }
  0xf0   :  { %v510_v56 = vpop.f32.mrf.mxu1 }
  0xf1   :  { %v477_v57 = vpack.c.bf16 %v411_v53, %v411_v53  ;;  %v383_v58 = vadd.f32 %v528_v31, %v334_v54  ;;  %v408_v59 = vadd.f32 %v472_v43, %v397_v55  ;;  %v511_v60 = vadd.f32 %v510_v56, %v509_v52 }
  0xf3   :  { %432 = vst.msk [vmem:[%s703_s6] sm:$0xf] %vm431_vm2, %v477_v57  ;;  %v398_v61 = vadd.f32 %v471_v40, %v383_v58  ;;  %v412_v62 = vmax.f32 %v408_v59, 0.0  ;;  %v337_v63 = vadd.f32 %v521_v29, %v511_v60 }
  0xf5   :  { %v409_v0 = vadd.f32 %v472_v43, %v398_v61  ;;  %v478_v1 = vpack.c.bf16 %v412_v62, %v412_v62  ;;  %v386_v2 = vadd.f32 %v529_v37, %v337_v63 }
  0xf7   :  { %v413_v3 = vmax.f32 %v409_v0, 0.0  ;;  %433 = vst.msk [vmem:[%s703_s6 + $0x4] sm:$0xf] %vm431_vm2, %v478_v1  ;;  %v399_v4 = vadd.f32 %v471_v40, %v386_v2 }
  0xf9   :  { %v479_v5 = vpack.c.bf16 %v413_v3, %v413_v3  ;;  %v410_v6 = vadd.f32 %v472_v43, %v399_v4 }
  0xfb   :  { %434 = vst.msk [vmem:[%s703_s6 + $0x8] sm:$0xf] %vm431_vm2, %v479_v5  ;;  %v414_v7 = vmax.f32 %v410_v6, 0.0 }
  0xfd   :  { %v480_v8 = vpack.c.bf16 %v414_v7, %v414_v7 }
  0xff   :  { %435 = vst.msk [vmem:[%s703_s6 + $0xc] sm:$0xf] %vm431_vm2, %v480_v8 }

// kernel: backbone_forward.16
= control target key start
LH: loop header
LB: loop body
LE: loop exit
PB: predicated region body
PF: predicated region fallthrough
CT: control target
= control target key end

     0   :  { %v349_v1 = vmov 0.0   ;;  %vm350_vm0 = vmmov 0   ;;  %vm178_vm1 = vcmask 261120   ;;  %vm264_vm2 = vcmask 519168   ;;  %s437_s1 = inlined_call_operand.vmem [shape: bf16[288,64], index: 1, kind: input, shape index: {}]   ;;  %s438_s0 = inlined_call_operand.vmem [shape: bf16[8,288], index: 0, kind: input, shape index: {}]   ;;  %s439_s2 = inlined_call_operand.vmem [shape: f32[1,64], index: 2, kind: input, shape index: {}]   ;;  %s440_s3 = inlined_call_operand.vmem [shape: bf16[8,64], index: 3, kind: output, shape index: {}]  }
   0x1   :  { %v328_v0 = vld [vmem:[%s437_s1 + $0x78] sm:$0xff]   ;;  %318 = vmatprep.subr.bf16.mxu1 %v349_v1  ;;  %322 = vmatprep.mubr.msk.bf16.mxu1 %vm350_vm0, %v349_v1  ;;  %v330_v3 = vld [vmem:[%s437_s1 + $0x70] sm:$0xff]   ;;  %v332_v5 = vld [vmem:[%s437_s1 + $0x68] sm:$0xff]  }
   0x2   :  { %v329_v2 = vld [vmem:[%s437_s1 + $0x38] sm:$0xff]   ;;  %293 = vmatprep.subr.bf16.mxu0 %v328_v0  ;;  %v331_v4 = vld [vmem:[%s437_s1 + $0x30] sm:$0xff]   ;;  %v333_v6 = vld [vmem:[%s437_s1 + $0x28] sm:$0xff]  }
   0x3   :  { %294 = vmatpush3.bf16.msra.mxu0 %v329_v2  ;;  %v334_v7 = vld [vmem:[%s437_s1 + $0x60] sm:$0xff]   ;;  %v336_v9 = vld [vmem:[%s437_s1 + $0x58] sm:$0xff]   ;;  %v342_v10 = vld [vmem:[%s437_s1 + $0x88] sm:$0xff]  }
   0x4   :  { %295 = vmatprep.subr.bf16.mxu0 %v330_v3  ;;  %v335_v8 = vld [vmem:[%s437_s1 + $0x20] sm:$0xff]   ;;  %v337_v11 = vld [vmem:[%s437_s1 + $0x18] sm:$0xff]   ;;  %v338_v12 = vld [vmem:[%s437_s1 + $0x50] sm:$0xff]   ;;  %319 = vmatpush3.bf16.msra.mxu1 %v342_v10 }
   0x5   :  { %320 = vmatprep.subr.bf16.mxu1 %v349_v1  ;;  %v345_v13 = vld [vmem:[%s437_s1 + $0x80] sm:$0xff]   ;;  %v339_v15 = vld [vmem:[%s437_s1 + $0x10] sm:$0xff]   ;;  %v348_v17 = vld [vmem:[%s438_s0 + $0x8] ss:$0 sps:$4 sm:$0xff]  }
   0x6   :  { %v15_v14 = vld [vmem:[%s438_s0] sm:$0xff]  ;;  %v340_v18 = vld [vmem:[%s437_s1 + $0x48] sm:$0xff]  }
   0x7   :  { %296 = vmatpush3.bf16.msra.mxu0 %v331_v4  ;;  %v272_v16 = vcombine.high %v15_v14, %v15_v14  ;;  %v341_v19 = vld [vmem:[%s437_s1 + $0x8] sm:$0xff]   ;;  %v343_v20 = vld [vmem:[%s437_s1 + $0x40] sm:$0xff]   ;;  %v271_v22 = vcombine.low %v15_v14, %v15_v14 }
   0x8   :  { %297 = vmatprep.subr.bf16.mxu0 %v332_v5  ;;  %321 = vmatpush3.bf16.msra.mxu1 %v345_v13  ;;  %v344_v21 = vld [vmem:[%s437_s1] sm:$0xff]  }
   0x9   :  { %214 = vmatprep.mubr.bf16.mxu0 %v272_v16  ;;  %v270_v28 = vld [vmem:[%s439_s2] ss:$0 sm:$0xff] }
   0xb   :  { %298 = vmatpush3.bf16.msra.mxu0 %v333_v6  ;;  %323 = vmatmul.mubr.msk.bf16.vlgmr.msra.gmra.mxu1 %vm178_vm1, %v348_v17 }
   0xc   :  { %299 = vmatprep.subr.bf16.mxu0 %v334_v7 }
   0xf   :  { %300 = vmatpush3.bf16.msra.mxu0 %v335_v8 }
  0x10   :  { %301 = vmatprep.subr.bf16.mxu0 %v336_v9 }
  0x13   :  { %302 = vmatpush3.bf16.msra.mxu0 %v337_v11 }
  0x14   :  { %303 = vmatprep.subr.bf16.mxu0 %v338_v12 }
  0x17   :  { %304 = vmatpush3.bf16.msra.mxu0 %v339_v15 }
  0x18   :  { %305 = vmatprep.subr.bf16.mxu0 %v340_v18 }
  0x1b   :  { %306 = vmatpush3.bf16.msra.mxu0 %v341_v19 }
  0x1c   :  { %307 = vmatprep.subr.bf16.mxu0 %v343_v20 }
  0x1f   :  { %308 = vmatpush3.bf16.msra.mxu0 %v344_v21 }
  0x22   :  { %215 = vmatmul.mubr.bf16.vlgmr.msra.gmra.mxu0 %v271_v22 }
  0xcb   :  { %v256_v23 = vpop.f32.mrf.mxu1 }
  0xcd   :  { %v324_v24 = vpop.f32.mrf.mxu1 }
  0xcf   :  { %v259_v25 = vpop.f32.mrf.mxu1 }
  0xd1   :  { %v325_v26 = vpop.f32.mrf.mxu1 }
  0xe2   :  { %v309_v27 = vpop.f32.mrf.mxu0 }
  0xe4   :  { %v310_v29 = vpop.f32.mrf.mxu0 }
  0xe5   :  { %v311_v30 = vadd.f32 %v310_v29, %v309_v27 }
  0xe6   :  { %v312_v31 = vpop.f32.mrf.mxu0 }
  0xe7   :  { %v217_v32 = vadd.f32 %v311_v30, %v270_v28 }
  0xe8   :  { %v313_v33 = vpop.f32.mrf.mxu0 }
  0xe9   :  { %v257_v34 = vadd.f32 %v256_v23, %v217_v32 }
  0xeb   :  { %v262_v35 = vmax.f32 %v257_v34, 0.0 }
  0xed   :  { %v263_v36 = vpack.c.bf16 %v262_v35, %v262_v35 }
  0xef   :  { %265 = vst.msk [vmem:[%s440_s3] sm:$0xf] %vm264_vm2, %v263_v36 }

// kernel: backbone_forward.17
= control target key start
LH: loop header
LB: loop body
LE: loop exit
PB: predicated region body
PF: predicated region fallthrough
CT: control target
= control target key end

     0   :  { %v705_v0 = vmov 0.0   ;;  %vm706_vm0 = vmmov 0   ;;  %vm116_vm1 = vcmask 261120   ;;  %vm393_vm2 = vcmask 523264   ;;  %s887_s4 = inlined_call_operand.vmem [shape: bf16[32,64], index: 4, kind: input, shape index: {}]   ;;  %s888_s1 = inlined_call_operand.vmem [shape: bf16[576,64], index: 1, kind: input, shape index: {}]   ;;  %s889_s3 = inlined_call_operand.vmem [shape: bf16[8,32], index: 3, kind: input, shape index: {}]   ;;  %s890_s0 = inlined_call_operand.vmem [shape: bf16[8,576], index: 0, kind: input, shape index: {}]   ;;  %s891_s2 = inlined_call_operand.vmem [shape: f32[1,64], index: 2, kind: input, shape index: {}]   ;;  %s892_s5 = inlined_call_operand.vmem [shape: f32[1,64], index: 5, kind: input, shape index: {}]   ;;  %s893_s6 = inlined_call_operand.vmem [shape: bf16[8,64], index: 6, kind: output, shape index: {}]  }
   0x1   :  { %640 = vmatprep.subr.bf16.mxu0 %v705_v0  ;;  %v662_v1 = vld [vmem:[%s887_s4 + $0x8] sm:$0xff]   ;;  %644 = vmatprep.mubr.msk.bf16.mxu0 %vm706_vm0, %v705_v0  ;;  %v663_v2 = vld [vmem:[%s888_s1 + $0x78] sm:$0xff]   ;;  %v665_v4 = vld [vmem:[%s887_s4] sm:$0xff]   ;;  %vm535_vm3 = vcmask 519168  }
   0x2   :  { %641 = vmatpush3.bf16.msra.mxu0 %v662_v1  ;;  %v664_v3 = vld [vmem:[%s888_s1 + $0x38] sm:$0xff]   ;;  %591 = vmatprep.subr.bf16.mxu1 %v663_v2  ;;  %v666_v5 = vld [vmem:[%s888_s1 + $0x70] sm:$0xff]   ;;  %v99_v7 = vld [vmem:[%s889_s3] sm:$0xf] }
   0x3   :  { %642 = vmatprep.subr.bf16.mxu0 %v705_v0  ;;  %592 = vmatpush3.bf16.msra.mxu1 %v664_v3  ;;  %v667_v6 = vld [vmem:[%s888_s1 + $0x30] sm:$0xff]   ;;  %v668_v8 = vld [vmem:[%s888_s1 + $0xf8] sm:$0xff]   ;;  %v669_v9 = vld [vmem:[%s888_s1 + $0x68] sm:$0xff]  }
   0x4   :  { %593 = vmatprep.subr.bf16.mxu1 %v666_v5  ;;  %v670_v10 = vld [vmem:[%s888_s1 + $0xb8] sm:$0xff]   ;;  %v671_v11 = vld [vmem:[%s888_s1 + $0x28] sm:$0xff]   ;;  %v672_v12 = vld [vmem:[%s888_s1 + $0xf0] sm:$0xff]  }
   0x5   :  { %v673_v13 = vld [vmem:[%s888_s1 + $0x60] sm:$0xff]   ;;  %v674_v14 = vld [vmem:[%s888_s1 + $0xb0] sm:$0xff]   ;;  %v676_v16 = vld [vmem:[%s888_s1 + $0xe8] sm:$0xff]  }
   0x6   :  { %643 = vmatpush3.bf16.msra.mxu0 %v665_v4  ;;  %v675_v15 = vld [vmem:[%s888_s1 + $0x20] sm:$0xff]   ;;  %v677_v17 = vld [vmem:[%s888_s1 + $0x58] sm:$0xff]   ;;  %v678_v18 = vld [vmem:[%s888_s1 + $0xa8] sm:$0xff]  }
   0x7   :  { %594 = vmatpush3.bf16.msra.mxu1 %v667_v6  ;;  %613 = vmatprep.subr.bf16.mxu0 %v668_v8  ;;  %v679_v19 = vld [vmem:[%s888_s1 + $0x18] sm:$0xff]   ;;  %v680_v20 = vld [vmem:[%s888_s1 + $0xe0] sm:$0xff]   ;;  %v681_v21 = vld [vmem:[%s888_s1 + $0x50] sm:$0xff]  }
   0x8   :  { %595 = vmatprep.subr.bf16.mxu1 %v669_v9  ;;  %v682_v22 = vld [vmem:[%s888_s1 + $0xa0] sm:$0xff]   ;;  %v683_v23 = vld [vmem:[%s888_s1 + $0x10] sm:$0xff]   ;;  %v684_v24 = vld [vmem:[%s888_s1 + $0xd8] sm:$0xff]  }
   0x9   :  { %645 = vmatmul.mubr.msk.bf16.vlgmr.msra.gmra.mxu0 %vm116_vm1, %v99_v7  ;;  %v685_v25 = vld [vmem:[%s888_s1 + $0x48] sm:$0xff]   ;;  %v686_v26 = vld [vmem:[%s888_s1 + $0x98] sm:$0xff]   ;;  %v688_v28 = vld [vmem:[%s888_s1 + $0xd0] sm:$0xff]  }
   0xa   :  { %614 = vmatpush3.bf16.msra.mxu0 %v670_v10  ;;  %v687_v27 = vld [vmem:[%s888_s1 + $0x8] sm:$0xff]   ;;  %v689_v29 = vld [vmem:[%s888_s1 + $0x40] sm:$0xff]   ;;  %v690_v30 = vld [vmem:[%s888_s1 + $0x90] sm:$0xff]  }
   0xb   :  { %596 = vmatpush3.bf16.msra.mxu1 %v671_v11  ;;  %615 = vmatprep.subr.bf16.mxu0 %v672_v12  ;;  %v691_v31 = vld [vmem:[%s888_s1] sm:$0xff]   ;;  %v695_v35 = vld [vmem:[%s888_s1 + $0xc8] sm:$0xff]   ;;  %v697_v37 = vld [vmem:[%s888_s1 + $0x118] sm:$0xff]  }
   0xc   :  { %597 = vmatprep.subr.bf16.mxu1 %v673_v13  ;;  %v24_v32 = vld [vmem:[%s890_s0] sm:$0xff]  ;;  %v696_v36 = vld [vmem:[%s888_s1 + $0x88] sm:$0xff]   ;;  %v700_v40 = vld [vmem:[%s888_s1 + $0x110] sm:$0xff]  }
   0xd   :  { %v544_v33 = vcombine.low %v24_v32, %v24_v32  ;;  %v545_v34 = vcombine.high %v24_v32, %v24_v32  ;;  %v698_v38 = vld [vmem:[%s888_s1 + $0xc0] sm:$0xff]   ;;  %v25_v41 = vld [vmem:[%s890_s0 + $0x8] sm:$0xff]  ;;  %v694_v46 = vld [vmem:[%s890_s0 + $0x10] ss:$0 sps:$4 sm:$0xff]  }
   0xe   :  { %616 = vmatpush3.bf16.msra.mxu0 %v674_v14  ;;  %v699_v39 = vld [vmem:[%s888_s1 + $0x80] sm:$0xff]   ;;  %v546_v42 = vcombine.low %v25_v41, %v25_v41  ;;  %v547_v43 = vcombine.high %v25_v41, %v25_v41  ;;  %v703_v44 = vld [vmem:[%s888_s1 + $0x108] sm:$0xff]  }
   0xf   :  { %598 = vmatpush3.bf16.msra.mxu1 %v675_v15  ;;  %617 = vmatprep.subr.bf16.mxu0 %v676_v16  ;;  %v704_v45 = vld [vmem:[%s888_s1 + $0x100] sm:$0xff]  }
  0x10   :  { %599 = vmatprep.subr.bf16.mxu1 %v677_v17  ;;  %429 = vmatprep.mubr.bf16.mxu1 %v545_v34  ;;  %v587_v2 = vld [vmem:[%s892_s5] ss:$0 sm:$0xff] }
  0x11   :  { %469 = vmatprep.mubr.bf16.mxu0 %v547_v43 }
  0x12   :  { %618 = vmatpush3.bf16.msra.mxu0 %v678_v18 }
  0x13   :  { %600 = vmatpush3.bf16.msra.mxu1 %v679_v19  ;;  %619 = vmatprep.subr.bf16.mxu0 %v680_v20 }
  0x14   :  { %601 = vmatprep.subr.bf16.mxu1 %v681_v21 }
  0x16   :  { %620 = vmatpush3.bf16.msra.mxu0 %v682_v22 }
  0x17   :  { %602 = vmatpush3.bf16.msra.mxu1 %v683_v23  ;;  %621 = vmatprep.subr.bf16.mxu0 %v684_v24 }
  0x18   :  { %603 = vmatprep.subr.bf16.mxu1 %v685_v25 }
  0x1a   :  { %622 = vmatpush3.bf16.msra.mxu0 %v686_v26 }
  0x1b   :  { %604 = vmatpush3.bf16.msra.mxu1 %v687_v27  ;;  %623 = vmatprep.subr.bf16.mxu0 %v688_v28 }
  0x1c   :  { %605 = vmatprep.subr.bf16.mxu1 %v689_v29 }
  0x1e   :  { %624 = vmatpush3.bf16.msra.mxu0 %v690_v30 }
  0x1f   :  { %606 = vmatpush3.bf16.msra.mxu1 %v691_v31  ;;  %625 = vmatprep.subr.bf16.mxu0 %v695_v35 }
  0x20   :  { %648 = vmatprep.subr.bf16.mxu1 %v705_v0 }
  0x22   :  { %430 = vmatmul.mubr.bf16.vlgmr.msra.gmra.mxu1 %v544_v33  ;;  %626 = vmatpush3.bf16.msra.mxu0 %v696_v36 }
  0x23   :  { %649 = vmatpush3.bf16.msra.mxu1 %v697_v37  ;;  %656 = vmatprep.mubr.msk.bf16.mxu1 %vm706_vm0, %v705_v0 }
  0x24   :  { %627 = vmatprep.subr.bf16.mxu0 %v698_v38  ;;  %650 = vmatprep.subr.bf16.mxu1 %v705_v0 }
  0x26   :  { %628 = vmatpush3.bf16.msra.mxu0 %v699_v39 }
  0x27   :  { %651 = vmatpush3.bf16.msra.mxu1 %v700_v40 }
  0x28   :  { %652 = vmatprep.subr.bf16.mxu1 %v705_v0 }
  0x29   :  { %470 = vmatmul.mubr.bf16.vlgmr.msra.gmra.mxu0 %v546_v42 }
  0x2b   :  { %653 = vmatpush3.bf16.msra.mxu1 %v703_v44 }
  0x2c   :  { %654 = vmatprep.subr.bf16.mxu1 %v705_v0  ;;  %v586_v0 = vld [vmem:[%s891_s2] ss:$0 sm:$0xff] }
  0x2f   :  { %655 = vmatpush3.bf16.msra.mxu1 %v704_v45 }
  0x32   :  { %657 = vmatmul.mubr.msk.bf16.vlgmr.msra.gmra.mxu1 %vm393_vm2, %v694_v46 }
  0xc9   :  { %v154_v47 = vpop.f32.mrf.mxu0 }
  0xcb   :  { %v646_v48 = vpop.f32.mrf.mxu0 }
  0xcd   :  { %v157_v49 = vpop.f32.mrf.mxu0 }
  0xcf   :  { %v647_v50 = vpop.f32.mrf.mxu0 }
  0xe2   :  { %v607_v51 = vpop.f32.mrf.mxu1 }
  0xe4   :  { %v608_v52 = vpop.f32.mrf.mxu1 }
  0xe5   :  { %v609_v56 = vadd.f32 %v608_v52, %v607_v51 }
  0xe6   :  { %v610_v53 = vpop.f32.mrf.mxu1 }
  0xe7   :  { %v432_v60 = vadd.f32 %v609_v56, %v154_v47 }
  0xe8   :  { %v611_v54 = vpop.f32.mrf.mxu1 }
  0xe9   :  { %v629_v55 = vpop.f32.mrf.mxu0 }
  0xeb   :  { %v630_v57 = vpop.f32.mrf.mxu0 }
  0xec   :  { %v631_v58 = vadd.f32 %v630_v57, %v629_v55 }
  0xed   :  { %v632_v59 = vpop.f32.mrf.mxu0 }
  0xee   :  { %v472_v62 = vadd.f32 %v631_v58, %v432_v60 }
  0xef   :  { %v633_v61 = vpop.f32.mrf.mxu0 }
  0xf2   :  { %v511_v63 = vpop.f32.mrf.mxu1 }
  0xf3   :  { %v512_v1 = vadd.f32 %v511_v63, %v472_v62 }
  0xf4   :  { %v658_v3 = vpop.f32.mrf.mxu1 }
  0xf5   :  { %v524_v4 = vadd.f32 %v586_v0, %v512_v1 }
  0xf6   :  { %v514_v5 = vpop.f32.mrf.mxu1 }
  0xf7   :  { %v532_v6 = vadd.f32 %v587_v2, %v524_v4 }
  0xf8   :  { %v659_v7 = vpop.f32.mrf.mxu1 }
  0xf9   :  { %v533_v8 = vmax.f32 %v532_v6, 0.0 }
  0xfb   :  { %v534_v9 = vpack.c.bf16 %v533_v8, %v533_v8 }
  0xfd   :  { %536 = vst.msk [vmem:[%s893_s6] sm:$0xf] %vm535_vm3, %v534_v9 }

// kernel: backbone_forward.18
= control target key start
LH: loop header
LB: loop body
LE: loop exit
PB: predicated region body
PF: predicated region fallthrough
CT: control target
= control target key end

     0   :  { %v625_v21 = vmov 1966171168   ;;  %v100_v23 = vlaneseq  ;;  %v626_v40 = vmov 0.0   ;;  %vm627_vm0 = vmmov 0   ;;  %s765_s1 = inlined_call_operand.vmem [shape: bf16[576,128], index: 1, kind: input, shape index: {}]   ;;  %s766_s0 = inlined_call_operand.vmem [shape: bf16[2,576], index: 0, kind: input, shape index: {}]   ;;  %s767_s2 = inlined_call_operand.vmem [shape: f32[1,128], index: 2, kind: input, shape index: {}]   ;;  %s768_s3 = inlined_call_operand.vmem [shape: bf16[2,128], index: 3, kind: output, shape index: {}]  }
   0x1   :  { %v588_v0 = vld [vmem:[%s765_s1 + $0x78] sm:$0xff]   ;;  %v592_v4 = vld [vmem:[%s765_s1 + $0x70] sm:$0xff]   ;;  %v596_v8 = vld [vmem:[%s765_s1 + $0x68] sm:$0xff]   ;;  %v98_v22 = vunpack.c.l.s4 %v625_v21  ;;  %vm355_vm1 = vcmask 523264  }
   0x2   :  { %v589_v1 = vld [vmem:[%s765_s1 + $0x38] sm:$0xff]   ;;  %524 = vmatprep.subr.bf16.mxu0 %v588_v0  ;;  %v593_v5 = vld [vmem:[%s765_s1 + $0x30] sm:$0xff]   ;;  %v597_v9 = vld [vmem:[%s765_s1 + $0x28] sm:$0xff]   ;;  %v101_v29 = vshrl.u32 %v100_v23, 7 }
   0x3   :  { %v590_v2 = vld [vmem:[%s765_s1 + $0xf8] sm:$0xff]   ;;  %525 = vmatpush3.bf16.msra.mxu0 %v589_v1  ;;  %v594_v6 = vld [vmem:[%s765_s1 + $0xf0] sm:$0xff]   ;;  %v598_v10 = vld [vmem:[%s765_s1 + $0xe8] sm:$0xff]   ;;  %v99_v28 = vunpack.c.0.s8 %v98_v22 }
   0x4   :  { %v591_v3 = vld [vmem:[%s765_s1 + $0xb8] sm:$0xff]   ;;  %546 = vmatprep.subr.bf16.mxu1 %v590_v2  ;;  %526 = vmatprep.subr.bf16.mxu0 %v592_v4  ;;  %v595_v7 = vld [vmem:[%s765_s1 + $0xb0] sm:$0xff]   ;;  %v599_v11 = vld [vmem:[%s765_s1 + $0xa8] sm:$0xff]  }
   0x5   :  { %547 = vmatpush3.bf16.msra.mxu1 %v591_v3  ;;  %v600_v12 = vld [vmem:[%s765_s1 + $0x60] sm:$0xff]   ;;  %v604_v16 = vld [vmem:[%s765_s1 + $0x58] sm:$0xff]   ;;  %v608_v20 = vld [vmem:[%s765_s1 + $0x50] sm:$0xff]   ;;  %v102_v34 = vsub.s32 %v99_v28, %v101_v29 }
   0x6   :  { %548 = vmatprep.subr.bf16.mxu1 %v594_v6  ;;  %v601_v13 = vld [vmem:[%s765_s1 + $0x20] sm:$0xff]   ;;  %v605_v17 = vld [vmem:[%s765_s1 + $0x18] sm:$0xff]   ;;  %v609_v24 = vld [vmem:[%s765_s1 + $0x10] sm:$0xff]  }
   0x7   :  { %527 = vmatpush3.bf16.msra.mxu0 %v593_v5  ;;  %v602_v14 = vld [vmem:[%s765_s1 + $0xe0] sm:$0xff]   ;;  %v606_v18 = vld [vmem:[%s765_s1 + $0xd8] sm:$0xff]   ;;  %v610_v25 = vld [vmem:[%s765_s1 + $0xd0] sm:$0xff]  }
   0x8   :  { %528 = vmatprep.subr.bf16.mxu0 %v596_v8  ;;  %v603_v15 = vld [vmem:[%s765_s1 + $0xa0] sm:$0xff]   ;;  %v607_v19 = vld [vmem:[%s765_s1 + $0x98] sm:$0xff]   ;;  %v611_v26 = vld [vmem:[%s765_s1 + $0x90] sm:$0xff]  }
   0x9   :  { %549 = vmatpush3.bf16.msra.mxu1 %v595_v7  ;;  %v612_v27 = vld [vmem:[%s765_s1 + $0x48] sm:$0xff]   ;;  %v616_v33 = vld [vmem:[%s765_s1 + $0x40] sm:$0xff]   ;;  %v621_v44 = vld [vmem:[%s765_s1 + $0x118] sm:$0xff]  }
   0xa   :  { %550 = vmatprep.subr.bf16.mxu1 %v598_v10  ;;  %v613_v30 = vld [vmem:[%s765_s1 + $0x8] sm:$0xff]   ;;  %v617_v35 = vld [vmem:[%s765_s1] sm:$0xff]   ;;  %v622_v47 = vld [vmem:[%s765_s1 + $0x110] sm:$0xff]  }
   0xb   :  { %529 = vmatpush3.bf16.msra.mxu0 %v597_v9  ;;  %v614_v31 = vld [vmem:[%s765_s1 + $0xc8] sm:$0xff]   ;;  %v618_v36 = vld [vmem:[%s765_s1 + $0xc0] sm:$0xff]  }
   0xc   :  { %530 = vmatprep.subr.bf16.mxu0 %v600_v12  ;;  %v615_v32 = vld [vmem:[%s765_s1 + $0x88] sm:$0xff]   ;;  %v15_v37 = vld [vmem:[%s766_s0] sm:$0x1f] }
   0xd   :  { %551 = vmatpush3.bf16.msra.mxu1 %v599_v11  ;;  %v103_v38 = vrot.slane %v15_v37, %v102_v34  ;;  %v620_v39 = vld [vmem:[%s765_s1 + $0x80] sm:$0xff]   ;;  %v96_v48 = vcombine.high %v15_v37, %v15_v37  ;;  %v623_v49 = vld [vmem:[%s765_s1 + $0x108] sm:$0xff]  }
   0xe   :  { %552 = vmatprep.subr.bf16.mxu1 %v602_v14  ;;  %v624_v51 = vld [vmem:[%s765_s1 + $0x100] sm:$0xff]  }
   0xf   :  { %531 = vmatpush3.bf16.msra.mxu0 %v601_v13  ;;  %v111_v41 = vcombine.high %v103_v38, %v103_v38  ;;  %v118_v42 = vrot.slane %v103_v38, %v102_v34  ;;  %v110_v50 = vrot.slane %v96_v48, %v102_v34  ;;  %v486_v61 = vld [vmem:[%s767_s2] ss:$0 sm:$0xff] }
  0x10   :  { %532 = vmatprep.subr.bf16.mxu0 %v604_v16 }
  0x11   :  { %553 = vmatpush3.bf16.msra.mxu1 %v603_v15  ;;  %v132_v43 = vrot.slane %v111_v41, %v102_v34  ;;  %v133_v45 = vcombine.high %v118_v42, %v118_v42  ;;  %v125_v52 = vrot.slane %v110_v50, %v102_v34 }
  0x12   :  { %554 = vmatprep.subr.bf16.mxu1 %v606_v18 }
  0x13   :  { %533 = vmatpush3.bf16.msra.mxu0 %v605_v17  ;;  %391 = vmatprep.mubr.bf16.mxu0 %v132_v43  ;;  %v134_v46 = vcombine.high %v132_v43, %v132_v43 }
  0x14   :  { %534 = vmatprep.subr.bf16.mxu0 %v608_v20 }
  0x15   :  { %555 = vmatpush3.bf16.msra.mxu1 %v607_v19  ;;  %431 = vmatprep.mubr.bf16.mxu1 %v134_v46 }
  0x16   :  { %556 = vmatprep.subr.bf16.mxu1 %v610_v25 }
  0x17   :  { %535 = vmatpush3.bf16.msra.mxu0 %v609_v24 }
  0x18   :  { %536 = vmatprep.subr.bf16.mxu0 %v612_v27 }
  0x19   :  { %557 = vmatpush3.bf16.msra.mxu1 %v611_v26 }
  0x1a   :  { %558 = vmatprep.subr.bf16.mxu1 %v614_v31 }
  0x1b   :  { %537 = vmatpush3.bf16.msra.mxu0 %v613_v30 }
  0x1c   :  { %538 = vmatprep.subr.bf16.mxu0 %v616_v33 }
  0x1d   :  { %559 = vmatpush3.bf16.msra.mxu1 %v615_v32 }
  0x1e   :  { %560 = vmatprep.subr.bf16.mxu1 %v618_v36 }
  0x1f   :  { %539 = vmatpush3.bf16.msra.mxu0 %v617_v35 }
  0x20   :  { %573 = vmatprep.subr.bf16.mxu0 %v626_v40 }
  0x21   :  { %561 = vmatpush3.bf16.msra.mxu1 %v620_v39 }
  0x22   :  { %392 = vmatmul.mubr.bf16.vlgmr.msra.gmra.mxu0 %v118_v42 }
  0x23   :  { %574 = vmatpush3.bf16.msra.mxu0 %v621_v44  ;;  %581 = vmatprep.mubr.msk.bf16.mxu0 %vm627_vm0, %v626_v40 }
  0x24   :  { %432 = vmatmul.mubr.bf16.vlgmr.msra.gmra.mxu1 %v133_v45  ;;  %575 = vmatprep.subr.bf16.mxu0 %v626_v40 }
  0x27   :  { %576 = vmatpush3.bf16.msra.mxu0 %v622_v47 }
  0x28   :  { %577 = vmatprep.subr.bf16.mxu0 %v626_v40 }
  0x2b   :  { %578 = vmatpush3.bf16.msra.mxu0 %v623_v49 }
  0x2c   :  { %579 = vmatprep.subr.bf16.mxu0 %v626_v40 }
  0x2f   :  { %580 = vmatpush3.bf16.msra.mxu0 %v624_v51 }
  0x32   :  { %582 = vmatmul.mubr.msk.bf16.vlgmr.msra.gmra.mxu0 %vm355_vm1, %v125_v52 }
  0xe2   :  { %v540_v53 = vpop.f32.mrf.mxu0 }
  0xe4   :  { %v541_v54 = vpop.f32.mrf.mxu0  ;;  %v562_v55 = vpop.f32.mrf.mxu1 }
  0xe5   :  { %v542_v60 = vadd.f32 %v541_v54, %v540_v53 }
  0xe6   :  { %v543_v56 = vpop.f32.mrf.mxu0  ;;  %v563_v57 = vpop.f32.mrf.mxu1 }
  0xe7   :  { %v394_v63 = vadd.f32 %v542_v60, %v486_v61  ;;  %v564_v0 = vadd.f32 %v563_v57, %v562_v55 }
  0xe8   :  { %v544_v58 = vpop.f32.mrf.mxu0  ;;  %v565_v59 = vpop.f32.mrf.mxu1 }
  0xe9   :  { %v434_v1 = vadd.f32 %v564_v0, %v394_v63 }
  0xea   :  { %v566_v62 = vpop.f32.mrf.mxu1 }
  0xf2   :  { %v473_v2 = vpop.f32.mrf.mxu0 }
  0xf3   :  { %v474_v3 = vadd.f32 %v473_v2, %v434_v1 }
  0xf4   :  { %v583_v4 = vpop.f32.mrf.mxu0 }
  0xf5   :  { %v479_v5 = vmax.f32 %v474_v3, 0.0 }
  0xf6   :  { %v476_v6 = vpop.f32.mrf.mxu0 }
  0xf7   :  { %v480_v7 = vpack.c.bf16 %v479_v5, %v479_v5 }
  0xf8   :  { %v584_v8 = vpop.f32.mrf.mxu0 }
  0xf9   :  { %481 = vst [vmem:[%s768_s3] sm:$0x1] %v480_v7 }

// kernel: backbone_forward.19
= control target key start
LH: loop header
LB: loop body
LE: loop exit
PB: predicated region body
PF: predicated region fallthrough
CT: control target
= control target key end

     0   :  { %v1270_v0 = vmov 0.0   ;;  %vm1271_vm0 = vmmov 0   ;;  %vm203_vm1 = vcmask 523264   ;;  %v1272_v19 = vmov 1966171168   ;;  %s1584_s4 = inlined_call_operand.vmem [shape: bf16[64,128], index: 4, kind: input, shape index: {}]   ;;  %s1585_s1 = inlined_call_operand.vmem [shape: bf16[1152,128], index: 1, kind: input, shape index: {}]   ;;  %s1586_s3 = inlined_call_operand.vmem [shape: bf16[2,64], index: 3, kind: input, shape index: {}]   ;;  %s1587_s0 = inlined_call_operand.vmem [shape: bf16[2,1152], index: 0, kind: input, shape index: {}]   ;;  %s1588_s2 = inlined_call_operand.vmem [shape: f32[1,128], index: 2, kind: input, shape index: {}]   ;;  %s1589_s5 = inlined_call_operand.vmem [shape: f32[1,128], index: 5, kind: input, shape index: {}]   ;;  %s1590_s6 = inlined_call_operand.vmem [shape: bf16[2,128], index: 6, kind: output, shape index: {}]  }
   0x1   :  { %1158 = vmatprep.subr.bf16.mxu0 %v1270_v0  ;;  %v1193_v1 = vld [vmem:[%s1584_s4 + $0x18] sm:$0xff]   ;;  %1166 = vmatprep.mubr.msk.bf16.mxu0 %vm1271_vm0, %v1270_v0  ;;  %v1196_v4 = vld [vmem:[%s1584_s4 + $0x10] sm:$0xff]   ;;  %v1199_v7 = vld [vmem:[%s1584_s4 + $0x8] sm:$0xff]   ;;  %v251_v20 = vunpack.c.l.s4 %v1272_v19  ;;  %v253_v21 = vlaneseq }
   0x2   :  { %v1194_v2 = vld [vmem:[%s1585_s1 + $0x78] sm:$0xff]   ;;  %1159 = vmatpush3.bf16.msra.mxu0 %v1193_v1  ;;  %v1197_v5 = vld [vmem:[%s1585_s1 + $0x70] sm:$0xff]   ;;  %v1200_v8 = vld [vmem:[%s1585_s1 + $0x68] sm:$0xff]  }
   0x3   :  { %v1195_v3 = vld [vmem:[%s1585_s1 + $0x38] sm:$0xff]   ;;  %1061 = vmatprep.subr.bf16.mxu1 %v1194_v2  ;;  %1160 = vmatprep.subr.bf16.mxu0 %v1270_v0  ;;  %v1198_v6 = vld [vmem:[%s1585_s1 + $0x30] sm:$0xff]   ;;  %v1201_v9 = vld [vmem:[%s1585_s1 + $0x28] sm:$0xff]   ;;  %v252_v26 = vunpack.c.0.s8 %v251_v20  ;;  %v254_v27 = vshrl.u32 %v253_v21, 7 }
   0x4   :  { %1062 = vmatpush3.bf16.msra.mxu1 %v1195_v3  ;;  %v1202_v10 = vld [vmem:[%s1584_s4] sm:$0xff]   ;;  %v1205_v13 = vld [vmem:[%s1585_s1 + $0xf8] sm:$0xff]   ;;  %v1209_v18 = vld [vmem:[%s1585_s1 + $0xf0] sm:$0xff]  }
   0x5   :  { %1063 = vmatprep.subr.bf16.mxu1 %v1197_v5  ;;  %v1203_v11 = vld [vmem:[%s1585_s1 + $0x60] sm:$0xff]   ;;  %v1206_v15 = vld [vmem:[%s1585_s1 + $0x58] sm:$0xff]   ;;  %v1210_v22 = vld [vmem:[%s1585_s1 + $0x50] sm:$0xff]   ;;  %v1392_v32 = vsub.s32 %v252_v26, %v254_v27 }
   0x6   :  { %1161 = vmatpush3.bf16.msra.mxu0 %v1196_v4  ;;  %v1204_v12 = vld [vmem:[%s1585_s1 + $0x20] sm:$0xff]   ;;  %v1207_v16 = vld [vmem:[%s1585_s1 + $0xb8] sm:$0xff]   ;;  %v1211_v23 = vld [vmem:[%s1585_s1 + $0xb0] sm:$0xff]  }
   0x7   :  { %1162 = vmatprep.subr.bf16.mxu0 %v1270_v0  ;;  %v170_v14 = vld [vmem:[%s1586_s3] sm:$0x1]  ;;  %v1208_v17 = vld [vmem:[%s1585_s1 + $0x18] sm:$0xff]   ;;  %v1212_v24 = vld [vmem:[%s1585_s1 + $0x10] sm:$0xff]  }
   0x8   :  { %1064 = vmatpush3.bf16.msra.mxu1 %v1198_v6  ;;  %v1213_v25 = vld [vmem:[%s1585_s1 + $0xe8] sm:$0xff]   ;;  %v1217_v31 = vld [vmem:[%s1585_s1 + $0xe0] sm:$0xff]   ;;  %v1222_v39 = vld [vmem:[%s1585_s1 + $0xd8] sm:$0xff]  }
   0x9   :  { %1065 = vmatprep.subr.bf16.mxu1 %v1200_v8  ;;  %v1214_v28 = vld [vmem:[%s1585_s1 + $0x48] sm:$0xff]   ;;  %v1218_v33 = vld [vmem:[%s1585_s1 + $0x40] sm:$0xff]   ;;  %v1223_v40 = vld [vmem:[%s1585_s1 + $0x98] sm:$0xff]  }
   0xa   :  { %1163 = vmatpush3.bf16.msra.mxu0 %v1199_v7  ;;  %v1215_v29 = vld [vmem:[%s1585_s1 + $0xa8] sm:$0xff]   ;;  %v1219_v34 = vld [vmem:[%s1585_s1 + $0xa0] sm:$0xff]   ;;  %v1224_v42 = vld [vmem:[%s1585_s1 + $0x178] sm:$0xff]  }
   0xb   :  { %1164 = vmatprep.subr.bf16.mxu0 %v1270_v0  ;;  %v1216_v30 = vld [vmem:[%s1585_s1 + $0x8] sm:$0xff]   ;;  %v1220_v35 = vld [vmem:[%s1585_s1] sm:$0xff]   ;;  %v1225_v45 = vld [vmem:[%s1585_s1 + $0x138] sm:$0xff]  }
   0xc   :  { %1066 = vmatpush3.bf16.msra.mxu1 %v1201_v9  ;;  %v24_v36 = vld [vmem:[%s1587_s0] sm:$0xff]  ;;  %v1226_v47 = vld [vmem:[%s1585_s1 + $0xd0] sm:$0xff]   ;;  %v1230_v54 = vld [vmem:[%s1585_s1 + $0xc8] sm:$0xff]  }
   0xd   :  { %1067 = vmatprep.subr.bf16.mxu1 %v1203_v11  ;;  %v249_v37 = vcombine.high %v24_v36, %v24_v36  ;;  %v256_v38 = vrot.slane %v24_v36, %v1392_v32  ;;  %v1227_v49 = vld [vmem:[%s1585_s1 + $0x90] sm:$0xff]   ;;  %v1231_v55 = vld [vmem:[%s1585_s1 + $0x88] sm:$0xff]   ;;  %v1234_v58 = vld [vmem:[%s1585_s1 + $0xc0] sm:$0xff]  }
   0xe   :  { %1165 = vmatpush3.bf16.msra.mxu0 %v1202_v10  ;;  %v1228_v51 = vld [vmem:[%s1585_s1 + $0x170] sm:$0xff]   ;;  %v1232_v56 = vld [vmem:[%s1585_s1 + $0x168] sm:$0xff]   ;;  %v1235_v59 = vld [vmem:[%s1585_s1 + $0x80] sm:$0xff]  }
   0xf   :  { %1083 = vmatprep.subr.bf16.mxu0 %v1205_v13  ;;  %v264_v41 = vcombine.high %v256_v38, %v256_v38  ;;  %v1417_v43 = vrot.slane %v249_v37, %v1392_v32  ;;  %v272_v44 = vrot.slane %v256_v38, %v1392_v32  ;;  %v1229_v53 = vld [vmem:[%s1585_s1 + $0x130] sm:$0xff]   ;;  %v1233_v57 = vld [vmem:[%s1585_s1 + $0x128] sm:$0xff]   ;;  %v1236_v60 = vld [vmem:[%s1585_s1 + $0x160] sm:$0xff]  }
  0x10   :  { %1068 = vmatpush3.bf16.msra.mxu1 %v1204_v12  ;;  %v1237_v61 = vld [vmem:[%s1585_s1 + $0x120] sm:$0xff]   ;;  %v1238_v63 = vld [vmem:[%s1585_s1 + $0x1f8] sm:$0xff]   ;;  %v1242_v5 = vld [vmem:[%s1585_s1 + $0x1f0] sm:$0xff]  }
  0x11   :  { %1167 = vmatmul.mubr.msk.bf16.vlgmr.msra.gmra.mxu0 %vm203_vm1, %v170_v14  ;;  %1069 = vmatprep.subr.bf16.mxu1 %v1206_v15  ;;  %v286_v46 = vrot.slane %v264_v41, %v1392_v32  ;;  %v265_v48 = vcombine.high %v1417_v43, %v1417_v43  ;;  %v294_v62 = vcombine.high %v272_v44, %v272_v44  ;;  %v1239_v1 = vld [vmem:[%s1585_s1 + $0x158] sm:$0xff]   ;;  %v1243_v6 = vld [vmem:[%s1585_s1 + $0x150] sm:$0xff]   ;;  %v1246_v9 = vld [vmem:[%s1585_s1 + $0x1e8] sm:$0xff]  }
  0x12   :  { %1084 = vmatpush3.bf16.msra.mxu0 %v1207_v16  ;;  %v1240_v2 = vld [vmem:[%s1585_s1 + $0x1b8] sm:$0xff]   ;;  %v1244_v7 = vld [vmem:[%s1585_s1 + $0x1b0] sm:$0xff]   ;;  %v1247_v10 = vld [vmem:[%s1585_s1 + $0x148] sm:$0xff]   ;;  %v279_v19 = vrot.slane %v1417_v43, %v1392_v32 }
  0x13   :  { %1085 = vmatprep.subr.bf16.mxu0 %v1209_v18  ;;  %v296_v50 = vcombine.high %v286_v46, %v286_v46  ;;  %785 = vmatprep.mubr.bf16.mxu1 %v286_v46  ;;  %v293_v52 = vrot.slane %v265_v48, %v1392_v32  ;;  %v1241_v4 = vld [vmem:[%s1585_s1 + $0x118] sm:$0xff]   ;;  %v1245_v8 = vld [vmem:[%s1585_s1 + $0x110] sm:$0xff]   ;;  %v1248_v11 = vld [vmem:[%s1585_s1 + $0x1a8] sm:$0xff]  }
  0x14   :  { %1070 = vmatpush3.bf16.msra.mxu1 %v1208_v17  ;;  %v1249_v12 = vld [vmem:[%s1585_s1 + $0x108] sm:$0xff]   ;;  %v1250_v13 = vld [vmem:[%s1585_s1 + $0x1e0] sm:$0xff]   ;;  %v1254_v17 = vld [vmem:[%s1585_s1 + $0x1d8] sm:$0xff]  }
  0x15   :  { %1071 = vmatprep.subr.bf16.mxu1 %v1210_v22  ;;  %825 = vmatprep.mubr.bf16.mxu0 %v296_v50  ;;  %v297_v3 = vcombine.high %v293_v52, %v293_v52  ;;  %v1251_v14 = vld [vmem:[%s1585_s1 + $0x140] sm:$0xff]   ;;  %v1255_v18 = vld [vmem:[%s1585_s1 + $0x198] sm:$0xff]   ;;  %v1257_v20 = vld [vmem:[%s1585_s1 + $0x1d0] sm:$0xff]  }
  0x16   :  { %1086 = vmatpush3.bf16.msra.mxu0 %v1211_v23  ;;  %v1252_v15 = vld [vmem:[%s1585_s1 + $0x1a0] sm:$0xff]   ;;  %v1256_v21 = vld [vmem:[%s1585_s1 + $0x238] sm:$0xff]   ;;  %v1258_v22 = vld [vmem:[%s1585_s1 + $0x190] sm:$0xff]  }
  0x17   :  { %1087 = vmatprep.subr.bf16.mxu0 %v1213_v25  ;;  %v1253_v16 = vld [vmem:[%s1585_s1 + $0x100] sm:$0xff]   ;;  %v1260_v23 = vld [vmem:[%s1585_s1 + $0x1c8] sm:$0xff]  }
  0x18   :  { %1072 = vmatpush3.bf16.msra.mxu1 %v1212_v24  ;;  %v1259_v24 = vld [vmem:[%s1585_s1 + $0x230] sm:$0xff]   ;;  %v1261_v25 = vld [vmem:[%s1585_s1 + $0x188] sm:$0xff]   ;;  %v1263_v26 = vld [vmem:[%s1585_s1 + $0x1c0] sm:$0xff]  }
  0x19   :  { %1073 = vmatprep.subr.bf16.mxu1 %v1214_v28  ;;  %v1262_v27 = vld [vmem:[%s1585_s1 + $0x228] sm:$0xff]   ;;  %v1264_v28 = vld [vmem:[%s1585_s1 + $0x180] sm:$0xff]  }
  0x1a   :  { %1088 = vmatpush3.bf16.msra.mxu0 %v1215_v29  ;;  %v1265_v29 = vld [vmem:[%s1585_s1 + $0x220] sm:$0xff]  }
  0x1b   :  { %1089 = vmatprep.subr.bf16.mxu0 %v1217_v31  ;;  %v981_v31 = vld.sshfl [vmem:[%s1587_s0 + $0x8] sm:$0x1 pattern:$0x75316420]  ;;  %v1269_v36 = vld [vmem:[%s1585_s1 + $0x200] sm:$0xff]  }
  0x1c   :  { %1074 = vmatpush3.bf16.msra.mxu1 %v1216_v30  ;;  %v295_v30 = vcombine.high %v279_v19, %v279_v19 }
  0x1d   :  { %1075 = vmatprep.subr.bf16.mxu1 %v1218_v33  ;;  %v311_v33 = vrot.slane %v981_v31, %v1392_v32  ;;  %v1268_v32 = vld [vmem:[%s1585_s1 + $0x208] sm:$0xff]  }
  0x1e   :  { %1090 = vmatpush3.bf16.msra.mxu0 %v1219_v34  ;;  %v1266_v34 = vld [vmem:[%s1585_s1 + $0x218] sm:$0xff]  }
  0x1f   :  { %1091 = vmatprep.subr.bf16.mxu0 %v1222_v39 }
  0x20   :  { %1076 = vmatpush3.bf16.msra.mxu1 %v1220_v35  ;;  %v1267_v35 = vld [vmem:[%s1585_s1 + $0x210] sm:$0xff]  }
  0x21   :  { %1105 = vmatprep.subr.bf16.mxu1 %v1224_v42 }
  0x22   :  { %1092 = vmatpush3.bf16.msra.mxu0 %v1223_v40 }
  0x23   :  { %1093 = vmatprep.subr.bf16.mxu0 %v1226_v47  ;;  %786 = vmatmul.mubr.bf16.vlgmr.msra.gmra.mxu1 %v272_v44 }
  0x24   :  { %1106 = vmatpush3.bf16.msra.mxu1 %v1225_v45  ;;  %865 = vmatprep.mubr.bf16.mxu1 %v293_v52 }
  0x25   :  { %1107 = vmatprep.subr.bf16.mxu1 %v1228_v51 }
  0x26   :  { %1094 = vmatpush3.bf16.msra.mxu0 %v1227_v49 }
  0x27   :  { %1095 = vmatprep.subr.bf16.mxu0 %v1230_v54 }
  0x28   :  { %1108 = vmatpush3.bf16.msra.mxu1 %v1229_v53 }
  0x29   :  { %1109 = vmatprep.subr.bf16.mxu1 %v1232_v56 }
  0x2a   :  { %1096 = vmatpush3.bf16.msra.mxu0 %v1231_v55 }
  0x2b   :  { %1097 = vmatprep.subr.bf16.mxu0 %v1234_v58 }
  0x2c   :  { %1110 = vmatpush3.bf16.msra.mxu1 %v1233_v57 }
  0x2d   :  { %1111 = vmatprep.subr.bf16.mxu1 %v1236_v60 }
  0x2e   :  { %1098 = vmatpush3.bf16.msra.mxu0 %v1235_v59 }
  0x2f   :  { %1127 = vmatprep.subr.bf16.mxu0 %v1238_v63 }
  0x30   :  { %1112 = vmatpush3.bf16.msra.mxu1 %v1237_v61 }
  0x31   :  { %826 = vmatmul.mubr.bf16.vlgmr.msra.gmra.mxu0 %v294_v62  ;;  %1113 = vmatprep.subr.bf16.mxu1 %v1239_v1 }
  0x32   :  { %1128 = vmatpush3.bf16.msra.mxu0 %v1240_v2  ;;  %905 = vmatprep.mubr.bf16.mxu0 %v297_v3  ;;  %v1054_v2 = vld [vmem:[%s1588_s2] ss:$0 sm:$0xff] }
  0x33   :  { %1129 = vmatprep.subr.bf16.mxu0 %v1242_v5 }
  0x34   :  { %1114 = vmatpush3.bf16.msra.mxu1 %v1241_v4  ;;  %v1055_v4 = vld [vmem:[%s1589_s5] ss:$0 sm:$0xff] }
  0x35   :  { %1115 = vmatprep.subr.bf16.mxu1 %v1243_v6 }
  0x36   :  { %1130 = vmatpush3.bf16.msra.mxu0 %v1244_v7 }
  0x37   :  { %1131 = vmatprep.subr.bf16.mxu0 %v1246_v9 }
  0x38   :  { %1116 = vmatpush3.bf16.msra.mxu1 %v1245_v8 }
  0x39   :  { %1117 = vmatprep.subr.bf16.mxu1 %v1247_v10 }
  0x3a   :  { %1132 = vmatpush3.bf16.msra.mxu0 %v1248_v11 }
  0x3b   :  { %1133 = vmatprep.subr.bf16.mxu0 %v1250_v13 }
  0x3c   :  { %1118 = vmatpush3.bf16.msra.mxu1 %v1249_v12 }
  0x3d   :  { %1119 = vmatprep.subr.bf16.mxu1 %v1251_v14 }
  0x3e   :  { %1134 = vmatpush3.bf16.msra.mxu0 %v1252_v15 }
  0x3f   :  { %1135 = vmatprep.subr.bf16.mxu0 %v1254_v17 }
  0x40   :  { %1120 = vmatpush3.bf16.msra.mxu1 %v1253_v16 }
  0x41   :  { %1170 = vmatprep.subr.bf16.mxu1 %v1270_v0 }
  0x42   :  { %1136 = vmatpush3.bf16.msra.mxu0 %v1255_v18 }
  0x43   :  { %1137 = vmatprep.subr.bf16.mxu0 %v1257_v20  ;;  %866 = vmatmul.mubr.bf16.vlgmr.msra.gmra.mxu1 %v279_v19 }
  0x44   :  { %1171 = vmatpush3.bf16.msra.mxu1 %v1256_v21  ;;  %1186 = vmatprep.mubr.msk.bf16.mxu1 %vm1271_vm0, %v1270_v0 }
  0x45   :  { %1172 = vmatprep.subr.bf16.mxu1 %v1270_v0 }
  0x46   :  { %1138 = vmatpush3.bf16.msra.mxu0 %v1258_v22 }
  0x47   :  { %1139 = vmatprep.subr.bf16.mxu0 %v1260_v23 }
  0x48   :  { %1173 = vmatpush3.bf16.msra.mxu1 %v1259_v24 }
  0x49   :  { %1174 = vmatprep.subr.bf16.mxu1 %v1270_v0 }
  0x4a   :  { %1140 = vmatpush3.bf16.msra.mxu0 %v1261_v25 }
  0x4b   :  { %1141 = vmatprep.subr.bf16.mxu0 %v1263_v26 }
  0x4c   :  { %1175 = vmatpush3.bf16.msra.mxu1 %v1262_v27 }
  0x4d   :  { %1176 = vmatprep.subr.bf16.mxu1 %v1270_v0 }
  0x4e   :  { %1142 = vmatpush3.bf16.msra.mxu0 %v1264_v28 }
  0x50   :  { %1177 = vmatpush3.bf16.msra.mxu1 %v1265_v29 }
  0x51   :  { %906 = vmatmul.mubr.bf16.vlgmr.msra.gmra.mxu0 %v295_v30  ;;  %1178 = vmatprep.subr.bf16.mxu1 %v1270_v0 }
  0x54   :  { %1179 = vmatpush3.bf16.msra.mxu1 %v1266_v34 }
  0x55   :  { %1180 = vmatprep.subr.bf16.mxu1 %v1270_v0 }
  0x58   :  { %1181 = vmatpush3.bf16.msra.mxu1 %v1267_v35 }
  0x59   :  { %1182 = vmatprep.subr.bf16.mxu1 %v1270_v0 }
  0x5c   :  { %1183 = vmatpush3.bf16.msra.mxu1 %v1268_v32 }
  0x5d   :  { %1184 = vmatprep.subr.bf16.mxu1 %v1270_v0 }
  0x60   :  { %1185 = vmatpush3.bf16.msra.mxu1 %v1269_v36 }
  0x63   :  { %1187 = vmatmul.mubr.bf16.vlgmr.msra.gmra.mxu1 %v311_v33 }
  0xd1   :  { %v241_v37 = vpop.f32.mrf.mxu0 }
  0xd3   :  { %v1168_v38 = vpop.f32.mrf.mxu0 }
  0xd5   :  { %v244_v39 = vpop.f32.mrf.mxu0 }
  0xd7   :  { %v1169_v40 = vpop.f32.mrf.mxu0 }
  0xe3   :  { %v1077_v41 = vpop.f32.mrf.mxu1 }
  0xe5   :  { %v1078_v42 = vpop.f32.mrf.mxu1 }
  0xe6   :  { %v1079_v56 = vadd.f32 %v1078_v42, %v1077_v41 }
  0xe7   :  { %v1080_v43 = vpop.f32.mrf.mxu1 }
  0xe8   :  { %v788_v58 = vadd.f32 %v1079_v56, %v241_v37 }
  0xe9   :  { %v1081_v44 = vpop.f32.mrf.mxu1 }
  0xf1   :  { %v1099_v45 = vpop.f32.mrf.mxu0 }
  0xf3   :  { %v1100_v46 = vpop.f32.mrf.mxu0 }
  0xf4   :  { %v1101_v57 = vadd.f32 %v1100_v46, %v1099_v45 }
  0xf5   :  { %v1102_v47 = vpop.f32.mrf.mxu0 }
  0xf6   :  { %v828_v60 = vadd.f32 %v1101_v57, %v788_v58 }
  0xf7   :  { %v1103_v48 = vpop.f32.mrf.mxu0 }
 0x103   :  { %v1121_v49 = vpop.f32.mrf.mxu1 }
 0x105   :  { %v1122_v50 = vpop.f32.mrf.mxu1 }
 0x106   :  { %v1123_v59 = vadd.f32 %v1122_v50, %v1121_v49 }
 0x107   :  { %v1124_v51 = vpop.f32.mrf.mxu1 }
 0x108   :  { %v868_v62 = vadd.f32 %v1123_v59, %v828_v60 }
 0x109   :  { %v1125_v52 = vpop.f32.mrf.mxu1 }
 0x111   :  { %v1143_v53 = vpop.f32.mrf.mxu0 }
 0x113   :  { %v1144_v0 = vpop.f32.mrf.mxu0 }
 0x114   :  { %v1145_v61 = vadd.f32 %v1144_v0, %v1143_v53 }
 0x115   :  { %v1146_v54 = vpop.f32.mrf.mxu0 }
 0x116   :  { %v908_v63 = vadd.f32 %v1145_v61, %v868_v62 }
 0x117   :  { %v1147_v55 = vpop.f32.mrf.mxu0 }
 0x123   :  { %v947_v1 = vpop.f32.mrf.mxu1 }
 0x124   :  { %v948_v3 = vadd.f32 %v947_v1, %v908_v63 }
 0x125   :  { %v1188_v5 = vpop.f32.mrf.mxu1 }
 0x126   :  { %v960_v6 = vadd.f32 %v1054_v2, %v948_v3 }
 0x127   :  { %v950_v7 = vpop.f32.mrf.mxu1 }
 0x128   :  { %v968_v8 = vadd.f32 %v1055_v4, %v960_v6 }
 0x129   :  { %v1189_v9 = vpop.f32.mrf.mxu1 }
 0x12a   :  { %v969_v10 = vmax.f32 %v968_v8, 0.0 }
 0x12c   :  { %v970_v11 = vpack.c.bf16 %v969_v10, %v969_v10 }
 0x12e   :  { %971 = vst [vmem:[%s1590_s6] sm:$0x1] %v970_v11 }

</bundles_post_ra>
